<compile_context>
chip_gen: v5e
topology: v5e:2x2
jax: 0.10.0
libtpu: 0.0.40
codegen_flags: <defaults>
</compile_context>

<pallas_src>
import functools

import jax
import jax.numpy as jnp
from jax import lax
from jax.experimental import pallas as pl
from jax.experimental.pallas import tpu as pltpu


def _round_up(x, m):
    return (x + m - 1) // m * m


# ---------------------------------------------------------------------------
# One fused kernel per image: stem conv (in-kernel patches) + swish + masked
# global mean pool + _fc + projector.  grid=(N,), batch axis "parallel".
# ---------------------------------------------------------------------------
def _network_fused_kernel(x_ref, wtap_ref, bconv_ref, mask_ref,
                          wcat_ref, bcat_ref, w2_ref, b2_ref,
                          y_ref, feat_ref, *, wp, lout, nc_pad):
    # x_ref:    (1, Cin, Lin)        bf16  zero-padded image, flattened (Hp*Wp)+tail
    # wtap_ref: (9, Cf, Cin)         f32   one (Cf, Cin) slab per 3x3 tap (kh, kw)
    # bconv_ref:(Cf, 1)              f32
    # mask_ref: (1, lout)            f32   1/(H*W) on valid output pixels, else 0
    # wcat_ref: (nc_pad+hidden, Cf)  bf16  [_fc | projector-1] fused, transposed
    # bcat_ref: (nc_pad+hidden, 1)   f32
    # w2_ref:   (dim_pad, hidden)    bf16  projector-2, transposed
    # b2_ref:   (dim_pad, 1)         f32
    # y_ref:    (1, nc_pad, 1)       f32   logits (lane-padded)
    # feat_ref: (1, dim_pad, 1)      f32   projected feature (lane-padded)
    xv = x_ref[0].astype(jnp.float32)            # (Cin, Lin) single aligned load

    # 3x3 SAME conv as 9 statically shifted windows of the padded image:
    # output pixel p0 = h*Wp + w reads xv[:, p0 + kh*Wp + kw].
    acc = None
    for kh in range(3):
        for kw in range(3):
            off = kh * wp + kw                   # static lane offset of this tap
            xs = xv[:, off:off + lout]           # (Cin, lout) shifted window
            part = jnp.dot(wtap_ref[kh * 3 + kw], xs,
                           preferred_element_type=jnp.float32)
            acc = part if acc is None else acc + part
    acc = acc + bconv_ref[...]                   # (Cf, lout) + (Cf, 1)
    act = acc * jax.nn.sigmoid(acc)              # swish in f32 (EUP)

    # Global average pool fused in (mask folds validity and the 1/(H*W) scale).
    pooled = jnp.sum(act * mask_ref[...], axis=1, keepdims=True)      # (Cf, 1)

    # Head: _dropout(eval)=identity; _fc and projector-1 share one MXU dot.
    pooled_bf = pooled.astype(jnp.bfloat16)
    z = jnp.dot(wcat_ref[...], pooled_bf,
                preferred_element_type=jnp.float32) + bcat_ref[...]   # (nc_pad+hidden, 1)
    y_ref[0] = z[:nc_pad, :]                                          # logits
    h = z[nc_pad:, :].astype(jnp.bfloat16)                            # (hidden, 1)
    feat_ref[0] = (jnp.dot(w2_ref[...], h, preferred_element_type=jnp.float32)
                   + b2_ref[...])                                     # (dim_pad, 1)


def network_forward(x, params, num_classes=7, dim=32, project=True):
    """x: (N, Cin, H, W) f32 -> (feature (N, dim), logits (N, num_classes))."""
    N, Cin, H, W = x.shape
    Cf = params["w_conv"].shape[0]
    hidden = params["w_p1"].shape[1]

    Hp, Wp = H + 2, W + 2
    lout = _round_up((H - 1) * Wp + W, 128)          # lane-dense output width
    lin = _round_up(max(Hp * Wp, lout + 2 * Wp + 2), 128)
    nc_pad = _round_up(num_classes, 128)
    dim_pad = _round_up(dim, 128)
    nh = nc_pad + hidden

    # ---- input prep: bf16 cast first, zero-pad, flatten; no transpose,
    #      no im2col patch tensor in HBM ----
    x_pad = jnp.pad(x.astype(jnp.bfloat16), ((0, 0), (0, 0), (1, 1), (1, 1)))
    x_flat = x_pad.reshape(N, Cin, Hp * Wp)
    x_flat = jnp.pad(x_flat, ((0, 0), (0, 0), (0, lin - Hp * Wp)))

    # Validity mask (garbage lanes: pad columns / pad rows / tail) with the
    # 1/(H*W) mean scale folded in.
    p = jnp.arange(lout)
    valid = ((p % Wp) < W) & ((p // Wp) < H)
    mask = (valid.astype(jnp.float32) / float(H * W)).reshape(1, lout)

    # Conv weight as 9 (Cf, Cin) tap slabs, ordered k = kh*3 + kw.
    w_taps = jnp.transpose(params["w_conv"], (2, 3, 0, 1)).reshape(9, Cf, Cin)
    w_taps = w_taps.astype(jnp.float32)
    b_conv = params["b_conv"].reshape(Cf, 1).astype(jnp.float32)

    # Head weights: _fc and projector-1 concatenated (one MXU push), transposed
    # so they consume the pooled column directly; lane-padded to 128.
    w_fc_p = jnp.pad(params["w_fc"], ((0, 0), (0, nc_pad - num_classes)))
    b_fc_p = jnp.pad(params["b_fc"], ((0, 0), (0, nc_pad - num_classes)))
    w_cat = jnp.concatenate([w_fc_p, params["w_p1"]], axis=1).T.astype(jnp.bfloat16)
    b_cat = jnp.concatenate([b_fc_p, params["b_p1"]], axis=1).T.astype(jnp.float32)
    w2 = jnp.pad(params["w_p2"], ((0, 0), (0, dim_pad - dim))).T.astype(jnp.bfloat16)
    b2 = jnp.pad(params["b_p2"], ((0, 0), (0, dim_pad - dim))).T.astype(jnp.float32)

    kernel = functools.partial(_network_fused_kernel,
                               wp=Wp, lout=lout, nc_pad=nc_pad)

    flops = N * (2 * 9 * Cf * Cin * lout + 4 * Cf * lout
                 + 2 * nh * Cf + 2 * dim_pad * hidden)
    transcendentals = N * Cf * lout
    bytes_accessed = (x_flat.size * 2 + w_taps.size * 4 + b_conv.size * 4
                      + mask.size * 4 + w_cat.size * 2 + b_cat.size * 4
                      + w2.size * 2 + b2.size * 4
                      + N * (nc_pad + dim_pad) * 4)

    vmem_need = (2 * Cin * lin * 2                                   # image (dbuf)
                 + 2 * (w_taps.size * 4 + b_conv.size * 4 + mask.size * 4
                        + w_cat.size * 2 + b_cat.size * 4
                        + w2.size * 2 + b2.size * 4)                 # params
                 + 6 * Cf * lout * 4                                 # conv/act temps
                 + 4 * (nc_pad + dim_pad) * 4)                       # head outputs
    vmem_limit = int(min(max(2 * vmem_need, 8 << 20), 32 << 20))

    y_pad, feat_pad = pl.pallas_call(
        kernel,
        out_shape=(jax.ShapeDtypeStruct((N, nc_pad, 1), jnp.float32),
                   jax.ShapeDtypeStruct((N, dim_pad, 1), jnp.float32)),
        grid_spec=pltpu.PrefetchScalarGridSpec(
            num_scalar_prefetch=0,
            grid=(N,),
            in_specs=[
                pl.BlockSpec((1, Cin, lin), lambda n: (n, 0, 0)),
                pl.BlockSpec((9, Cf, Cin), lambda n: (0, 0, 0)),
                pl.BlockSpec((Cf, 1), lambda n: (0, 0)),
                pl.BlockSpec((1, lout), lambda n: (0, 0)),
                pl.BlockSpec((nh, Cf), lambda n: (0, 0)),
                pl.BlockSpec((nh, 1), lambda n: (0, 0)),
                pl.BlockSpec((dim_pad, hidden), lambda n: (0, 0)),
                pl.BlockSpec((dim_pad, 1), lambda n: (0, 0)),
            ],
            out_specs=(pl.BlockSpec((1, nc_pad, 1), lambda n: (n, 0, 0)),
                       pl.BlockSpec((1, dim_pad, 1), lambda n: (n, 0, 0))),
        ),
        compiler_params=pltpu.CompilerParams(
            dimension_semantics=("parallel",),
            vmem_limit_bytes=vmem_limit),
        cost_estimate=pl.CostEstimate(flops=flops,
                                      transcendentals=transcendentals,
                                      bytes_accessed=bytes_accessed),
    )(x_flat, w_taps, b_conv, mask, w_cat, b_cat, w2, b2)

    y = y_pad[:, :num_classes, 0]
    feature = feat_pad[:, :dim, 0]
    if project:
        return feature, y
    return y


# ---------------------------------------------------------------------------
# Parameters (deterministic, synthetic) and pure-JAX reference
# ---------------------------------------------------------------------------
def init_params(key, cin=3, cf=32, num_classes=7, hidden=1024, dim=32):
    ks = jax.random.split(key, 8)
    s = 0.05
    return {
        "w_conv": s * jax.random.normal(ks[0], (cf, cin, 3, 3), jnp.float32),
        "b_conv": s * jax.random.normal(ks[1], (cf,), jnp.float32),
        "w_fc":   s * jax.random.normal(ks[2], (cf, num_classes), jnp.float32),
        "b_fc":   s * jax.random.normal(ks[3], (1, num_classes), jnp.float32),
        "w_p1":   s * jax.random.normal(ks[4], (cf, hidden), jnp.float32),
        "b_p1":   s * jax.random.normal(ks[5], (1, hidden), jnp.float32),
        "w_p2":   s * jax.random.normal(ks[6], (hidden, dim), jnp.float32),
        "b_p2":   s * jax.random.normal(ks[7], (1, dim), jnp.float32),
    }


def reference_forward(x, params):
    conv = lax.conv_general_dilated(
        x, params["w_conv"], window_strides=(1, 1), padding="SAME",
        dimension_numbers=("NCHW", "OIHW", "NCHW"))
    conv = conv + params["b_conv"].reshape(1, -1, 1, 1)
    act = conv * jax.nn.sigmoid(conv)
    pooled = jnp.mean(act, axis=(2, 3))
    y = pooled @ params["w_fc"] + params["b_fc"]
    h = pooled @ params["w_p1"] + params["b_p1"]
    feat = h @ params["w_p2"] + params["b_p2"]
    return feat, y


if __name__ == "__main__":
    key = jax.random.PRNGKey(0)
    k_x, k_p = jax.random.split(key)

    N, Cin, H, W = 2, 3, 16, 16
    num_classes, dim = 7, 32
    x = jax.random.normal(k_x, (N, Cin, H, W), jnp.float32)
    params = init_params(k_p, cin=Cin, cf=32, num_classes=num_classes,
                         hidden=1024, dim=dim)

    fwd = jax.jit(functools.partial(network_forward, num_classes=num_classes,
                                    dim=dim, project=True))
    feature, y = fwd(x, params)
    jax.block_until_ready((feature, y))
    assert feature.shape == (N, dim) and y.shape == (N, num_classes)

    # Regression check against the pure-JAX f32 reference (bf16 MXU tolerance).
    feat_ref, y_ref = reference_forward(x, params)
    assert float(jnp.max(jnp.abs(feature - feat_ref))) < 5e-2
    assert float(jnp.max(jnp.abs(y - y_ref))) < 5e-2

    print("KERNEL_OK")
</pallas_src>

<mosaic_0001>
module attributes {stable_mosaic.version = 11 : i64} {
  func.func @_network_fused_kernel(%arg0: i32, %arg1: memref<1x3x512xbf16, #tpu.memory_space<vmem>>, %arg2: memref<9x32x3xf32, #tpu.memory_space<vmem>>, %arg3: memref<32x1xf32, #tpu.memory_space<vmem>>, %arg4: memref<1x384xf32, #tpu.memory_space<vmem>>, %arg5: memref<1152x32xbf16, #tpu.memory_space<vmem>>, %arg6: memref<1152x1xf32, #tpu.memory_space<vmem>>, %arg7: memref<128x1024xbf16, #tpu.memory_space<vmem>>, %arg8: memref<128x1xf32, #tpu.memory_space<vmem>>, %arg9: memref<1x128x1xf32, #tpu.memory_space<vmem>>, %arg10: memref<1x128x1xf32, #tpu.memory_space<vmem>>) attributes {dimension_semantics = [#tpu.dimension_semantics<parallel>], iteration_bounds = array<i64: 2>, scalar_prefetch = 0 : i64, scratch_operands = 0 : i64, tpu.core_type = #tpu.core_type<tc>, window_params = [{transform_indices = @transform_0, window_bounds = array<i64: 1, 3, 512>}, {pipeline_mode = #tpu.pipeline_mode<synchronous>, transform_indices = @transform_1, window_bounds = array<i64: 9, 32, 3>}, {pipeline_mode = #tpu.pipeline_mode<synchronous>, transform_indices = @transform_2, window_bounds = array<i64: 32, 1>}, {pipeline_mode = #tpu.pipeline_mode<synchronous>, transform_indices = @transform_3, window_bounds = array<i64: 1, 384>}, {pipeline_mode = #tpu.pipeline_mode<synchronous>, transform_indices = @transform_4, window_bounds = array<i64: 1152, 32>}, {pipeline_mode = #tpu.pipeline_mode<synchronous>, transform_indices = @transform_5, window_bounds = array<i64: 1152, 1>}, {pipeline_mode = #tpu.pipeline_mode<synchronous>, transform_indices = @transform_6, window_bounds = array<i64: 128, 1024>}, {pipeline_mode = #tpu.pipeline_mode<synchronous>, transform_indices = @transform_7, window_bounds = array<i64: 128, 1>}, {transform_indices = @transform_8, window_bounds = array<i64: 1, 128, 1>}, {transform_indices = @transform_9, window_bounds = array<i64: 1, 128, 1>}]} {
    %c0 = arith.constant 0 : index
    %c0_0 = arith.constant 0 : index
    %c0_1 = arith.constant 0 : index
    %0 = vector.load %arg1[%c0, %c0_0, %c0_1] : memref<1x3x512xbf16, #tpu.memory_space<vmem>>, vector<1x3x512xbf16>
    %1 = vector.shape_cast %0 : vector<1x3x512xbf16> to vector<3x512xbf16>
    %2 = arith.extf %1 : vector<3x512xbf16> to vector<3x512xf32>
    %3 = vector.extract_strided_slice %2 {offsets = [0, 0], sizes = [3, 384], strides = [1, 1]} : vector<3x512xf32> to vector<3x384xf32>
    %c0_2 = arith.constant 0 : index
    %c0_3 = arith.constant 0 : index
    %c0_4 = arith.constant 0 : index
    %4 = vector.load %arg2[%c0_2, %c0_3, %c0_4] : memref<9x32x3xf32, #tpu.memory_space<vmem>>, vector<1x32x3xf32>
    %5 = vector.shape_cast %4 : vector<1x32x3xf32> to vector<32x3xf32>
    %cst = arith.constant dense<0.000000e+00> : vector<32x384xf32>
    %6 = tpu.matmul %5, %3, %cst {dimension_numbers = #tpu.dot_dimension_numbers<[1], [0], [0], [1], [0, 0, 1, 1], [], []>} : vector<32x3xf32>, vector<3x384xf32>, vector<32x384xf32> -> vector<32x384xf32>
    %7 = vector.extract_strided_slice %2 {offsets = [0, 1], sizes = [3, 384], strides = [1, 1]} : vector<3x512xf32> to vector<3x384xf32>
    %c1 = arith.constant 1 : index
    %c0_5 = arith.constant 0 : index
    %c0_6 = arith.constant 0 : index
    %8 = vector.load %arg2[%c1, %c0_5, %c0_6] : memref<9x32x3xf32, #tpu.memory_space<vmem>>, vector<1x32x3xf32>
    %9 = vector.shape_cast %8 : vector<1x32x3xf32> to vector<32x3xf32>
    %cst_7 = arith.constant dense<0.000000e+00> : vector<32x384xf32>
    %10 = tpu.matmul %9, %7, %cst_7 {dimension_numbers = #tpu.dot_dimension_numbers<[1], [0], [0], [1], [0, 0, 1, 1], [], []>} : vector<32x3xf32>, vector<3x384xf32>, vector<32x384xf32> -> vector<32x384xf32>
    %11 = arith.addf %6, %10 : vector<32x384xf32>
    %12 = vector.extract_strided_slice %2 {offsets = [0, 2], sizes = [3, 384], strides = [1, 1]} : vector<3x512xf32> to vector<3x384xf32>
    %c2 = arith.constant 2 : index
    %c0_8 = arith.constant 0 : index
    %c0_9 = arith.constant 0 : index
    %13 = vector.load %arg2[%c2, %c0_8, %c0_9] : memref<9x32x3xf32, #tpu.memory_space<vmem>>, vector<1x32x3xf32>
    %14 = vector.shape_cast %13 : vector<1x32x3xf32> to vector<32x3xf32>
    %cst_10 = arith.constant dense<0.000000e+00> : vector<32x384xf32>
    %15 = tpu.matmul %14, %12, %cst_10 {dimension_numbers = #tpu.dot_dimension_numbers<[1], [0], [0], [1], [0, 0, 1, 1], [], []>} : vector<32x3xf32>, vector<3x384xf32>, vector<32x384xf32> -> vector<32x384xf32>
    %16 = arith.addf %11, %15 : vector<32x384xf32>
    %17 = vector.extract_strided_slice %2 {offsets = [0, 18], sizes = [3, 384], strides = [1, 1]} : vector<3x512xf32> to vector<3x384xf32>
    %c3 = arith.constant 3 : index
    %c0_11 = arith.constant 0 : index
    %c0_12 = arith.constant 0 : index
    %18 = vector.load %arg2[%c3, %c0_11, %c0_12] : memref<9x32x3xf32, #tpu.memory_space<vmem>>, vector<1x32x3xf32>
    %19 = vector.shape_cast %18 : vector<1x32x3xf32> to vector<32x3xf32>
    %cst_13 = arith.constant dense<0.000000e+00> : vector<32x384xf32>
    %20 = tpu.matmul %19, %17, %cst_13 {dimension_numbers = #tpu.dot_dimension_numbers<[1], [0], [0], [1], [0, 0, 1, 1], [], []>} : vector<32x3xf32>, vector<3x384xf32>, vector<32x384xf32> -> vector<32x384xf32>
    %21 = arith.addf %16, %20 : vector<32x384xf32>
    %22 = vector.extract_strided_slice %2 {offsets = [0, 19], sizes = [3, 384], strides = [1, 1]} : vector<3x512xf32> to vector<3x384xf32>
    %c4 = arith.constant 4 : index
    %c0_14 = arith.constant 0 : index
    %c0_15 = arith.constant 0 : index
    %23 = vector.load %arg2[%c4, %c0_14, %c0_15] : memref<9x32x3xf32, #tpu.memory_space<vmem>>, vector<1x32x3xf32>
    %24 = vector.shape_cast %23 : vector<1x32x3xf32> to vector<32x3xf32>
    %cst_16 = arith.constant dense<0.000000e+00> : vector<32x384xf32>
    %25 = tpu.matmul %24, %22, %cst_16 {dimension_numbers = #tpu.dot_dimension_numbers<[1], [0], [0], [1], [0, 0, 1, 1], [], []>} : vector<32x3xf32>, vector<3x384xf32>, vector<32x384xf32> -> vector<32x384xf32>
    %26 = arith.addf %21, %25 : vector<32x384xf32>
    %27 = vector.extract_strided_slice %2 {offsets = [0, 20], sizes = [3, 384], strides = [1, 1]} : vector<3x512xf32> to vector<3x384xf32>
    %c5 = arith.constant 5 : index
    %c0_17 = arith.constant 0 : index
    %c0_18 = arith.constant 0 : index
    %28 = vector.load %arg2[%c5, %c0_17, %c0_18] : memref<9x32x3xf32, #tpu.memory_space<vmem>>, vector<1x32x3xf32>
    %29 = vector.shape_cast %28 : vector<1x32x3xf32> to vector<32x3xf32>
    %cst_19 = arith.constant dense<0.000000e+00> : vector<32x384xf32>
    %30 = tpu.matmul %29, %27, %cst_19 {dimension_numbers = #tpu.dot_dimension_numbers<[1], [0], [0], [1], [0, 0, 1, 1], [], []>} : vector<32x3xf32>, vector<3x384xf32>, vector<32x384xf32> -> vector<32x384xf32>
    %31 = arith.addf %26, %30 : vector<32x384xf32>
    %32 = vector.extract_strided_slice %2 {offsets = [0, 36], sizes = [3, 384], strides = [1, 1]} : vector<3x512xf32> to vector<3x384xf32>
    %c6 = arith.constant 6 : index
    %c0_20 = arith.constant 0 : index
    %c0_21 = arith.constant 0 : index
    %33 = vector.load %arg2[%c6, %c0_20, %c0_21] : memref<9x32x3xf32, #tpu.memory_space<vmem>>, vector<1x32x3xf32>
    %34 = vector.shape_cast %33 : vector<1x32x3xf32> to vector<32x3xf32>
    %cst_22 = arith.constant dense<0.000000e+00> : vector<32x384xf32>
    %35 = tpu.matmul %34, %32, %cst_22 {dimension_numbers = #tpu.dot_dimension_numbers<[1], [0], [0], [1], [0, 0, 1, 1], [], []>} : vector<32x3xf32>, vector<3x384xf32>, vector<32x384xf32> -> vector<32x384xf32>
    %36 = arith.addf %31, %35 : vector<32x384xf32>
    %37 = vector.extract_strided_slice %2 {offsets = [0, 37], sizes = [3, 384], strides = [1, 1]} : vector<3x512xf32> to vector<3x384xf32>
    %c7 = arith.constant 7 : index
    %c0_23 = arith.constant 0 : index
    %c0_24 = arith.constant 0 : index
    %38 = vector.load %arg2[%c7, %c0_23, %c0_24] : memref<9x32x3xf32, #tpu.memory_space<vmem>>, vector<1x32x3xf32>
    %39 = vector.shape_cast %38 : vector<1x32x3xf32> to vector<32x3xf32>
    %cst_25 = arith.constant dense<0.000000e+00> : vector<32x384xf32>
    %40 = tpu.matmul %39, %37, %cst_25 {dimension_numbers = #tpu.dot_dimension_numbers<[1], [0], [0], [1], [0, 0, 1, 1], [], []>} : vector<32x3xf32>, vector<3x384xf32>, vector<32x384xf32> -> vector<32x384xf32>
    %41 = arith.addf %36, %40 : vector<32x384xf32>
    %42 = vector.extract_strided_slice %2 {offsets = [0, 38], sizes = [3, 384], strides = [1, 1]} : vector<3x512xf32> to vector<3x384xf32>
    %c8 = arith.constant 8 : index
    %c0_26 = arith.constant 0 : index
    %c0_27 = arith.constant 0 : index
    %43 = vector.load %arg2[%c8, %c0_26, %c0_27] : memref<9x32x3xf32, #tpu.memory_space<vmem>>, vector<1x32x3xf32>
    %44 = vector.shape_cast %43 : vector<1x32x3xf32> to vector<32x3xf32>
    %cst_28 = arith.constant dense<0.000000e+00> : vector<32x384xf32>
    %45 = tpu.matmul %44, %42, %cst_28 {dimension_numbers = #tpu.dot_dimension_numbers<[1], [0], [0], [1], [0, 0, 1, 1], [], []>} : vector<32x3xf32>, vector<3x384xf32>, vector<32x384xf32> -> vector<32x384xf32>
    %46 = arith.addf %41, %45 : vector<32x384xf32>
    %c0_29 = arith.constant 0 : index
    %c0_30 = arith.constant 0 : index
    %47 = vector.load %arg3[%c0_29, %c0_30] : memref<32x1xf32, #tpu.memory_space<vmem>>, vector<32x1xf32>
    %48 = vector.broadcast %47 : vector<32x1xf32> to vector<32x384xf32>
    %49 = arith.addf %46, %48 : vector<32x384xf32>
    %50 = arith.negf %49 : vector<32x384xf32>
    %51 = math.exp %50 : vector<32x384xf32>
    %cst_31 = arith.constant 1.000000e+00 : f32
    %52 = vector.broadcast %cst_31 : f32 to vector<32x384xf32>
    %53 = arith.addf %52, %51 : vector<32x384xf32>
    %54 = arith.divf %52, %53 : vector<32x384xf32>
    %55 = arith.mulf %49, %54 : vector<32x384xf32>
    %c0_32 = arith.constant 0 : index
    %c0_33 = arith.constant 0 : index
    %56 = vector.load %arg4[%c0_32, %c0_33] : memref<1x384xf32, #tpu.memory_space<vmem>>, vector<1x384xf32>
    %57 = vector.broadcast %56 : vector<1x384xf32> to vector<32x384xf32>
    %58 = arith.mulf %55, %57 : vector<32x384xf32>
    %cst_34 = arith.constant dense<0.000000e+00> : vector<32xf32>
    %59 = vector.multi_reduction <add>, %58, %cst_34 [1] : vector<32x384xf32> to vector<32xf32>
    %60 = vector.shape_cast %59 : vector<32xf32> to vector<32x1xf32>
    %61 = arith.truncf %60 : vector<32x1xf32> to vector<32x1xbf16>
    %c0_35 = arith.constant 0 : index
    %c0_36 = arith.constant 0 : index
    %62 = vector.load %arg5[%c0_35, %c0_36] : memref<1152x32xbf16, #tpu.memory_space<vmem>>, vector<1152x32xbf16>
    %cst_37 = arith.constant dense<0.000000e+00> : vector<1152x1xf32>
    %63 = tpu.matmul %62, %61, %cst_37 {dimension_numbers = #tpu.dot_dimension_numbers<[1], [0], [0], [1], [0, 0, 1, 1], [], []>} : vector<1152x32xbf16>, vector<32x1xbf16>, vector<1152x1xf32> -> vector<1152x1xf32>
    %c0_38 = arith.constant 0 : index
    %c0_39 = arith.constant 0 : index
    %64 = vector.load %arg6[%c0_38, %c0_39] : memref<1152x1xf32, #tpu.memory_space<vmem>>, vector<1152x1xf32>
    %65 = arith.addf %63, %64 : vector<1152x1xf32>
    %66 = vector.extract_strided_slice %65 {offsets = [0, 0], sizes = [128, 1], strides = [1, 1]} : vector<1152x1xf32> to vector<128x1xf32>
    %c0_40 = arith.constant 0 : index
    %c0_41 = arith.constant 0 : index
    %c0_42 = arith.constant 0 : index
    %67 = vector.load %arg9[%c0_40, %c0_41, %c0_42] : memref<1x128x1xf32, #tpu.memory_space<vmem>>, vector<1x128x1xf32>
    %68 = vector.shape_cast %67 : vector<1x128x1xf32> to vector<128x1xf32>
    %69 = vector.shape_cast %66 : vector<128x1xf32> to vector<1x128x1xf32>
    tpu.vector_store %arg9[%c0_40, %c0_41, %c0_42], %69 {strides = array<i32>} : memref<1x128x1xf32, #tpu.memory_space<vmem>>, vector<1x128x1xf32>,
    %70 = vector.extract_strided_slice %65 {offsets = [128, 0], sizes = [1024, 1], strides = [1, 1]} : vector<1152x1xf32> to vector<1024x1xf32>
    %71 = arith.truncf %70 : vector<1024x1xf32> to vector<1024x1xbf16>
    %c0_43 = arith.constant 0 : index
    %c0_44 = arith.constant 0 : index
    %72 = vector.load %arg7[%c0_43, %c0_44] : memref<128x1024xbf16, #tpu.memory_space<vmem>>, vector<128x1024xbf16>
    %cst_45 = arith.constant dense<0.000000e+00> : vector<128x1xf32>
    %73 = tpu.matmul %72, %71, %cst_45 {dimension_numbers = #tpu.dot_dimension_numbers<[1], [0], [0], [1], [0, 0, 1, 1], [], []>} : vector<128x1024xbf16>, vector<1024x1xbf16>, vector<128x1xf32> -> vector<128x1xf32>
    %c0_46 = arith.constant 0 : index
    %c0_47 = arith.constant 0 : index
    %74 = vector.load %arg8[%c0_46, %c0_47] : memref<128x1xf32, #tpu.memory_space<vmem>>, vector<128x1xf32>
    %75 = arith.addf %73, %74 : vector<128x1xf32>
    %c0_48 = arith.constant 0 : index
    %c0_49 = arith.constant 0 : index
    %c0_50 = arith.constant 0 : index
    %76 = vector.load %arg10[%c0_48, %c0_49, %c0_50] : memref<1x128x1xf32, #tpu.memory_space<vmem>>, vector<1x128x1xf32>
    %77 = vector.shape_cast %76 : vector<1x128x1xf32> to vector<128x1xf32>
    %78 = vector.shape_cast %75 : vector<128x1xf32> to vector<1x128x1xf32>
    tpu.vector_store %arg10[%c0_48, %c0_49, %c0_50], %78 {strides = array<i32>} : memref<1x128x1xf32, #tpu.memory_space<vmem>>, vector<1x128x1xf32>,
    return
  }
  func.func @transform_0(%arg0: i32) -> (i32, i32, i32) {
    %c0_i32 = arith.constant 0 : i32
    %c0_i32_0 = arith.constant 0 : i32
    %c0_i32_1 = arith.constant 0 : i32
    return %arg0, %c0_i32, %c0_i32_0 : i32, i32, i32
  }
  func.func @transform_1(%arg0: i32) -> (i32, i32, i32) {
    %c0_i32 = arith.constant 0 : i32
    %c0_i32_0 = arith.constant 0 : i32
    %c0_i32_1 = arith.constant 0 : i32
    %c0_i32_2 = arith.constant 0 : i32
    return %c0_i32, %c0_i32_0, %c0_i32_1 : i32, i32, i32
  }
  func.func @transform_2(%arg0: i32) -> (i32, i32) {
    %c0_i32 = arith.constant 0 : i32
    %c0_i32_0 = arith.constant 0 : i32
    %c0_i32_1 = arith.constant 0 : i32
    return %c0_i32, %c0_i32_0 : i32, i32
  }
  func.func @transform_3(%arg0: i32) -> (i32, i32) {
    %c0_i32 = arith.constant 0 : i32
    %c0_i32_0 = arith.constant 0 : i32
    %c0_i32_1 = arith.constant 0 : i32
    return %c0_i32, %c0_i32_0 : i32, i32
  }
  func.func @transform_4(%arg0: i32) -> (i32, i32) {
    %c0_i32 = arith.constant 0 : i32
    %c0_i32_0 = arith.constant 0 : i32
    %c0_i32_1 = arith.constant 0 : i32
    return %c0_i32, %c0_i32_0 : i32, i32
  }
  func.func @transform_5(%arg0: i32) -> (i32, i32) {
    %c0_i32 = arith.constant 0 : i32
    %c0_i32_0 = arith.constant 0 : i32
    %c0_i32_1 = arith.constant 0 : i32
    return %c0_i32, %c0_i32_0 : i32, i32
  }
  func.func @transform_6(%arg0: i32) -> (i32, i32) {
    %c0_i32 = arith.constant 0 : i32
    %c0_i32_0 = arith.constant 0 : i32
    %c0_i32_1 = arith.constant 0 : i32
    return %c0_i32, %c0_i32_0 : i32, i32
  }
  func.func @transform_7(%arg0: i32) -> (i32, i32) {
    %c0_i32 = arith.constant 0 : i32
    %c0_i32_0 = arith.constant 0 : i32
    %c0_i32_1 = arith.constant 0 : i32
    return %c0_i32, %c0_i32_0 : i32, i32
  }
  func.func @transform_8(%arg0: i32) -> (i32, i32, i32) {
    %c0_i32 = arith.constant 0 : i32
    %c0_i32_0 = arith.constant 0 : i32
    %c0_i32_1 = arith.constant 0 : i32
    return %arg0, %c0_i32, %c0_i32_0 : i32, i32, i32
  }
  func.func @transform_9(%arg0: i32) -> (i32, i32, i32) {
    %c0_i32 = arith.constant 0 : i32
    %c0_i32_0 = arith.constant 0 : i32
    %c0_i32_1 = arith.constant 0 : i32
    return %arg0, %c0_i32, %c0_i32_0 : i32, i32, i32
  }
}

</mosaic_0001>

<bundles_post_ra>
// kernel: network_forward.1
= control target key start
LH: loop header
LB: loop body
LE: loop exit
PB: predicated region body
PF: predicated region fallthrough
CT: control target
= control target key end

     0   :  { %s5201_s30 = smov 0   ;;  %s7904_s0 = inlined_call_operand.vmem [shape: bf16[2,3,512], index: 0, kind: input, shape index: {}]   ;;  %s7905_s1 = inlined_call_operand.vmem [shape: f32[9,32,3], index: 1, kind: input, shape index: {}]   ;;  %s7906_s2 = inlined_call_operand.vmem [shape: f32[32,1], index: 2, kind: input, shape index: {}]   ;;  %s7907_s3 = inlined_call_operand.vmem [shape: f32[1,384], index: 3, kind: input, shape index: {}]   ;;  %s7908_s4 = inlined_call_operand.vmem [shape: bf16[1152,32], index: 4, kind: input, shape index: {}]   ;;  %s7909_s5 = inlined_call_operand.vmem [shape: f32[1152,1], index: 5, kind: input, shape index: {}]   ;;  %s7910_s6 = inlined_call_operand.vmem [shape: bf16[128,1024], index: 6, kind: input, shape index: {}]   ;;  %s7911_s7 = inlined_call_operand.vmem [shape: f32[128,1], index: 7, kind: input, shape index: {}]   ;;  %s7912_s8 = inlined_call_operand.vmem [shape: f32[2,128,1], index: 8, kind: output, shape index: {0}]   ;;  %s7913_s9 = inlined_call_operand.vmem [shape: f32[2,128,1], index: 9, kind: output, shape index: {1}]  }
   0x1 LB: > { %s4110_s10 = sadd.s32 4294967295, %s5140_s30   ;;  %p4114_p0 = scmp.ge.s32.totalorder %s5140_s30, 1  ;;  %s5140_s30 = sphi %s5201_s30, %s20_s30  }
   0x2   : > { %p290_p1 = scmp.lt.s32.totalorder %s5140_s30, 3 }
   0x4   : > { %p291_p2 = pnand %p4114_p0, %p290_p1 }
   0x6   : > { %294 = sbr.rel (%p291_p2) target bundleno = 1673 (0x689), region = 52 }
   0xb   : > { %p331_p3 = scmp.lt.s32.totalorder %s4110_s10, 1  ;;  %s5142_s15 = smov 127   ;;  %vm393_vm0 = vcmask 1042432   ;;  %v5242_v26 = vld [vmem:[%s7905_s1 + $0x8] sm:$0xff]  ;;  %vm380_vm1 = vcmask 23552   ;;  %v5252_v30 = vld [vmem:[%s7905_s1 + $0x10] sm:$0xff] }
   0xc   : > { %s5143_s16 = smov 126   ;;  %s5144_s17 = smov 110   ;;  %v5260_v32 = vld [vmem:[%s7905_s1 + $0x18] sm:$0xff]  ;;  %vm376_vm2 = vcmask 1039360   ;;  %v4121_v40 = vld [vmem:[%s7905_s1 + $0x20] sm:$0xff]  ;;  %v4122_v41 = vld [vmem:[%s7905_s1 + $0x28] sm:$0xff] }
   0xd   : > { %s7965_s10 = smov (!%p331_p3, %s4110_s10), 1  ;;  %s5145_s18 = smov 109   ;;  %vm618_vm3 = vcmask 1031168   ;;  %v4123_v47 = vld [vmem:[%s7905_s1 + $0x30] sm:$0xff]  ;;  %v5294_v50 = vld [vmem:[%s7905_s1 + $0x40] sm:$0xff]  ;;  %v4124_v52 = vld [vmem:[%s7905_s1 + $0x38] sm:$0xff] }
   0xe   : > { %s4918_s11 = sshll.u32 %s7965_s10, 3  ;;  %s5146_s19 = smov 108   ;;  %v5310_v53 = vld [vmem:[%s7905_s1] sm:$0xff]  ;;  %v5315_v54 = vld [vmem:[%s7905_s1 + $0x48] sm:$0xff]  ;;  %vm759_vm4 = vcmask 900096   ;;  %v5332_v61 = vld [vmem:[%s7905_s1 + $0x50] sm:$0xff] }
   0xf   : > { %s335_s14 = scalar_lea.vmem %s7904_s0, %s4918_s11  ;;  %s5147_s22 = smov 92   ;;  %vm900_vm5 = vcmask 891904   ;;  %vm1041_vm6 = vcmask 883712   ;;  %vm1182_vm7 = vcmask 752640   ;;  %vm1323_vm8 = vcmask 744448  }
  0x10   : > { %v347_v0 = vld [vmem:[%s335_s14] sm:$0xff]  ;;  %s5148_s27 = smov 91   ;;  %s5149_s25 = smov 90   ;;  %vm1464_vm9 = vcmask 736256  }
  0x11   : > { %v5215_v1 = vunpack.c.h.bf16 %v347_v0  ;;  %v5217_v2 = vunpack.c.l.bf16 %v347_v0  ;;  %s4919_s13 = sshll.u32 %s7965_s10, 7 }
  0x12   : > { %s6292_s20 = scalar_lea.vmem %s7912_s8, %s4919_s13  ;;  %s7845_s21 = scalar_lea.vmem %s7913_s9, %s4919_s13 }
  0x13   : > { %363 = vst [vmem:[#allocation1 + $0x10] ss:$2 sm:$0xff] %v5215_v1 }
  0x14   : > { %361 = vst [vmem:[#allocation1] ss:$2 sm:$0xff] %v5217_v2 }
  0x1a   : > { %v366_v3 = vld.sshfl [vmem:[#allocation1 + $0x10] sm:$0xff pattern:$0x75316420]  ;;  %v367_v4 = vld.sshfl [vmem:[#allocation1 + $0x18] sm:$0xff pattern:$0x75316420] }
  0x1b   : > { %372 = vrot.lane.b32.xlu1 %v366_v3, %s5142_s15  ;;  %v364_v5 = vld.sshfl [vmem:[#allocation1] sm:$0xff pattern:$0x75316420]  ;;  %489 = vst [vmem:[#allocation1 + $0x10] ss:$2 sm:$0xff] %v5215_v1 }
  0x1c   : > { %368 = vrot.lane.b32.xlu0 %v364_v5, %s5142_s15  ;;  %v365_v6 = vld.sshfl [vmem:[#allocation1 + $0x8] sm:$0xff pattern:$0x75316420] }
  0x1d   : > { %487 = vst [vmem:[#allocation1] ss:$2 sm:$0xff] %v5217_v2 }
  0x22   : > { %v5223_v7 = vld.sshfl [vmem:[#allocation1 + $0x10] sm:$0xff pattern:$0x75316420] }
  0x23   : > { %374 = vrot.lane.b32.xlu1 %v367_v4, %s5142_s15  ;;  %605 = vst [vmem:[#allocation1 + $0x10] ss:$2 sm:$0xff] %v5215_v1 }
  0x24   : > { %370 = vrot.lane.b32.xlu0 %v365_v6, %s5142_s15  ;;  %v5226_v8 = vld.sshfl [vmem:[#allocation1] sm:$0xff pattern:$0x75316420]  ;;  %v5228_v9 = vld.sshfl [vmem:[#allocation1 + $0x8] sm:$0xff pattern:$0x75316420] }
  0x25   : > { %603 = vst [vmem:[#allocation1] ss:$2 sm:$0xff] %v5217_v2  ;;  %5059 = vmatpush.msk.msra.mxu3 %vm393_vm0, %v5226_v8  ;;  %v4174_v6 = vld [vmem:[%s7905_s1 + $0x60] sm:$0xff] }
  0x26   : > { %4142 = vmatmul.msk.f32.vlgmr.msra.gmra.mxu3 %vm380_vm1, %v5242_v26 }
  0x2a   : > { %v608_v10 = vld.sshfl [vmem:[#allocation1 + $0x10] sm:$0xff pattern:$0x75316420]  ;;  %v609_v11 = vld.sshfl [vmem:[#allocation1 + $0x18] sm:$0xff pattern:$0x75316420] }
  0x2b   : > { %746 = vst [vmem:[#allocation1 + $0x10] ss:$2 sm:$0xff] %v5215_v1 }
  0x2c   : > { %614 = vrot.lane.b32.xlu0 %v608_v10, %s5143_s16  ;;  %v606_v12 = vld.sshfl [vmem:[#allocation1] sm:$0xff pattern:$0x75316420]  ;;  %v607_v13 = vld.sshfl [vmem:[#allocation1 + $0x8] sm:$0xff pattern:$0x75316420] }
  0x2d   : > { %610 = vrot.lane.b32.xlu2 %v606_v12, %s5143_s16  ;;  %744 = vst [vmem:[#allocation1] ss:$2 sm:$0xff] %v5217_v2 }
  0x2e   : > { %4143 = vmatmul.msk.f32.gmra.mxu3 %vm380_vm1, %v5252_v30 }
  0x32   : > { %v749_v14 = vld.sshfl [vmem:[#allocation1 + $0x10] sm:$0xff pattern:$0x75316420]  ;;  %v750_v15 = vld.sshfl [vmem:[#allocation1 + $0x18] sm:$0xff pattern:$0x75316420] }
  0x33   : > { %887 = vst [vmem:[#allocation1 + $0x10] ss:$2 sm:$0xff] %v5215_v1 }
  0x34   : > { %v748_v16 = vld.sshfl [vmem:[#allocation1 + $0x8] sm:$0xff pattern:$0x75316420]  ;;  %616 = vrot.lane.b32.xlu0 %v609_v11, %s5143_s16  ;;  %v747_v17 = vld.sshfl [vmem:[#allocation1] sm:$0xff pattern:$0x75316420] }
  0x35   : > { %612 = vrot.lane.b32.xlu2 %v607_v13, %s5143_s16  ;;  %753 = vrot.lane.b32.xlu1 %v748_v16, %s5144_s17  ;;  %885 = vst [vmem:[#allocation1] ss:$2 sm:$0xff] %v5217_v2  ;;  %v4175_v11 = vld [vmem:[%s7905_s1 + $0x68] sm:$0xff] }
  0x36   : > { %4144 = vmatmul.msk.f32.gmra.mxu3 %vm380_vm1, %v5260_v32 }
  0x3a   : > { %v891_v18 = vld.sshfl [vmem:[#allocation1 + $0x18] sm:$0xff pattern:$0x75316420]  ;;  %v890_v19 = vld.sshfl [vmem:[#allocation1 + $0x10] sm:$0xff pattern:$0x75316420] }
  0x3b   : > { %1028 = vst [vmem:[#allocation1 + $0x10] ss:$2 sm:$0xff] %v5215_v1 }
  0x3c   : > { %v888_v20 = vld.sshfl [vmem:[#allocation1] sm:$0xff pattern:$0x75316420]  ;;  %v889_v21 = vld.sshfl [vmem:[#allocation1 + $0x8] sm:$0xff pattern:$0x75316420]  ;;  %896 = vrot.lane.b32.xlu0 %v890_v19, %s5145_s18 }
  0x3d   : > { %755 = vrot.lane.b32.xlu2 %v749_v14, %s5144_s17  ;;  %751 = vrot.lane.b32.xlu1 %v747_v17, %s5144_s17  ;;  %1026 = vst [vmem:[#allocation1] ss:$2 sm:$0xff] %v5217_v2  ;;  %v4176_v17 = vld [vmem:[%s7905_s1 + $0x70] sm:$0xff] }
  0x42   : > { %v1031_v22 = vld.sshfl [vmem:[#allocation1 + $0x10] sm:$0xff pattern:$0x75316420]  ;;  %v1032_v23 = vld.sshfl [vmem:[#allocation1 + $0x18] sm:$0xff pattern:$0x75316420] }
  0x43   : > { %1169 = vst [vmem:[#allocation1 + $0x10] ss:$2 sm:$0xff] %v5215_v1 }
  0x44   : > { %894 = vrot.lane.b32.xlu0 %v889_v21, %s5145_s18  ;;  %v1029_v24 = vld.sshfl [vmem:[#allocation1] sm:$0xff pattern:$0x75316420]  ;;  %v1030_v25 = vld.sshfl [vmem:[#allocation1 + $0x8] sm:$0xff pattern:$0x75316420] }
  0x45   : > { %757 = vrot.lane.b32.xlu2 %v750_v15, %s5144_s17  ;;  %898 = vrot.lane.b32.xlu1 %v891_v18, %s5145_s18  ;;  %1167 = vst [vmem:[#allocation1] ss:$2 sm:$0xff] %v5217_v2  ;;  %v5405_v21 = vld [vmem:[%s7905_s1 + $0xa0] sm:$0xff] }
  0x4a   : > { %v1172_v28 = vld.sshfl [vmem:[#allocation1 + $0x10] sm:$0xff pattern:$0x75316420]  ;;  %v1173_v29 = vld.sshfl [vmem:[#allocation1 + $0x18] sm:$0xff pattern:$0x75316420] }
  0x4b   : > { %1310 = vst [vmem:[#allocation1 + $0x10] ss:$2 sm:$0xff] %v5215_v1 }
  0x4c   : > { %v1171_v27 = vld.sshfl [vmem:[#allocation1 + $0x8] sm:$0xff pattern:$0x75316420]  ;;  %v1170_v31 = vld.sshfl [vmem:[#allocation1] sm:$0xff pattern:$0x75316420] }
  0x4d   : > { %1033 = vrot.lane.b32.xlu1 %v1029_v24, %s5146_s19  ;;  %892 = vrot.lane.b32.xlu2 %v888_v20, %s5145_s18  ;;  %1308 = vst [vmem:[#allocation1] ss:$2 sm:$0xff] %v5217_v2  ;;  %v4177_v20 = vld [vmem:[%s7905_s1 + $0x78] sm:$0xff] }
  0x4e   : > { %1174 = vrot.lane.b32.xlu0 %v1170_v31, %s5147_s22 }
  0x52   : > { %v1313_v36 = vld.sshfl [vmem:[#allocation1 + $0x10] sm:$0xff pattern:$0x75316420]  ;;  %v1314_v46 = vld.sshfl [vmem:[#allocation1 + $0x18] sm:$0xff pattern:$0x75316420] }
  0x53   : > { %1451 = vst [vmem:[#allocation1 + $0x10] ss:$2 sm:$0xff] %v5215_v1  ;;  %v4158_v1 = vld [vmem:[%s7905_s1 + $0x58] sm:$0xff] }
  0x54   : > { %v1312_v62 = vld.sshfl [vmem:[#allocation1 + $0x8] sm:$0xff pattern:$0x75316420]  ;;  %v1311_v63 = vld.sshfl [vmem:[#allocation1] sm:$0xff pattern:$0x75316420] }
  0x55   : > { %1035 = vrot.lane.b32.xlu2 %v1030_v25, %s5146_s19  ;;  %1176 = vrot.lane.b32.xlu1 %v1171_v27, %s5147_s22  ;;  %1449 = vst [vmem:[#allocation1] ss:$2 sm:$0xff] %v5217_v2 }
  0x56   : > { %1039 = vrot.lane.b32.xlu0 %v1032_v23, %s5146_s19  ;;  %v5417_v23 = vld [vmem:[%s7905_s1 + $0xa8] sm:$0xff] }
  0x5a   : > { %v1454_v0 = vld.sshfl [vmem:[#allocation1 + $0x10] sm:$0xff pattern:$0x75316420]  ;;  %v1455_v19 = vld.sshfl [vmem:[#allocation1 + $0x18] sm:$0xff pattern:$0x75316420] }
  0x5c   : > { %v1453_v2 = vld.sshfl [vmem:[#allocation1 + $0x8] sm:$0xff pattern:$0x75316420]  ;;  %v1452_v4 = vld.sshfl [vmem:[#allocation1] sm:$0xff pattern:$0x75316420] }
  0x5d   : > { %1037 = vrot.lane.b32.xlu2 %v1031_v22, %s5146_s19  ;;  %1178 = vrot.lane.b32.xlu1 %v1172_v28, %s5147_s22 }
  0x5e   : > { %1319 = vrot.lane.b32.xlu0 %v1313_v36, %s5148_s27  ;;  %v4195_v36 = vld [vmem:[%s7905_s1 + $0x90] sm:$0xff] }
  0x65   : > { %1180 = vrot.lane.b32.xlu1 %v1173_v29, %s5147_s22  ;;  %1317 = vrot.lane.b32.xlu2 %v1312_v62, %s5148_s27  ;;  %v4193_v29 = vld [vmem:[%s7905_s1 + $0x80] sm:$0xff]  ;;  %v5548_v62 = vld [vmem:[%s7905_s1 + $0xe8] sm:$0xff] }
  0x66   : > { %1321 = vrot.lane.b32.xlu0 %v1314_v46, %s5148_s27 }
  0x6d   : > { %1460 = vrot.lane.b32.xlu1 %v1454_v0, %s5149_s25  ;;  %1315 = vrot.lane.b32.xlu2 %v1311_v63, %s5148_s27 }
  0x6e   : > { %1456 = vrot.lane.b32.xlu0 %v1452_v4, %s5149_s25 }
  0x75   : > { %1458 = vrot.lane.b32.xlu1 %v1453_v2, %s5149_s25  ;;  %1462 = vrot.lane.b32.xlu2 %v1455_v19, %s5149_s25 }
  0x87   : > { %v611_v34 = vpop.permute.xlu2 %610 }
  0x8d   : > { %v373_v33 = vpop.permute.xlu1 %372 }
  0x8e   : > { %v369_v35 = vpop.permute.xlu0 %368 }
  0x8f   : > { %v613_v44 = vpop.permute.xlu2 %612 }
  0x90   : > { %v619_v45 = vsel %vm618_vm3, %v611_v34, %v613_v44 }
  0x95   : > { %v375_v37 = vpop.permute.xlu1 %374 }
  0x96   : > { %v371_v38 = vpop.permute.xlu0 %370  ;;  %v379_v39 = vsel %vm376_vm2, %v373_v33, %v375_v37  ;;  %v5464_v37 = vld [vmem:[%s7905_s1 + $0xc0] sm:$0xff] }
  0x97   : > { %v377_v42 = vsel %vm376_vm2, %v369_v35, %v371_v38  ;;  %5058 = vmatpush.msk.msra.mxu2 %vm393_vm0, %v379_v39  ;;  %v378_v43 = vsel %vm376_vm2, %v371_v38, %v373_v33  ;;  %v756_v51 = vpop.permute.xlu2 %755  ;;  %v5450_v33 = vld [vmem:[%s7905_s1 + $0xb8] sm:$0xff] }
  0x98   : > { %4125 = vmatpush.msk.msra.mxu0 %vm393_vm0, %v377_v42  ;;  %5057 = vmatpush.msk.msra.mxu1 %vm393_vm0, %v377_v42 }
  0x99   : > { %4126 = vmatmul.msk.f32.vlgmr.msra.gmra.mxu0 %vm380_vm1, %v4121_v40  ;;  %4127 = vmatmul.msk.f32.vlgmr.msra.gmra.mxu1 %vm380_vm1, %v4122_v41 }
  0x9a   : > { %4130 = vmatpush.msk.msrb.mxu1 %vm393_vm0, %v378_v43  ;;  %4137 = vmatmul.msk.f32.vlgmr.msra.gmra.mxu2 %vm380_vm1, %v4122_v41 }
  0x9b   : > { %4135 = vmatpush.msk.msrb.mxu0 %vm393_vm0, %v379_v39  ;;  %4159 = vmatpush.msk.msrb.mxu2 %vm393_vm0, %v619_v45  ;;  %v4196_v39 = vld [vmem:[%s7905_s1 + $0x98] sm:$0xff] }
  0x9c   : > { %4150 = vmatpush.msk.msra.mxu1 %vm393_vm0, %v5223_v7 }
  0x9d   : > { %4140 = vmatpush.msk.msra.mxu0 %vm393_vm0, %v5226_v8 }
  0x9e   : > { %v615_v48 = vpop.permute.xlu0 %614 }
  0x9f   : > { %v620_v49 = vsel %vm618_vm3, %v613_v44, %v615_v48  ;;  %v758_v55 = vpop.permute.xlu2 %757  ;;  %v5490_v44 = vld [vmem:[%s7905_s1 + $0xd0] sm:$0xff] }
  0xa0   : > { %4164 = vmatpush.msk.msrb.mxu3 %vm393_vm0, %v620_v49  ;;  %v762_v57 = vsel %vm759_vm4, %v756_v51, %v758_v55 }
  0xa1   : > { %4128 = vmatmul.msk.f32.gmra.mxu1 %vm380_vm1, %v4123_v47  ;;  %4136 = vmatmul.msk.f32.vlgmr.msrb.gmra.mxu0 %vm380_vm1, %v4121_v40 }
  0xa2   : > { %4138 = vmatmul.msk.f32.gmra.mxu2 %vm380_vm1, %v4123_v47  ;;  %4165 = vmatmul.msk.f32.vlgmr.msrb.gmra.mxu3 %vm380_vm1, %v5294_v50 }
  0xa3   : > { %4145 = vmatpush.msk.msrb.mxu0 %vm393_vm0, %v5228_v9  ;;  %4188 = vmatpush.msk.msra.mxu3 %vm393_vm0, %v762_v57  ;;  %v5532_v57 = vld [vmem:[%s7905_s1 + $0xe0] sm:$0xff] }
  0xa6   : > { %v617_v59 = vpop.permute.xlu0 %616 }
  0xa7   : > { %v754_v56 = vpop.permute.xlu1 %753  ;;  %v621_v60 = vsel %vm618_vm3, %v615_v48, %v617_v59  ;;  %v893_v8 = vpop.permute.xlu2 %892 }
  0xa8   : > { %v761_v58 = vsel %vm759_vm4, %v754_v56, %v756_v51 }
  0xa9   : > { %4129 = vmatmul.msk.f32.gmra.mxu1 %vm380_vm1, %v4124_v52  ;;  %4141 = vmatmul.msk.f32.vlgmr.msra.gmra.mxu0 %vm380_vm1, %v5310_v53 }
  0xaa   : > { %4139 = vmatmul.msk.f32.gmra.mxu2 %vm380_vm1, %v4124_v52  ;;  %4166 = vmatmul.msk.f32.gmra.mxu3 %vm380_vm1, %v5315_v54 }
  0xab   : > { %4183 = vmatpush.msk.msra.mxu2 %vm393_vm0, %v761_v58  ;;  %4169 = vmatpush.msk.msra.mxu0 %vm393_vm0, %v621_v60 }
  0xae   : > { %v897_v9 = vpop.permute.xlu0 %896 }
  0xaf   : > { %v752_v3 = vpop.permute.xlu1 %751  ;;  %v1036_v12 = vpop.permute.xlu2 %1035 }
  0xb0   : > { %v760_v5 = vsel %vm759_vm4, %v752_v3, %v754_v56 }
  0xb1   : > { %4131 = vmatmul.msk.f32.vlgmr.msrb.gmra.mxu1 %vm380_vm1, %v4121_v40  ;;  %4146 = vmatmul.msk.f32.vlgmr.msrb.gmra.mxu0 %vm380_vm1, %v5310_v53  ;;  %v5478_v40 = vld [vmem:[%s7905_s1 + $0xc8] sm:$0xff] }
  0xb2   : > { %4160 = vmatmul.msk.f32.vlgmr.msrb.gmra.mxu2 %vm380_vm1, %v5294_v50  ;;  %4167 = vmatmul.msk.f32.gmra.mxu3 %vm380_vm1, %v5332_v61 }
  0xb3   : > { %4178 = vmatpush.msk.msrb.mxu1 %vm393_vm0, %v760_v5 }
  0xb6   : > { %v895_v15 = vpop.permute.xlu0 %894 }
  0xb7   : > { %v899_v7 = vpop.permute.xlu1 %898  ;;  %v901_v16 = vsel %vm900_vm5, %v893_v8, %v895_v15  ;;  %v902_v18 = vsel %vm900_vm5, %v895_v15, %v897_v9  ;;  %v1038_v24 = vpop.permute.xlu2 %1037 }
  0xb8   : > { %v903_v10 = vsel %vm900_vm5, %v897_v9, %v899_v7  ;;  %4197 = vmatpush.msk.msrb.mxu0 %vm393_vm0, %v901_v16  ;;  %v1043_v25 = vsel %vm1041_vm6, %v1036_v12, %v1038_v24  ;;  %v5566_v7 = vld [vmem:[%s7905_s1 + $0xf0] sm:$0xff] }
  0xb9   : > { %4132 = vmatmul.msk.f32.gmra.mxu1 %vm380_vm1, %v4122_v41  ;;  %4147 = vmatmul.msk.f32.gmra.mxu0 %vm380_vm1, %v5242_v26  ;;  %v5482_v41 = vpop.f32.mrf.mxu3 }
  0xba   : > { %4161 = vmatmul.msk.f32.gmra.mxu2 %vm380_vm1, %v5315_v54  ;;  %4168 = vmatmul.msk.f32.gmra.mxu3 %vm380_vm1, %v4158_v1 }
  0xbb   : > { %4207 = vmatpush.msk.msrb.mxu2 %vm393_vm0, %v903_v10 }
  0xbf   : > { %v1034_v13 = vpop.permute.xlu1 %1033  ;;  %v1318_v43 = vpop.permute.xlu2 %1317 }
  0xc0   : > { %v1042_v14 = vsel %vm1041_vm6, %v1034_v13, %v1036_v12  ;;  %v1175_v28 = vpop.permute.xlu0 %1174 }
  0xc1   : > { %4133 = vmatmul.msk.f32.gmra.mxu1 %vm380_vm1, %v4123_v47  ;;  %4148 = vmatmul.msk.f32.gmra.mxu0 %vm380_vm1, %v5252_v30  ;;  %v5504_v49 = vpop.f32.mrf.mxu3 }
  0xc2   : > { %4162 = vmatmul.msk.f32.gmra.mxu2 %vm380_vm1, %v5332_v61  ;;  %4189 = vmatmul.msk.f32.vlgmr.msra.gmra.mxu3 %vm380_vm1, %v4174_v6 }
  0xc3   : > { %4216 = vmatpush.msk.msrb.mxu3 %vm393_vm0, %v1042_v14 }
  0xc7   : > { %v1177_v22 = vpop.permute.xlu1 %1176  ;;  %v1316_v63 = vpop.permute.xlu2 %1315 }
  0xc8   : > { %v1183_v31 = vsel %vm1182_vm7, %v1175_v28, %v1177_v22  ;;  %v1040_v34 = vpop.permute.xlu0 %1039  ;;  %v5150_v28 = vmov 0  }
  0xc9   : > { %4134 = vmatmul.msk.f32.gmra.mxu1 %vm380_vm1, %v4124_v52  ;;  %4149 = vmatmul.msk.f32.gmra.mxu0 %vm380_vm1, %v5260_v32  ;;  %v1044_v35 = vsel %vm1041_vm6, %v1038_v24, %v1040_v34  ;;  %v5512_v52 = vld [vmem:[%s7905_s1 + $0xd8] sm:$0xff] }
  0xca   : > { %4163 = vmatmul.msk.f32.gmra.mxu2 %vm380_vm1, %v4158_v1  ;;  %4190 = vmatmul.msk.f32.gmra.mxu3 %vm380_vm1, %v4175_v11 }
  0xcb   : > { %5085 = vset.pattern.permute.xlu1 %v5150_v28  ;;  %5084 = vset.pattern.permute.xlu0 %v5150_v28 }
  0xcc   : > { %5083 = vset.pattern.permute.xlu2 %v5150_v28 }
  0xcf   : > { %v1463_v8 = vpop.permute.xlu2 %1462 }
  0xd0   : > { %v1320_v38 = vpop.permute.xlu0 %1319 }
  0xd1   : > { %4151 = vmatmul.msk.f32.vlgmr.msra.gmra.mxu1 %vm380_vm1, %v5310_v53  ;;  %4170 = vmatmul.msk.f32.vlgmr.msra.gmra.mxu0 %vm380_vm1, %v5294_v50  ;;  %v1325_v46 = vsel %vm1323_vm8, %v1318_v43, %v1320_v38 }
  0xd2   : > { %4184 = vmatmul.msk.f32.vlgmr.msra.gmra.mxu2 %vm380_vm1, %v4174_v6  ;;  %4191 = vmatmul.msk.f32.gmra.mxu3 %vm380_vm1, %v4176_v17 }
  0xd3   : > { %4202 = vmatpush.msk.msra.mxu1 %vm393_vm0, %v902_v18  ;;  %4221 = vmatpush.msk.msra.mxu0 %vm393_vm0, %v1043_v25 }
  0xd4   : > { %4235 = vmatpush.msk.msra.mxu2 %vm393_vm0, %v1183_v31 }
  0xd8   : > { %v1322_v42 = vpop.permute.xlu0 %1321 }
  0xd9   : > { %4152 = vmatmul.msk.f32.gmra.mxu1 %vm380_vm1, %v5242_v26  ;;  %4171 = vmatmul.msk.f32.gmra.mxu0 %vm380_vm1, %v5315_v54  ;;  %v1179_v26 = vpop.permute.xlu1 %1178  ;;  %v1326_v45 = vsel %vm1323_vm8, %v1320_v38, %v1322_v42  ;;  %v5523_v54 = vpop.f32.mrf.mxu3  ;;  %v4269_v42 = vld [vmem:[%s7905_s1 + $0x100] sm:$0xff] }
  0xda   : > { %4185 = vmatmul.msk.f32.gmra.mxu2 %vm380_vm1, %v4175_v11  ;;  %4192 = vmatmul.msk.f32.gmra.mxu3 %vm380_vm1, %v4177_v20  ;;  %v1184_v27 = vsel %vm1182_vm7, %v1177_v22, %v1179_v26 }
  0xdb   : > { %4240 = vmatpush.msk.msra.mxu3 %vm393_vm0, %v1184_v27 }
  0xe1   : > { %4153 = vmatmul.msk.f32.gmra.mxu1 %vm380_vm1, %v5252_v30  ;;  %4172 = vmatmul.msk.f32.gmra.mxu0 %vm380_vm1, %v5332_v61  ;;  %v5434_v30 = vld [vmem:[%s7905_s1 + $0xb0] sm:$0xff]  ;;  %v1181_v47 = vpop.permute.xlu1 %1180 }
  0xe2   : > { %4186 = vmatmul.msk.f32.gmra.mxu2 %vm380_vm1, %v4176_v17  ;;  %4217 = vmatmul.msk.f32.vlgmr.msrb.gmra.mxu3 %vm380_vm1, %v5405_v21  ;;  %v1185_v48 = vsel %vm1182_vm7, %v1179_v26, %v1181_v47 }
  0xe3   : > { %4264 = vmatpush.msk.msrb.mxu3 %vm393_vm0, %v1326_v45 }
  0xe9   : > { %4154 = vmatmul.msk.f32.gmra.mxu1 %vm380_vm1, %v5260_v32  ;;  %4173 = vmatmul.msk.f32.gmra.mxu0 %vm380_vm1, %v4158_v1  ;;  %v4194_v32 = vld [vmem:[%s7905_s1 + $0x88] sm:$0xff]  ;;  %v1461_v0 = vpop.permute.xlu1 %1460  ;;  %v1324_v1 = vsel %vm1323_vm8, %v1316_v63, %v1318_v43  ;;  %v4271_v63 = vld [vmem:[%s7905_s1 + $0x110] sm:$0xff] }
  0xea   : > { %4187 = vmatmul.msk.f32.gmra.mxu2 %vm380_vm1, %v4177_v20  ;;  %4218 = vmatmul.msk.f32.gmra.mxu3 %vm380_vm1, %v5417_v23  ;;  %v1467_v10 = vsel %vm1464_vm9, %v1461_v0, %v1463_v8 }
  0xf1   : > { %4179 = vmatmul.msk.f32.vlgmr.msrb.gmra.mxu1 %vm380_vm1, %v4174_v6  ;;  %4198 = vmatmul.msk.f32.vlgmr.msrb.gmra.mxu0 %vm380_vm1, %v4193_v29  ;;  %v1459_v9 = vpop.permute.xlu1 %1458 }
  0xf2   : > { %4208 = vmatmul.msk.f32.vlgmr.msrb.gmra.mxu2 %vm380_vm1, %v4193_v29  ;;  %4219 = vmatmul.msk.f32.gmra.mxu3 %vm380_vm1, %v5434_v30  ;;  %v1466_v13 = vsel %vm1464_vm9, %v1459_v9, %v1461_v0  ;;  %v1586_v0 = vld [vmem:[%s7906_s2 + $0x8] sm:$0xff] }
  0xf3   : > { %4226 = vmatpush.msk.msrb.mxu1 %vm393_vm0, %v1044_v35  ;;  %4259 = vmatpush.msk.msrb.mxu2 %vm393_vm0, %v1325_v46 }
  0xf4   : > { %4245 = vmatpush.msk.msrb.mxu0 %vm393_vm0, %v1185_v48 }
  0xf9   : > { %4180 = vmatmul.msk.f32.gmra.mxu1 %vm380_vm1, %v4175_v11  ;;  %4199 = vmatmul.msk.f32.gmra.mxu0 %vm380_vm1, %v4194_v32  ;;  %v1457_v11 = vpop.permute.xlu0 %1456 }
  0xfa   : > { %4209 = vmatmul.msk.f32.gmra.mxu2 %vm380_vm1, %v4194_v32  ;;  %4220 = vmatmul.msk.f32.gmra.mxu3 %vm380_vm1, %v5450_v33  ;;  %v1465_v14 = vsel %vm1464_vm9, %v1457_v11, %v1459_v9  ;;  %v4272_v9 = vld [vmem:[%s7905_s1 + $0x118] sm:$0xff] }
 0x101   : > { %4181 = vmatmul.msk.f32.gmra.mxu1 %vm380_vm1, %v4176_v17  ;;  %4200 = vmatmul.msk.f32.gmra.mxu0 %vm380_vm1, %v4195_v36 }
 0x102   : > { %4210 = vmatmul.msk.f32.gmra.mxu2 %vm380_vm1, %v4195_v36  ;;  %4241 = vmatmul.msk.f32.vlgmr.msra.gmra.mxu3 %vm380_vm1, %v5464_v37 }
 0x109   : > { %4182 = vmatmul.msk.f32.gmra.mxu1 %vm380_vm1, %v4177_v20  ;;  %4201 = vmatmul.msk.f32.gmra.mxu0 %vm380_vm1, %v4196_v39 }
 0x10a   : > { %4211 = vmatmul.msk.f32.gmra.mxu2 %vm380_vm1, %v4196_v39  ;;  %4242 = vmatmul.msk.f32.gmra.mxu3 %vm380_vm1, %v5478_v40 }
 0x111   : > { %4203 = vmatmul.msk.f32.vlgmr.msra.gmra.mxu1 %vm380_vm1, %v4193_v29  ;;  %4222 = vmatmul.msk.f32.vlgmr.msra.gmra.mxu0 %vm380_vm1, %v5405_v21 }
 0x112   : > { %4236 = vmatmul.msk.f32.vlgmr.msra.gmra.mxu2 %vm380_vm1, %v5464_v37  ;;  %4243 = vmatmul.msk.f32.gmra.mxu3 %vm380_vm1, %v5490_v44 }
 0x113   : > { %4254 = vmatpush.msk.msra.mxu1 %vm393_vm0, %v1324_v1  ;;  %4283 = vmatpush.msk.msra.mxu2 %vm393_vm0, %v1467_v10 }
 0x114   : > { %4273 = vmatpush.msk.msra.mxu0 %vm393_vm0, %v1465_v14 }
 0x116   : > { %v417_v50 = vpop.f32.mrf.mxu0  ;;  %v5507_v51 = vpop.f32.mrf.mxu1 }
 0x119   : > { %4204 = vmatmul.msk.f32.gmra.mxu1 %vm380_vm1, %v4194_v32  ;;  %4223 = vmatmul.msk.f32.gmra.mxu0 %vm380_vm1, %v5417_v23 }
 0x11a   : > { %4237 = vmatmul.msk.f32.gmra.mxu2 %vm380_vm1, %v5478_v40  ;;  %4244 = vmatmul.msk.f32.gmra.mxu3 %vm380_vm1, %v5512_v52 }
 0x11d   : > { %v5521_v53 = vpop.f32.mrf.mxu2 }
 0x11e   : > { %v5525_v55 = vpop.f32.mrf.mxu1  ;;  %v5527_v56 = vpop.f32.mrf.mxu0 }
 0x11f   : > { %v535_v31 = vadd.f32 %v5504_v49, %v5525_v55  ;;  %v4270_v49 = vld [vmem:[%s7905_s1 + $0x108] sm:$0xff] }
 0x121   : > { %4205 = vmatmul.msk.f32.gmra.mxu1 %vm380_vm1, %v4195_v36  ;;  %4224 = vmatmul.msk.f32.gmra.mxu0 %vm380_vm1, %v5434_v30 }
 0x122   : > { %4238 = vmatmul.msk.f32.gmra.mxu2 %vm380_vm1, %v5490_v44  ;;  %4265 = vmatmul.msk.f32.vlgmr.msrb.gmra.mxu3 %vm380_vm1, %v5532_v57 }
 0x125   : > { %v5541_v58 = vpop.f32.mrf.mxu2  ;;  %v686_v59 = vpop.f32.mrf.mxu3 }
 0x126   : > { %v5543_v60 = vpop.f32.mrf.mxu1  ;;  %v528_v61 = vpop.f32.mrf.mxu0 }
 0x127   : > { %v529_v15 = vadd.f32 %v528_v61, %v417_v50  ;;  %v1587_v50 = vld [vmem:[%s7906_s2 + $0x10] sm:$0xff] }
 0x128   : > { %1601 = vperm.xlu2 %5083, %v1587_v50  }
 0x129   : > { %4206 = vmatmul.msk.f32.gmra.mxu1 %vm380_vm1, %v4196_v39  ;;  %4225 = vmatmul.msk.f32.gmra.mxu0 %vm380_vm1, %v5450_v33 }
 0x12a   : > { %4239 = vmatmul.msk.f32.gmra.mxu2 %vm380_vm1, %v5512_v52  ;;  %4266 = vmatmul.msk.f32.gmra.mxu3 %vm380_vm1, %v5548_v62 }
 0x12d   : > { %v5559_v3 = vpop.f32.mrf.mxu2  ;;  %v5561_v2 = vpop.f32.mrf.mxu3 }
 0x12e   : > { %v446_v4 = vpop.f32.mrf.mxu1  ;;  %v557_v5 = vpop.f32.mrf.mxu0 }
 0x12f   : > { %v558_v6 = vadd.f32 %v557_v5, %v446_v4 }
 0x130   : > { %1596 = vperm.xlu2 %5083, %v1586_v0  }
 0x131   : > { %v728_v12 = vadd.f32 %v686_v59, %v558_v6  ;;  %4227 = vmatmul.msk.f32.vlgmr.msrb.gmra.mxu1 %vm380_vm1, %v5405_v21  ;;  %4246 = vmatmul.msk.f32.vlgmr.msrb.gmra.mxu0 %vm380_vm1, %v5464_v37  ;;  %v5588_v21 = vld [vmem:[%s7905_s1 + $0xf8] sm:$0xff] }
 0x132   : > { %4260 = vmatmul.msk.f32.vlgmr.msrb.gmra.mxu2 %vm380_vm1, %v5532_v57  ;;  %4267 = vmatmul.msk.f32.gmra.mxu3 %vm380_vm1, %v5566_v7 }
 0x133   : > { %4278 = vmatpush.msk.msrb.mxu1 %vm393_vm0, %v1466_v13 }
 0x135   : > { %v657_v16 = vpop.f32.mrf.mxu2  ;;  %v692_v17 = vpop.f32.mrf.mxu3 }
 0x136   : > { %v5579_v18 = vadd.f32 %v657_v16, %v529_v15  ;;  %v5581_v19 = vpop.f32.mrf.mxu1  ;;  %v5583_v20 = vpop.f32.mrf.mxu0 }
 0x139   : > { %4228 = vmatmul.msk.f32.gmra.mxu1 %vm380_vm1, %v5417_v23  ;;  %4247 = vmatmul.msk.f32.gmra.mxu0 %vm380_vm1, %v5478_v40  ;;  %v1585_v23 = vld [vmem:[%s7906_s2] sm:$0xff] }
 0x13a   : > { %4261 = vmatmul.msk.f32.gmra.mxu2 %vm380_vm1, %v5548_v62  ;;  %4268 = vmatmul.msk.f32.gmra.mxu3 %vm380_vm1, %v5588_v21 }
 0x13b   : > { %1591 = vperm.xlu1 %5085, %v1585_v23  }
 0x13d   : > { %v5598_v22 = vpop.f32.mrf.mxu2  ;;  %v5600_v27 = vpop.f32.mrf.mxu3 }
 0x13e   : > { %v452_v24 = vpop.f32.mrf.mxu1  ;;  %v563_v25 = vpop.f32.mrf.mxu0 }
 0x13f   : > { %v564_v26 = vadd.f32 %v563_v25, %v452_v24 }
 0x141   : > { %v734_v29 = vadd.f32 %v692_v17, %v564_v26  ;;  %4229 = vmatmul.msk.f32.gmra.mxu1 %vm380_vm1, %v5434_v30  ;;  %4248 = vmatmul.msk.f32.gmra.mxu0 %vm380_vm1, %v5490_v44 }
 0x142   : > { %4262 = vmatmul.msk.f32.gmra.mxu2 %vm380_vm1, %v5566_v7 }
 0x145   : > { %v663_v32 = vpop.f32.mrf.mxu2  ;;  %v856_v37 = vpop.f32.mrf.mxu3 }
 0x146   : > { %v5613_v34 = vadd.f32 %v663_v32, %v535_v31  ;;  %v5615_v35 = vpop.f32.mrf.mxu1  ;;  %v5617_v36 = vpop.f32.mrf.mxu0 }
 0x149   : > { %4230 = vmatmul.msk.f32.gmra.mxu1 %vm380_vm1, %v5450_v33  ;;  %4249 = vmatmul.msk.f32.gmra.mxu0 %vm380_vm1, %v5512_v52  ;;  %v1588_v52 = vld [vmem:[%s7906_s2 + $0x18] sm:$0xff] }
 0x14a   : > { %4263 = vmatmul.msk.f32.gmra.mxu2 %vm380_vm1, %v5588_v21  ;;  %1606 = vperm.xlu0 %5084, %v1588_v52  }
 0x14d   : > { %v5625_v30 = vpop.f32.mrf.mxu2  ;;  %v5634_v33 = vpop.f32.mrf.mxu3 }
 0x14e   : > { %v586_v38 = vpop.f32.mrf.mxu1  ;;  %v715_v39 = vpop.f32.mrf.mxu0 }
 0x14f   : > { %v587_v40 = vadd.f32 %v586_v38, %v5527_v56 }
 0x151   : > { %v729_v43 = vadd.f32 %v715_v39, %v587_v40  ;;  %4255 = vmatmul.msk.f32.vlgmr.msra.gmra.mxu1 %vm380_vm1, %v5532_v57  ;;  %4274 = vmatmul.msk.f32.vlgmr.msra.gmra.mxu0 %vm380_vm1, %v4269_v42 }
 0x152   : > { %4284 = vmatmul.msk.f32.vlgmr.msra.gmra.mxu2 %vm380_vm1, %v4269_v42 }
 0x153   : > { %v870_v44 = vadd.f32 %v856_v37, %v729_v43 }
 0x155   : > { %v827_v45 = vpop.f32.mrf.mxu2  ;;  %v862_v55 = vpop.f32.mrf.mxu3 }
 0x156   : > { %v869_v46 = vadd.f32 %v827_v45, %v728_v12  ;;  %v5637_v47 = vpop.f32.mrf.mxu1  ;;  %v5639_v48 = vpop.f32.mrf.mxu0 }
 0x159   : > { %4256 = vmatmul.msk.f32.gmra.mxu1 %vm380_vm1, %v5548_v62  ;;  %4275 = vmatmul.msk.f32.gmra.mxu0 %vm380_vm1, %v4270_v49 }
 0x15a   : > { %4285 = vmatmul.msk.f32.gmra.mxu2 %vm380_vm1, %v4270_v49 }
 0x15d   : > { %v5654_v56 = vpop.f32.mrf.mxu2 }
 0x15e   : > { %v592_v57 = vpop.f32.mrf.mxu1  ;;  %v721_v59 = vpop.f32.mrf.mxu0 }
 0x15f   : > { %v593_v61 = vadd.f32 %v592_v57, %v5541_v58  ;;  %v5667_v58 = vpop.f32.mrf.mxu3 }
 0x161   : > { %v735_v62 = vadd.f32 %v721_v59, %v593_v61  ;;  %4257 = vmatmul.msk.f32.gmra.mxu1 %vm380_vm1, %v5566_v7  ;;  %4276 = vmatmul.msk.f32.gmra.mxu0 %vm380_vm1, %v4271_v63 }
 0x162   : > { %4286 = vmatmul.msk.f32.gmra.mxu2 %vm380_vm1, %v4271_v63 }
 0x163   : > { %v876_v1 = vadd.f32 %v862_v55, %v735_v62 }
 0x165   : > { %v833_v4 = vpop.f32.mrf.mxu2 }
 0x166   : > { %v875_v5 = vadd.f32 %v833_v4, %v734_v29  ;;  %v5669_v6 = vpop.f32.mrf.mxu1  ;;  %v5671_v8 = vpop.f32.mrf.mxu0 }
 0x167   : > { %v1080_v13 = vpop.f32.mrf.mxu3 }
 0x169   : > { %4258 = vmatmul.msk.f32.gmra.mxu1 %vm380_vm1, %v5588_v21  ;;  %4277 = vmatmul.msk.f32.gmra.mxu0 %vm380_vm1, %v4272_v9 }
 0x16a   : > { %4287 = vmatmul.msk.f32.gmra.mxu2 %vm380_vm1, %v4272_v9 }
 0x16d   : > { %v5680_v7 = vpop.f32.mrf.mxu2 }
 0x16e   : > { %7914 = vst [vmem:[#allocation2_spill] sm:$0xff] %v5680_v7  ;;  %v798_v10 = vpop.f32.mrf.mxu1  ;;  %v939_v11 = vpop.f32.mrf.mxu0 }
 0x16f   : > { %v868_v12 = vadd.f32 %v798_v10, %v5579_v18  ;;  %v1083_v38 = vpop.f32.mrf.mxu3 }
 0x171   : > { %v1009_v14 = vadd.f32 %v939_v11, %v868_v12  ;;  %4279 = vmatmul.msk.f32.vlgmr.msrb.gmra.mxu1 %vm380_vm1, %v4269_v42 }
 0x173   : > { %v1150_v15 = vadd.f32 %v1080_v13, %v1009_v14 }
 0x175   : > { %v997_v16 = vpop.f32.mrf.mxu2 }
 0x176   : > { %v1011_v17 = vadd.f32 %v997_v16, %v870_v44  ;;  %v801_v24 = vpop.f32.mrf.mxu1  ;;  %v942_v25 = vpop.f32.mrf.mxu0 }
 0x179   : > { %4280 = vmatmul.msk.f32.gmra.mxu1 %vm380_vm1, %v4270_v49 }
 0x17d   : > { %v5685_v21 = vpop.f32.mrf.mxu2 }
 0x17e   : > { %v804_v26 = vpop.f32.mrf.mxu1  ;;  %v945_v23 = vpop.f32.mrf.mxu0 }
 0x17f   : > { %v874_v28 = vadd.f32 %v804_v26, %v5613_v34  ;;  %v1086_v34 = vpop.f32.mrf.mxu3 }
 0x181   : > { %v5688_v29 = vadd.f32 %v945_v23, %v874_v28  ;;  %4281 = vmatmul.msk.f32.gmra.mxu1 %vm380_vm1, %v4271_v63 }
 0x185   : > { %v1003_v18 = vpop.f32.mrf.mxu2 }
 0x186   : > { %v5691_v31 = vadd.f32 %v1003_v18, %v876_v1  ;;  %v5693_v32 = vpop.f32.mrf.mxu1  ;;  %v5695_v37 = vpop.f32.mrf.mxu0 }
 0x187   : > { %v5706_v55 = vpop.f32.mrf.mxu3 }
 0x189   : > { %4282 = vmatmul.msk.f32.gmra.mxu1 %vm380_vm1, %v4272_v9 }
 0x18d   : > { %v5698_v39 = vpop.f32.mrf.mxu2 }
 0x18e   : > { %v968_v40 = vpop.f32.mrf.mxu1  ;;  %v1109_v42 = vpop.f32.mrf.mxu0 }
 0x18f   : > { %v1010_v43 = vadd.f32 %v968_v40, %v869_v46  ;;  %v5712_v0 = vpop.f32.mrf.mxu3 }
 0x191   : > { %v5700_v44 = vadd.f32 %v1109_v42, %v1010_v43 }
 0x195   : > { %v1221_v45 = vpop.f32.mrf.mxu2 }
 0x196   : > { %v1291_v49 = vadd.f32 %v1221_v45, %v1150_v15  ;;  %v5702_v50 = vpop.f32.mrf.mxu1  ;;  %v5704_v52 = vpop.f32.mrf.mxu0 }
 0x197   : > { %v5720_v11 = vpop.f32.mrf.mxu3 }
 0x198   : > { %7919 = vst [vmem:[#allocation7_spill] sm:$0xff] %v5720_v11 }
 0x19d   : > { %v1224_v57 = vpop.f32.mrf.mxu2 }
 0x19e   : > { %v974_v59 = vpop.f32.mrf.mxu1  ;;  %v5708_v61 = vpop.f32.mrf.mxu0 }
 0x19f   : > { %7915 = vst [vmem:[#allocation3_spill] sm:$0xff] %v5708_v61  ;;  %v5710_v63 = vadd.f32 %v974_v59, %v875_v5  ;;  %v5726_v5 = vpop.f32.mrf.mxu3 }
 0x1a0   : > { %7920 = vst [vmem:[#allocation8_spill] sm:$0xff] %v5726_v5 }
 0x1a1   : > { %7916 = vst [vmem:[#allocation4_spill] sm:$0xff] %v5710_v63 }
 0x1a5   : > { %v1227_v46 = vpop.f32.mrf.mxu2 }
 0x1a6   : > { %v5714_v62 = vpop.f32.mrf.mxu1  ;;  %v5716_v1 = vpop.f32.mrf.mxu0 }
 0x1a7   : > { %7917 = vst [vmem:[#allocation5_spill] sm:$0xff] %v5714_v62  ;;  %v5730_v28 = vpop.f32.mrf.mxu3 }
 0x1a8   : > { %7918 = vst [vmem:[#allocation6_spill] sm:$0xff] %v5716_v1 }
 0x1a9   : > { %7922 = vst [vmem:[#allocation10_spill] sm:$0xff] %v5730_v28 }
 0x1ad   : > { %v5718_v4 = vpop.f32.mrf.mxu2  ;;  %v5745_v11 = vpop.permute.xlu1 %1591 }
 0x1ae   : > { %v1138_v9 = vpop.f32.mrf.mxu1  ;;  %v1279_v10 = vpop.f32.mrf.mxu0 }
 0x1af   : > { %v1152_v12 = vadd.f32 %v1138_v9, %v1011_v17  ;;  %v532_v17 = vadd.f32 %v5482_v41, %v5507_v51  ;;  %v1420_v59 = vpop.f32.mrf.mxu3  ;;  %v590_v41 = vadd.f32 %v5637_v47, %v5521_v53  ;;  %v596_v53 = vadd.f32 %v5669_v6, %v5559_v3 }
 0x1b1   : > { %v730_v43 = vadd.f32 %v5598_v22, %v532_v17  ;;  %v1293_v28 = vadd.f32 %v1279_v10, %v1152_v12  ;;  %v738_v3 = vadd.f32 %v5671_v8, %v596_v53 }
 0x1b3   : > { %v871_v45 = vadd.f32 %v801_v24, %v730_v43  ;;  %v1434_v7 = vadd.f32 %v1420_v59, %v1293_v28  ;;  %v879_v8 = vadd.f32 %v5667_v58, %v738_v3  ;;  %v7924_v3 = vld [vmem:[#allocation2_spill] sm:$0xff] }
 0x1b5   : > { %v5722_v13 = vpop.f32.mrf.mxu2  ;;  %v1012_v61 = vadd.f32 %v942_v25, %v871_v45 }
 0x1b6   : > { %v1141_v14 = vpop.f32.mrf.mxu1  ;;  %v5724_v15 = vpop.f32.mrf.mxu0 }
 0x1b7   : > { %v1153_v62 = vadd.f32 %v1083_v38, %v1012_v61  ;;  %v538_v38 = vadd.f32 %v5523_v54, %v5543_v60  ;;  %v732_v61 = vadd.f32 %v5639_v48, %v590_v41  ;;  %v1020_v41 = vadd.f32 %v5698_v39, %v879_v8 }
 0x1b9   : > { %v1294_v51 = vadd.f32 %v1224_v57, %v1153_v62  ;;  %v736_v57 = vadd.f32 %v5625_v30, %v538_v38  ;;  %v873_v54 = vadd.f32 %v5634_v33, %v732_v61 }
 0x1bb   : > { %v877_v60 = vadd.f32 %v5693_v32, %v736_v57  ;;  %v1014_v30 = vadd.f32 %v5685_v21, %v873_v54  ;;  %v561_v32 = vadd.f32 %v5583_v20, %v5581_v19 }
 0x1bc   : > { %v5806_v54 = vpop.permute.xlu0 %1606 }
 0x1bd   : > { %v5728_v16 = vpop.f32.mrf.mxu2  ;;  %v1018_v28 = vadd.f32 %v5695_v37, %v877_v60  ;;  %v1155_v33 = vadd.f32 %v1141_v14, %v1014_v30  ;;  %v731_v14 = vadd.f32 %v5561_v2, %v561_v32 }
 0x1be   : > { %7921 = vst [vmem:[#allocation9_spill] sm:$0xff] %v5728_v16  ;;  %v1144_v26 = vpop.f32.mrf.mxu1  ;;  %v1285_v23 = vpop.f32.mrf.mxu0 }
 0x1bf   : > { %v872_v39 = vadd.f32 %v5654_v56, %v731_v14 }
 0x1c5   : > { %v5732_v18 = vpop.f32.mrf.mxu2 }
 0x1c6   : > { %7923 = vst [vmem:[#allocation11_spill] sm:$0xff] %v5732_v18  ;;  %v5734_v40 = vpop.f32.mrf.mxu1  ;;  %v5736_v42 = vpop.f32.mrf.mxu0 }
 0x1c7   : > { %v5743_v18 = vpop.permute.xlu2 %1601 }
 0x1cd   : > { %v5741_v9 = vpop.f32.mrf.mxu2 }
 0x1ce   : > { %v1362_v5 = vpop.f32.mrf.mxu1  ;;  %v1503_v1 = vpop.f32.mrf.mxu0 }
 0x1cf   : > { %v1432_v63 = vadd.f32 %v1362_v5, %v1291_v49  ;;  %v1423_v49 = vpop.f32.mrf.mxu3  ;;  %v5765_v5 = vpop.permute.xlu2 %1596 }
 0x1d1   : > { %v1573_v16 = vadd.f32 %v1503_v1, %v1432_v63  ;;  %v1158_v1 = vadd.f32 %v1144_v26, %v5691_v31 }
 0x1d3   : > { %v5750_v24 = vadd.f32 %v5745_v11, %v1573_v16  ;;  %v1299_v26 = vadd.f32 %v1285_v23, %v1158_v1  ;;  %v1296_v23 = vadd.f32 %v5724_v15, %v1155_v33 }
 0x1d5   : > { %v1561_v22 = vpop.f32.mrf.mxu2  ;;  %v4288_v47 = vmul.f32 -1.442695, %v5750_v24 }
 0x1d6   : > { %v1575_v17 = vadd.f32 %v1561_v22, %v1434_v7  ;;  %v1365_v43 = vpop.f32.mrf.mxu1  ;;  %v1506_v25 = vpop.f32.mrf.mxu0  ;;  %v1156_v7 = vadd.f32 %v1086_v34, %v5688_v29  ;;  %v1159_v22 = vadd.f32 %v5706_v55, %v1018_v28  ;;  %v1437_v55 = vadd.f32 %v1423_v49, %v1296_v23  ;;  %v7928_v23 = vld [vmem:[#allocation4_spill] sm:$0xff] }
 0x1d7   : > { %v1435_v10 = vadd.f32 %v1365_v43, %v1294_v51  ;;  %5086 = vpow2.f32 %v4288_v47  ;;  %v1426_v45 = vpop.f32.mrf.mxu3  ;;  %v1161_v43 = vadd.f32 %v5734_v40, %v1020_v41  ;;  %v1013_v47 = vadd.f32 %v5702_v50, %v872_v39 }
 0x1d8   : > { %v5753_v63 = vadd.f32 %v5745_v11, %v1575_v17  ;;  %v1297_v48 = vadd.f32 %v1227_v46, %v1156_v7  ;;  %v1440_v51 = vadd.f32 %v1426_v45, %v1299_v26 }
 0x1d9   : > { %v1576_v62 = vadd.f32 %v1506_v25, %v1435_v10  ;;  %v1300_v25 = vadd.f32 %v5718_v4, %v1159_v22  ;;  %v1302_v40 = vadd.f32 %v5736_v42, %v1161_v43  ;;  %v567_v4 = vadd.f32 %v5617_v36, %v5615_v35 }
 0x1da   : > { %v4290_v12 = vmul.f32 -1.442695, %v5753_v63  ;;  %v1154_v50 = vadd.f32 %v5704_v52, %v1013_v47  ;;  %v7925_v52 = vld [vmem:[#allocation7_spill] sm:$0xff]  ;;  %v5859_v47 = vld [vmem:[%s7907_s3] sm:$0x7] }
 0x1db   : > { %v5772_v29 = vadd.f32 %v5765_v5, %v1576_v62  ;;  %v1292_v62 = vadd.f32 %v5712_v0, %v5700_v44  ;;  %v737_v36 = vadd.f32 %v5600_v27, %v567_v4 }
 0x1dc   : > { %5088 = vpow2.f32 %v4290_v12 }
 0x1dd   : > { %v1564_v16 = vpop.f32.mrf.mxu2  ;;  %v4291_v59 = vmul.f32 -1.442695, %v5772_v29  ;;  %v5087_v21 = vpop.eup %5086  ;;  %v1433_v60 = vadd.f32 %v5722_v13, %v1292_v62  ;;  %v7926_v13 = vld [vmem:[#allocation5_spill] sm:$0xff] }
 0x1de   : > { %v1368_v6 = vpop.f32.mrf.mxu1  ;;  %v1509_v34 = vpop.f32.mrf.mxu0  ;;  %v5788_v10 = vadd.f32 1.0, %v5087_v21  ;;  %v1578_v56 = vadd.f32 %v1564_v16, %v1437_v55 }
 0x1df   : > { %v1438_v31 = vadd.f32 %v1368_v6, %v1297_v48  ;;  %5090 = vpow2.f32 %v4291_v59  ;;  %v1429_v57 = vpop.f32.mrf.mxu3  ;;  %v878_v6 = vadd.f32 %v7924_v3, %v737_v36 }
 0x1e0   : > { %5092 = vrcp.f32 %v5788_v10  ;;  %v1443_v12 = vadd.f32 %v1429_v57, %v1302_v40  ;;  %v5812_v48 = vadd.f32 %v5765_v5, %v1578_v56  ;;  %v7932_v57 = vld [vmem:[#allocation10_spill] sm:$0xff]  ;;  %v1680_v3 = vand.u32 2147483648, %v5788_v10 }
 0x1e1   : > { %v1579_v46 = vadd.f32 %v1509_v34, %v1438_v31  ;;  %v1295_v34 = vadd.f32 %v7925_v52, %v1154_v50  ;;  %v1019_v26 = vadd.f32 %v7926_v13, %v878_v6  ;;  %v5871_v50 = vperm.slane %v5859_v47, 0 }
 0x1e2   : > { %v5089_v37 = vpop.eup %5088  ;;  %v4293_v28 = vmul.f32 -1.442695, %v5812_v48  ;;  %vm1674_vm11 = vweird.f32 %v5788_v10 }
 0x1e3   : > { %v5785_v19 = vadd.f32 %v5743_v18, %v1579_v46  ;;  %v5791_v15 = vadd.f32 1.0, %v5089_v37  ;;  %v7927_v46 = vld [vmem:[#allocation9_spill] sm:$0xff] }
 0x1e4   : > { %v1436_v59 = vadd.f32 %v7927_v46, %v1295_v34 }
 0x1e5   : > { %v1567_v17 = vpop.f32.mrf.mxu2  ;;  %v4294_v61 = vmul.f32 -1.442695, %v5785_v19  ;;  %v5091_v7 = vpop.eup %5090  ;;  %5094 = vrcp.f32 %v5791_v15  ;;  %v1708_v6 = vand.u32 2147483647, %v5791_v15  ;;  %vm1704_vm15 = vweird.f32 %v5791_v15 }
 0x1e6   : > { %v1581_v20 = vadd.f32 %v1567_v17, %v1440_v51  ;;  %v1371_v58 = vpop.f32.mrf.mxu1  ;;  %v1512_v53 = vpop.f32.mrf.mxu0  ;;  %v5814_v16 = vadd.f32 1.0, %v5091_v7  ;;  %v7929_v17 = vld [vmem:[#allocation3_spill] sm:$0xff] }
 0x1e7   : > { %v1441_v2 = vadd.f32 %v1371_v58, %v1300_v25  ;;  %5096 = vpow2.f32 %v4294_v61  ;;  %v5816_v0 = vpop.eup %5092  ;;  %v1157_v37 = vadd.f32 %v7929_v17, %v7928_v23  ;;  %v7930_v58 = vld [vmem:[#allocation6_spill] sm:$0xff]  ;;  %v7933_v7 = vld [vmem:[#allocation11_spill] sm:$0xff]  ;;  %vm5905_vm0 = vcmp.eq.f32.partialorder %v1708_v6, 8.507059e+37 }
 0x1e8   : > { %v5794_v38 = vadd.f32 %v5743_v18, %v1581_v20  ;;  %v1670_v45 = vmul.f32 %v5816_v0, %v5788_v10  ;;  %vm1675_vm10 = vweird.f32 %v5816_v0  ;;  %vm1719_vm2 = vweird.f32 %v5814_v16 }
 0x1e9   : > { %v1582_v42 = vadd.f32 %v1512_v53, %v1441_v2  ;;  %v7931_v53 = vld [vmem:[#allocation8_spill] sm:$0xff]  ;;  %vm5896_vm13 = vmor %vm1674_vm11, %vm1675_vm10 }
 0x1ea   : > { %v4296_v49 = vmul.f32 -1.442695, %v5794_v38  ;;  %v1671_v25 = vsub.f32 1.0, %v1670_v45  ;;  %v1298_v4 = vadd.f32 %v7931_v53, %v1157_v37  ;;  %v5887_v45 = vperm.slane %v5859_v47, 2 }
 0x1eb   : > { %v5820_v30 = vadd.f32 %v5806_v54, %v1582_v42  ;;  %v5822_v27 = vpop.eup %5094 }
 0x1ec   : > { %5098 = vpow2.f32 %v4296_v49  ;;  %v1700_v51 = vmul.f32 %v5822_v27, %v5791_v15  ;;  %v1672_v49 = vmul.f32 %v5816_v0, %v1671_v25  ;;  %v1439_v62 = vadd.f32 %v7933_v7, %v1298_v4 }
 0x1ed   : > { %v1570_v1 = vpop.f32.mrf.mxu2  ;;  %v5097_v33 = vpop.eup %5096  ;;  %5100 = vrcp.f32 %v5814_v16  ;;  %v4297_v21 = vmul.f32 -1.442695, %v5820_v30  ;;  %vm1705_vm12 = vweird.f32 %v5822_v27 }
 0x1ee   : > { %v1532_v35 = vpop.f32.mrf.mxu1  ;;  %v1584_v44 = vadd.f32 %v1570_v1, %v1443_v12  ;;  %v5842_v14 = vadd.f32 1.0, %v5097_v33  ;;  %5102 = vpow2.f32 %v4293_v28  ;;  %v1701_v40 = vsub.f32 1.0, %v1700_v51  ;;  %vm5915_vm1 = vmor %vm1704_vm15, %vm1705_vm12 }
 0x1ef   : > { %v1574_v31 = vadd.f32 %v1532_v35, %v1433_v60  ;;  %5104 = vpow2.f32 %v4297_v21  ;;  %v1673_v34 = vadd.f32 %v5816_v0, %v1672_v49 }
 0x1f0   : > { %v5831_v32 = vadd.f32 %v5806_v54, %v1584_v44  ;;  %v1702_v12 = vmul.f32 %v5822_v27, %v1701_v40  ;;  %v1678_v44 = vand.u32 2147483647, %v5788_v10  ;;  %vm1764_vm5 = vweird.f32 %v5842_v14 }
 0x1f1   : > { %v5834_v8 = vadd.f32 %v5745_v11, %v1574_v31  ;;  %v1160_v11 = vadd.f32 %v7930_v58, %v1019_v26  ;;  %v1677_v23 = vsel %vm5896_vm13, %v5816_v0, %v1673_v34 }
 0x1f2   : > { %v5099_v41 = vpop.eup %5098  ;;  %v4299_v39 = vmul.f32 -1.442695, %v5831_v32  ;;  %vm5900_vm14 = vcmp.eq.f32.partialorder %v1678_v44, 8.507059e+37 }
 0x1f3   : > { %v4289_v43 = vmul.f32 -1.442695, %v5834_v8  ;;  %v5847_v55 = vadd.f32 1.0, %v5099_v41  ;;  %v5849_v2 = vpop.eup %5100  ;;  %v1301_v56 = vadd.f32 %v7932_v57, %v1160_v11 }
 0x1f4   : > { %v5103_v42 = vpop.eup %5102  ;;  %vm1720_vm3 = vweird.f32 %v5849_v2 }
 0x1f5   : > { %5106 = vpow2.f32 %v4289_v43  ;;  %v1442_v1 = vadd.f32 %v5741_v9, %v1301_v56  ;;  %v5105_v60 = vpop.eup %5104  ;;  %v1710_v9 = vand.u32 2147483648, %v5791_v15  ;;  %v5912_v37 = vadd.f32 1.0, %v5103_v42  ;;  %vm5963_vm4 = vmor %vm1719_vm2, %vm1720_vm3 }
 0x1f6   : > { %v1535_v22 = vpop.f32.mrf.mxu1  ;;  %5108 = vrcp.f32 %v5842_v14  ;;  %v5892_v21 = vadd.f32 1.0, %v5105_v60  ;;  %v1723_v42 = vand.u32 2147483647, %v5814_v16  ;;  %v1768_v60 = vand.u32 2147483647, %v5842_v14 }
 0x1f7   : > { %v1577_v20 = vadd.f32 %v1535_v22, %v1436_v59  ;;  %5110 = vpow2.f32 %v4299_v39  ;;  %v1703_v59 = vadd.f32 %v5822_v27, %v1702_v12  ;;  %v1681_v22 = vor.u32 1.1754944e-38, %v1680_v3 }
 0x1f8   : > { %5112 = vrcp.f32 %v5847_v55  ;;  %v1711_v17 = vor.u32 1.1754944e-38, %v1710_v9  ;;  %v1725_v39 = vand.u32 2147483648, %v5814_v16  ;;  %vm1794_vm6 = vweird.f32 %v5847_v55 }
 0x1f9   : > { %v5852_v61 = vadd.f32 %v5765_v5, %v1577_v20  ;;  %v1715_v5 = vmul.f32 %v5849_v2, %v5814_v16  ;;  %v1707_v0 = vsel %vm5915_vm1, %v5822_v27, %v1703_v59  ;;  %v1682_v57 = vsel %vm5900_vm14, %v1681_v22, %v1677_v23  ;;  %v4925_v16 = vld [vmem:[%s7908_s4 + $0x20] sm:$0xff] }
 0x1fa   : > { %v1770_v27 = vand.u32 2147483648, %v5842_v14  ;;  %v1712_v49 = vsel %vm5905_vm0, %v1711_v17, %v1707_v0  ;;  %v5947_v12 = vor.u32 1.1754944e-38, %v1725_v39  ;;  %vm5991_vm9 = vcmp.eq.f32.partialorder %v1768_v60, 8.507059e+37 }
 0x1fb   : > { %v4292_v35 = vmul.f32 -1.442695, %v5852_v61  ;;  %v5107_v52 = vpop.eup %5106  ;;  %v1716_v26 = vsub.f32 1.0, %v1715_v5  ;;  %v1851_v6 = vmul.f32 %v1712_v49, %v5753_v63  ;;  %v1815_v39 = vand.u32 2147483648, %v5892_v21 }
 0x1fc   : > { %v5879_v13 = vpop.eup %5108  ;;  %v5881_v28 = vadd.f32 1.0, %v5107_v52  ;;  %vm1809_vm0 = vweird.f32 %v5892_v21 }
 0x1fd   : > { %5114 = vpow2.f32 %v4292_v35  ;;  %v5111_v46 = vpop.eup %5110  ;;  %v1717_v20 = vmul.f32 %v5849_v2, %v1716_v26  ;;  %v1760_v15 = vmul.f32 %v5879_v13, %v5842_v14  ;;  %v1800_v26 = vand.u32 2147483648, %v5847_v55 }
 0x1fe   : > { %v1538_v36 = vpop.f32.mrf.mxu1  ;;  %v5894_v41 = vpop.eup %5112  ;;  %5116 = vrcp.f32 %v5881_v28  ;;  %v5922_v58 = vadd.f32 1.0, %v5111_v46  ;;  %v1693_v43 = vand.u32 2147483647, %v5881_v28  ;;  %vm1765_vm8 = vweird.f32 %v5879_v13 }
 0x1ff   : > { %v1580_v31 = vadd.f32 %v1538_v36, %v1439_v62  ;;  %v1790_v40 = vmul.f32 %v5894_v41, %v5847_v55  ;;  %5118 = vrcp.f32 %v5892_v21  ;;  %v5943_v7 = vadd.f32 %v5849_v2, %v1717_v20  ;;  %vm6023_vm15 = vmor %vm1764_vm5, %vm1765_vm8 }
 0x200   : > { %v1761_v62 = vsub.f32 1.0, %v1760_v15  ;;  %v5997_v15 = vperm.slane %v5859_v47, 1  ;;  %vm1689_vm11 = vweird.f32 %v5881_v28  ;;  %vm1795_vm12 = vweird.f32 %v5894_v41 }
 0x201   : > { %v5884_v33 = vadd.f32 %v5743_v18, %v1580_v31  ;;  %v1791_v35 = vsub.f32 1.0, %v1790_v40  ;;  %v1722_v63 = vsel %vm5963_vm4, %v5849_v2, %v5943_v7  ;;  %v1695_v18 = vand.u32 2147483648, %v5881_v28  ;;  %vm6039_vm1 = vmor %vm1794_vm6, %vm1795_vm12 }
 0x202   : > { %v1762_v9 = vmul.f32 %v5879_v13, %v1761_v62  ;;  %vm1694_vm14 = vcmp.eq.f32.partialorder %v1693_v43, 8.507059e+37  ;;  %v1845_v43 = vand.u32 2147483648, %v5922_v58  ;;  %vm1839_vm3 = vweird.f32 %v5922_v58 }
 0x203   : > { %v4295_v11 = vmul.f32 -1.442695, %v5884_v33  ;;  %v5115_v25 = vpop.eup %5114  ;;  %v1792_v51 = vmul.f32 %v5894_v41, %v1791_v35  ;;  %v1696_v47 = vor.u32 1.1754944e-38, %v1695_v18 }
 0x204   : > { %v5934_v4 = vadd.f32 1.0, %v5115_v25  ;;  %v5117_v5 = vpop.eup %5116 }
 0x205   : > { %5120 = vpow2.f32 %v4295_v11  ;;  %v1685_v44 = vmul.f32 %v5117_v5, %v5881_v28  ;;  %v5956_v3 = vpop.eup %5118  ;;  %vm1690_vm7 = vweird.f32 %v5117_v5  ;;  %v1801_v28 = vor.u32 1.1754944e-38, %v1800_v26 }
 0x206   : > { %v1541_v53 = vpop.f32.mrf.mxu1  ;;  %5122 = vrcp.f32 %v5912_v37  ;;  %v1805_v23 = vmul.f32 %v5956_v3, %v5892_v21  ;;  %vm1691_vm13 = vmor %vm1689_vm11, %vm1690_vm7  ;;  %v1816_v26 = vor.u32 1.1754944e-38, %v1815_v39  ;;  %vm1810_vm2 = vweird.f32 %v5956_v3 }
 0x207   : > { %v1583_v56 = vadd.f32 %v1541_v53, %v1442_v1  ;;  %5124 = vrcp.f32 %v5922_v58  ;;  %v1849_v1 = vmul.f32 %v1682_v57, %v5750_v24  ;;  %v5968_v24 = vor.u32 1.1754944e-38, %v1770_v27  ;;  %vm6079_vm8 = vmor %vm1809_vm0, %vm1810_vm2 }
 0x208   : > { %5126 = vrcp.f32 %v5934_v4  ;;  %v1686_v46 = vsub.f32 1.0, %v1685_v44  ;;  %v1763_v57 = vadd.f32 %v5879_v13, %v1762_v9  ;;  %v1806_v49 = vsub.f32 1.0, %v1805_v23 }
 0x209   : > { %v5950_v36 = vadd.f32 %v5806_v54, %v1583_v56  ;;  %v1798_v54 = vand.u32 2147483647, %v5847_v55  ;;  %v1869_v11 = vmul.f32 %v5871_v50, %v1849_v1  ;;  %v1793_v56 = vadd.f32 %v5894_v41, %v1792_v51 }
 0x20a   : > { %v1687_v17 = vmul.f32 %v5117_v5, %v1686_v46  ;;  %v1871_v44 = vmul.f32 %v5887_v45, %v1851_v6  ;;  %v1767_v6 = vsel %vm6023_vm15, %v5879_v13, %v1763_v57  ;;  %v1807_v18 = vmul.f32 %v5956_v3, %v1806_v49 }
 0x20b   : > { %v4298_v52 = vmul.f32 -1.442695, %v5950_v36  ;;  %v5121_v34 = vpop.eup %5120  ;;  %vm6002_vm10 = vcmp.eq.f32.partialorder %v1798_v54, 8.507059e+37  ;;  %v1772_v39 = vsel %vm5991_vm9, %v5968_v24, %v1767_v6  ;;  %vm6094_vm15 = vcmp.eq.f32.partialorder %v1723_v42, 8.507059e+37 }
 0x20c   : > { %v5979_v59 = vpop.eup %5122  ;;  %v5983_v22 = vadd.f32 1.0, %v5121_v34  ;;  %v1688_v40 = vadd.f32 %v5117_v5, %v1687_v17  ;;  %v1843_v17 = vand.u32 2147483647, %v5922_v58  ;;  %v1808_v20 = vadd.f32 %v5956_v3, %v1807_v18 }
 0x20d   : > { %5128 = vpow2.f32 %v4298_v52  ;;  %v5985_v10 = vpop.eup %5124  ;;  %v1745_v53 = vmul.f32 %v5979_v59, %v5912_v37  ;;  %vm1750_vm12 = vweird.f32 %v5979_v59 }
 0x20e   : > { %5130 = vrcp.f32 %v5983_v22  ;;  %v6000_v25 = vpop.eup %5126  ;;  %v1835_v27 = vmul.f32 %v5985_v10, %v5922_v58  ;;  %v1692_v62 = vsel %vm1691_vm13, %v5117_v5, %v1688_v40  ;;  %v1813_v5 = vand.u32 2147483647, %v5892_v21 }
 0x20f   : > { %v1697_v1 = vsel %vm1694_vm14, %v1696_v47, %v1692_v62  ;;  %v1730_v60 = vmul.f32 %v6000_v25, %v5934_v4  ;;  %v1746_v51 = vsub.f32 1.0, %v1745_v53  ;;  %v1785_v57 = vand.u32 2147483648, %v5983_v22 }
 0x210   : > { %v1850_v52 = vmul.f32 %v1697_v1, %v5834_v8  ;;  %v1836_v46 = vsub.f32 1.0, %v1835_v27  ;;  %v1797_v8 = vsel %vm6039_vm1, %v5894_v41, %v1793_v56  ;;  %vm6059_vm5 = vcmp.eq.f32.partialorder %v1813_v5, 8.507059e+37 }
 0x211   : > { %v1731_v13 = vsub.f32 1.0, %v1730_v60  ;;  %v1802_v40 = vsel %vm6002_vm10, %v1801_v28, %v1797_v8  ;;  %v1783_v56 = vand.u32 2147483647, %v5983_v22  ;;  %vm6068_vm7 = vcmp.eq.f32.partialorder %v1843_v17, 8.507059e+37 }
 0x212   : > { %v1870_v55 = vmul.f32 %v5997_v15, %v1850_v52  ;;  %v1837_v27 = vmul.f32 %v5985_v10, %v1836_v46  ;;  %v1747_v28 = vmul.f32 %v5979_v59, %v1746_v51  ;;  %v1857_v60 = vmul.f32 %v1802_v40, %v5794_v38 }
 0x213   : > { %v5129_v35 = vpop.eup %5128  ;;  %v1732_v49 = vmul.f32 %v6000_v25, %v1731_v13  ;;  %vm1779_vm9 = vweird.f32 %v5983_v22  ;;  %v1786_v5 = vor.u32 1.1754944e-38, %v1785_v57  ;;  %vm1840_vm11 = vweird.f32 %v5985_v10  ;;  %v4944_v13 = vld [vmem:[%s7908_s4 + $0xb8] sm:$0xff] }
 0x214   : > { %v6030_v34 = vadd.f32 1.0, %v5129_v35  ;;  %v5131_v9 = vpop.eup %5130  ;;  %v1881_v47 = vadd.f32 %v1870_v55, %v1869_v11  ;;  %v1846_v35 = vor.u32 1.1754944e-38, %v1845_v43  ;;  %v1855_v11 = vmul.f32 %v1772_v39, %v5785_v19  ;;  %vm6108_vm1 = vmor %vm1839_vm3, %vm1840_vm11 }
 0x215   : > { %v1775_v23 = vmul.f32 %v5131_v9, %v5983_v22  ;;  %vm1780_vm6 = vweird.f32 %v5131_v9  ;;  %v1838_v19 = vadd.f32 %v5985_v10, %v1837_v27  ;;  %v1812_v38 = vsel %vm6079_vm8, %v5956_v3, %v1808_v20  ;;  %v4923_v22 = vld [vmem:[%s7908_s4 + $0x10] sm:$0xff] }
 0x216   : > { %5132 = vrcp.f32 %v6030_v34  ;;  %v1882_v62 = vadd.f32 %v1881_v47, %v1871_v44  ;;  %vm1781_vm10 = vmor %vm1779_vm9, %vm1780_vm6  ;;  %vm1734_vm13 = vweird.f32 %v5934_v4  ;;  %vm1784_vm14 = vcmp.eq.f32.partialorder %v1783_v56, 8.507059e+37 }
 0x217   : > { %v1776_v41 = vsub.f32 1.0, %v1775_v23  ;;  %v1733_v6 = vadd.f32 %v6000_v25, %v1732_v49  ;;  %vm1735_vm0 = vweird.f32 %v6000_v25  ;;  %v1738_v51 = vand.u32 2147483647, %v5934_v4 }
 0x218   : > { %1883 = vadd.xlane.f32.xlu0 %v1882_v62  ;;  %v1740_v3 = vand.u32 2147483648, %v5934_v4  ;;  %v1828_v18 = vand.u32 2147483647, %v6030_v34  ;;  %v1842_v23 = vsel %vm6108_vm1, %v5985_v10, %v1838_v19  ;;  %vm6120_vm6 = vmor %vm1734_vm13, %vm1735_vm0  ;;  %v1875_v58 = vmul.f32 %v5871_v50, %v1855_v11  ;;  %v4940_v19 = vld [vmem:[%s7908_s4 + $0x98] sm:$0xff] }
 0x219   : > { %v1777_v24 = vmul.f32 %v5131_v9, %v1776_v41  ;;  %v1748_v17 = vadd.f32 %v5979_v59, %v1747_v28  ;;  %v1737_v43 = vsel %vm6120_vm6, %v6000_v25, %v1733_v6  ;;  %vm1824_vm3 = vweird.f32 %v6030_v34  ;;  %v4941_v6 = vld [vmem:[%s7908_s4 + $0xa0] sm:$0xff] }
 0x21a   : > { %v1741_v4 = vor.u32 1.1754944e-38, %v1740_v3  ;;  %v1847_v40 = vsel %vm6068_vm7, %v1846_v35, %v1842_v23  ;;  %vm1739_vm8 = vcmp.eq.f32.partialorder %v1738_v51, 8.507059e+37  ;;  %vm1829_vm9 = vcmp.eq.f32.partialorder %v1828_v18, 8.507059e+37  ;;  %v4924_v51 = vld [vmem:[%s7908_s4 + $0x18] sm:$0xff]  ;;  %v4942_v3 = vld [vmem:[%s7908_s4 + $0xa8] sm:$0xff]  ;;  %v4961_v18 = vld [vmem:[%s7908_s4 + $0x140] sm:$0xff] }
 0x21b   : > { %v1778_v44 = vadd.f32 %v5131_v9, %v1777_v24  ;;  %v1755_v20 = vand.u32 2147483648, %v5912_v37  ;;  %v1860_v24 = vmul.f32 %v1847_v40, %v5831_v32  ;;  %v1753_v56 = vand.u32 2147483647, %v5912_v37  ;;  %v4935_v23 = vld [vmem:[%s7908_s4 + $0x70] sm:$0xff]  ;;  %v4929_v40 = vld [vmem:[%s7908_s4 + $0x40] sm:$0xff] }
 0x21c   : > { %v5133_v1 = vpop.eup %5132  ;;  %v1742_v47 = vsel %vm1739_vm8, %v1741_v4, %v1737_v43  ;;  %vm2547_vm11 = vcmask 261120   ;;  %v4945_v43 = vld [vmem:[%s7908_s4 + $0xc0] sm:$0xff]  ;;  %v4946_v4 = vld [vmem:[%s7908_s4 + $0xc8] sm:$0xff] }
 0x21d   : > { %v1820_v52 = vmul.f32 %v5133_v1, %v6030_v34  ;;  %v1782_v21 = vsel %vm1781_vm10, %v5131_v9, %v1778_v44  ;;  %v1830_v9 = vand.u32 2147483648, %v6030_v34  ;;  %vm1825_vm2 = vweird.f32 %v5133_v1 }
 0x21e   : > { %v1787_v14 = vsel %vm1784_vm14, %v1786_v5, %v1782_v21  ;;  %vm1749_vm10 = vweird.f32 %v5912_v37  ;;  %v1756_v31 = vor.u32 1.1754944e-38, %v1755_v20  ;;  %v1880_v2 = vmul.f32 %v5887_v45, %v1860_v24  ;;  %v4931_v5 = vld [vmem:[%s7908_s4 + $0x50] sm:$0xff]  ;;  %v4932_v21 = vld [vmem:[%s7908_s4 + $0x58] sm:$0xff]  ;;  %v2044_v20 = vld [vmem:[%s7909_s5 + $0x8] sm:$0xff] }
 0x21f   : > { %v1821_v46 = vsub.f32 1.0, %v1820_v52  ;;  %v1856_v8 = vmul.f32 %v1787_v14, %v5884_v33  ;;  %v1817_v33 = vsel %vm6059_vm5, %v1816_v26, %v1812_v38  ;;  %v1877_v26 = vmul.f32 %v5887_v45, %v1857_v60  ;;  %vm1826_vm5 = vmor %vm1824_vm3, %vm1825_vm2  ;;  %v4922_v52 = vld [vmem:[%s7908_s4 + $0x8] sm:$0xff]  ;;  %v4959_v14 = vld [vmem:[%s7908_s4 + $0x130] sm:$0xff] }
 0x220   : > { %v1831_v39 = vor.u32 1.1754944e-38, %v1830_v9  ;;  %v1858_v53 = vmul.f32 %v1817_v33, %v5820_v30  ;;  %v1727_v30 = vsel %vm6094_vm15, %v5947_v12, %v1722_v63  ;;  %vm1751_vm7 = vmor %vm1749_vm10, %vm1750_vm12  ;;  %vm1754_vm4 = vcmp.eq.f32.partialorder %v1753_v56, 8.507059e+37  ;;  %v4958_v38 = vld [vmem:[%s7908_s4 + $0x128] sm:$0xff] }
 0x221   : > { %v1822_v42 = vmul.f32 %v5133_v1, %v1821_v46  ;;  %v1876_v55 = vmul.f32 %v5997_v15, %v1856_v8  ;;  %v1752_v37 = vsel %vm1751_vm7, %v5979_v59, %v1748_v17  ;;  %v1852_v62 = vmul.f32 %v1727_v30, %v5772_v29  ;;  %v4933_v46 = vld [vmem:[%s7908_s4 + $0x60] sm:$0xff]  ;;  %v4960_v8 = vld [vmem:[%s7908_s4 + $0x138] sm:$0xff]  ;;  %v4934_v9 = vld [vmem:[%s7908_s4 + $0x68] sm:$0xff] }
 0x222   : > { %v1878_v32 = vmul.f32 %v5871_v50, %v1858_v53  ;;  %v1757_v12 = vsel %vm1754_vm4, %v1756_v31, %v1752_v37  ;;  %v4926_v33 = vld [vmem:[%s7908_s4 + $0x28] sm:$0xff]  ;;  %v4927_v17 = vld [vmem:[%s7908_s4 + $0x30] sm:$0xff]  ;;  %vm3133_vm12 = vcmask 7168  }
 0x223   : > { %v1823_v10 = vadd.f32 %v5133_v1, %v1822_v42  ;;  %v1889_v41 = vadd.f32 %v1876_v55, %v1875_v58  ;;  %v1872_v35 = vmul.f32 %v5871_v50, %v1852_v62  ;;  %v4939_v50 = vld [vmem:[%s7908_s4 + $0x90] sm:$0xff]  ;;  %v4962_v58 = vld [vmem:[%s7908_s4 + $0x148] sm:$0xff]  ;;  %v4936_v55 = vld [vmem:[%s7908_s4 + $0x78] sm:$0xff] }
 0x224   : > { %v4943_v42 = vld [vmem:[%s7908_s4 + $0xb0] sm:$0xff]  ;;  %v2080_v37 = vld [vmem:[%s7909_s5 + $0x128] sm:$0xff] }
 0x225   : > { %v1827_v57 = vsel %vm1826_vm5, %v5133_v1, %v1823_v10  ;;  %v1890_v25 = vadd.f32 %v1889_v41, %v1877_v26  ;;  %v4963_v10 = vld [vmem:[%s7908_s4 + $0x150] sm:$0xff]  ;;  %v4928_v26 = vld [vmem:[%s7908_s4 + $0x38] sm:$0xff]  ;;  %v2043_v41 = vld [vmem:[%s7909_s5] sm:$0xff] }
 0x226   : > { %v1832_v27 = vsel %vm1829_vm9, %v1831_v39, %v1827_v57  ;;  %v4964_v39 = vld [vmem:[%s7908_s4 + $0x158] sm:$0xff]  ;;  %v4947_v57 = vld [vmem:[%s7908_s4 + $0xd0] sm:$0xff]  ;;  %v2116_v31 = vld [vmem:[%s7909_s5 + $0x248] sm:$0xff] }
 0x227   : > { %v1859_v34 = vmul.f32 %v1832_v27, %v5950_v36  ;;  %1891 = vadd.xlane.f32.xlu1 %v1890_v25  ;;  %v1853_v36 = vmul.f32 %v1742_v47, %v5852_v61  ;;  %v1854_v61 = vmul.f32 %v1757_v12, %v5812_v48  ;;  %v4921_v48 = vld [vmem:[%s7908_s4] sm:$0xff] }
 0x228   : > { %v4965_v47 = vld [vmem:[%s7908_s4 + $0x160] sm:$0xff] }
 0x229   : > { %v1879_v49 = vmul.f32 %v5997_v15, %v1859_v34  ;;  %v1873_v0 = vmul.f32 %v5997_v15, %v1853_v36  ;;  %v1874_v1 = vmul.f32 %v5887_v45, %v1854_v61  ;;  %v4957_v45 = vld [vmem:[%s7908_s4 + $0x120] sm:$0xff] }
 0x22a   : > { %v4937_v25 = vld [vmem:[%s7908_s4 + $0x80] sm:$0xff] }
 0x22b   : > { %v1893_v7 = vadd.f32 %v1879_v49, %v1878_v32  ;;  %v1885_v28 = vadd.f32 %v1873_v0, %v1872_v35  ;;  %v2079_v36 = vld [vmem:[%s7909_s5 + $0x120] sm:$0xff] }
 0x22c   : > { %v2115_v49 = vld [vmem:[%s7909_s5 + $0x240] sm:$0xff] }
 0x22d   : > { %v1894_v63 = vadd.f32 %v1893_v7, %v1880_v2  ;;  %v1886_v59 = vadd.f32 %v1885_v28, %v1874_v1  ;;  %v2045_v2 = vld [vmem:[%s7909_s5 + $0x10] sm:$0xff]  ;;  %v4948_v1 = vld [vmem:[%s7908_s4 + $0xd8] sm:$0xff] }
 0x22f   : > { %1895 = vadd.xlane.f32.xlu2 %v1894_v63  ;;  %v4930_v63 = vld [vmem:[%s7908_s4 + $0x48] sm:$0xff] }
 0x237   : > { %1887 = vadd.xlane.f32.xlu2 %v1886_v59  ;;  %v4966_v59 = vld [vmem:[%s7908_s4 + $0x168] sm:$0xff] }
 0x28b   : > { %v1884_v54 = vpop.xlane.xlu0 %1883 }
 0x29a   : > { %v1892_v11 = vpop.xlane.xlu1 %1891 }
 0x2a2   : > { %v1896_v29 = vpop.xlane.xlu2 %1895 }
 0x2a3   : > { %v1898_v60 = vpack.c.bf16 %v1896_v29, %v1892_v11 }
 0x2a5   : > { %2770 = vmatpush.bf16.msrb.mxu0 %v1898_v60  ;;  %5060 = vmatpush.bf16.msra.mxu1 %v1898_v60 }
 0x2a6   : > { %5061 = vmatpush.bf16.msrb.mxu2 %v1898_v60  ;;  %5062 = vmatpush.bf16.msra.mxu3 %v1898_v60 }
 0x2aa   : > { %v1888_v44 = vpop.xlane.xlu2 %1887 }
 0x2ab   : > { %v1897_v15 = vpack.c.bf16 %v1888_v44, %v1884_v54  ;;  %v4938_v44 = vld [vmem:[%s7908_s4 + $0x88] sm:$0xff] }
 0x2ad   : > { %2771 = vmatpush.bf16.msrb.mxu0 %v1897_v15  ;;  %5063 = vmatpush.bf16.msra.mxu1 %v1897_v15 }
 0x2ae   : > { %5064 = vmatpush.bf16.msrb.mxu2 %v1897_v15  ;;  %5065 = vmatpush.bf16.msra.mxu3 %v1897_v15  ;;  %v2046_v15 = vld [vmem:[%s7909_s5 + $0x18] sm:$0xff] }
 0x2b0   : > { %4588 = vmatmul.msk.bf16.vlgmr.msrb.gmra.mxu0 %vm2547_vm11, %v4921_v48  ;;  %4598 = vmatmul.msk.bf16.vlgmr.msra.gmra.mxu1 %vm2547_vm11, %v4931_v5 }
 0x2b1   : > { %4606 = vmatmul.msk.bf16.vlgmr.msrb.gmra.mxu2 %vm2547_vm11, %v4939_v50  ;;  %4624 = vmatmul.msk.bf16.vlgmr.msra.gmra.mxu3 %vm2547_vm11, %v4957_v45 }
 0x2c0   : > { %4589 = vmatmul.msk.bf16.gmra.mxu0 %vm2547_vm11, %v4922_v52  ;;  %4599 = vmatmul.msk.bf16.gmra.mxu1 %vm2547_vm11, %v4932_v21  ;;  %v2081_v52 = vld [vmem:[%s7909_s5 + $0x130] sm:$0xff]  ;;  %v2082_v21 = vld [vmem:[%s7909_s5 + $0x138] sm:$0xff] }
 0x2c1   : > { %4607 = vmatmul.msk.bf16.gmra.mxu2 %vm2547_vm11, %v4940_v19  ;;  %4625 = vmatmul.msk.bf16.gmra.mxu3 %vm2547_vm11, %v4958_v38  ;;  %v2117_v38 = vld [vmem:[%s7909_s5 + $0x250] sm:$0xff] }
 0x2d0   : > { %4590 = vmatmul.msk.bf16.gmra.mxu0 %vm2547_vm11, %v4923_v22  ;;  %4600 = vmatmul.msk.bf16.gmra.mxu1 %vm2547_vm11, %v4933_v46  ;;  %v2118_v22 = vld [vmem:[%s7909_s5 + $0x258] sm:$0xff] }
 0x2d1   : > { %4608 = vmatmul.msk.bf16.gmra.mxu2 %vm2547_vm11, %v4941_v6  ;;  %4626 = vmatmul.msk.bf16.gmra.mxu3 %vm2547_vm11, %v4959_v14  ;;  %v2047_v14 = vld [vmem:[%s7909_s5 + $0x20] sm:$0xff] }
 0x2e0   : > { %4591 = vmatmul.msk.bf16.gmra.mxu0 %vm2547_vm11, %v4924_v51  ;;  %4601 = vmatmul.msk.bf16.gmra.mxu1 %vm2547_vm11, %v4934_v9 }
 0x2e1   : > { %4609 = vmatmul.msk.bf16.gmra.mxu2 %vm2547_vm11, %v4942_v3  ;;  %4627 = vmatmul.msk.bf16.gmra.mxu3 %vm2547_vm11, %v4960_v8 }
 0x2f0   : > { %4592 = vmatmul.msk.bf16.gmra.mxu0 %vm2547_vm11, %v4925_v16  ;;  %4602 = vmatmul.msk.bf16.gmra.mxu1 %vm2547_vm11, %v4935_v23 }
 0x2f1   : > { %4610 = vmatmul.msk.bf16.gmra.mxu2 %vm2547_vm11, %v4943_v42  ;;  %4628 = vmatmul.msk.bf16.gmra.mxu3 %vm2547_vm11, %v4961_v18  ;;  %v4949_v42 = vld [vmem:[%s7908_s4 + $0xe0] sm:$0xff]  ;;  %v4967_v18 = vld [vmem:[%s7908_s4 + $0x170] sm:$0xff] }
 0x300   : > { %4593 = vmatmul.msk.bf16.gmra.mxu0 %vm2547_vm11, %v4926_v33  ;;  %4603 = vmatmul.msk.bf16.gmra.mxu1 %vm2547_vm11, %v4936_v55  ;;  %v2048_v55 = vld [vmem:[%s7909_s5 + $0x28] sm:$0xff] }
 0x301   : > { %4611 = vmatmul.msk.bf16.gmra.mxu2 %vm2547_vm11, %v4944_v13  ;;  %4629 = vmatmul.msk.bf16.gmra.mxu3 %vm2547_vm11, %v4962_v58 }
 0x310   : > { %4594 = vmatmul.msk.bf16.gmra.mxu0 %vm2547_vm11, %v4927_v17  ;;  %4604 = vmatmul.msk.bf16.gmra.mxu1 %vm2547_vm11, %v4937_v25 }
 0x311   : > { %4612 = vmatmul.msk.bf16.gmra.mxu2 %vm2547_vm11, %v4945_v43  ;;  %4630 = vmatmul.msk.bf16.gmra.mxu3 %vm2547_vm11, %v4963_v10 }
 0x320   : > { %4595 = vmatmul.msk.bf16.gmra.mxu0 %vm2547_vm11, %v4928_v26  ;;  %4605 = vmatmul.msk.bf16.gmra.mxu1 %vm2547_vm11, %v4938_v44 }
 0x321   : > { %4613 = vmatmul.msk.bf16.gmra.mxu2 %vm2547_vm11, %v4946_v4  ;;  %4631 = vmatmul.msk.bf16.gmra.mxu3 %vm2547_vm11, %v4964_v39  ;;  %v2119_v39 = vld [vmem:[%s7909_s5 + $0x260] sm:$0xff] }
 0x32d   : > { %v2773_v53 = vpop.f32.mrf.mxu0  ;;  %v6317_v32 = vpop.f32.mrf.mxu1 }
 0x32e   : > { %v2774_v27 = vadd.f32 %v2773_v53, %v2043_v41  ;;  %v2120_v41 = vld [vmem:[%s7909_s5 + $0x268] sm:$0xff] }
 0x330   : > { %3134 = vst.msk [vmem:[%s6292_s20] sm:$0xff] %vm3133_vm12, %v2774_v27  ;;  %4596 = vmatmul.msk.bf16.gmra.mxu0 %vm2547_vm11, %v4929_v40  ;;  %v2049_v40 = vld [vmem:[%s7909_s5 + $0x30] sm:$0xff] }
 0x331   : > { %4614 = vmatmul.msk.bf16.gmra.mxu2 %vm2547_vm11, %v4947_v57  ;;  %4632 = vmatmul.msk.bf16.gmra.mxu3 %vm2547_vm11, %v4965_v47 }
 0x334   : > { %v2863_v34 = vpop.f32.mrf.mxu2  ;;  %v2953_v24 = vpop.f32.mrf.mxu3 }
 0x335   : > { %v2775_v56 = vpop.f32.mrf.mxu0  ;;  %v6328_v62 = vadd.f32 %v2863_v34, %v2079_v36  ;;  %v6336_v0 = vadd.f32 %v2953_v24, %v2115_v49  ;;  %v6355_v54 = vpop.f32.mrf.mxu1  ;;  %v4968_v34 = vld [vmem:[%s7908_s4 + $0x178] sm:$0xff] }
 0x336   : > { %v2776_v30 = vadd.f32 %v2775_v56, %v2044_v20  ;;  %v4950_v20 = vld [vmem:[%s7908_s4 + $0xe8] sm:$0xff]  ;;  %v2050_v36 = vld [vmem:[%s7909_s5 + $0x38] sm:$0xff] }
 0x338   : > { %3135 = vst.msk [vmem:[%s6292_s20 + $0x8] sm:$0xff] %vm3133_vm12, %v2776_v30 }
 0x33c   : > { %v2865_v7 = vpop.f32.mrf.mxu2  ;;  %v2955_v12 = vpop.f32.mrf.mxu3 }
 0x33d   : > { %v6338_v61 = vadd.f32 %v2865_v7, %v2080_v37  ;;  %v6340_v35 = vadd.f32 %v2955_v12, %v2116_v31  ;;  %v2778_v28 = vpop.f32.mrf.mxu0  ;;  %v6371_v19 = vpop.f32.mrf.mxu1  ;;  %v2121_v12 = vld [vmem:[%s7909_s5 + $0x270] sm:$0xff] }
 0x33e   : > { %v2779_v11 = vadd.f32 %v2778_v28, %v2045_v2  ;;  %v2051_v28 = vld [vmem:[%s7909_s5 + $0x40] sm:$0xff] }
 0x33f   : > { %v3160_v29 = vpack.c.bf16 %v6338_v61, %v6328_v62  ;;  %v3178_v60 = vpack.c.bf16 %v6340_v35, %v6336_v0  ;;  %v2138_v0 = vld [vmem:[%s7909_s5 + $0x2f8] sm:$0xff]  ;;  %v2136_v35 = vld [vmem:[%s7909_s5 + $0x2e8] sm:$0xff] }
 0x340   : > { %3136 = vst.msk [vmem:[%s6292_s20 + $0x10] sm:$0xff] %vm3133_vm12, %v2779_v11  ;;  %4597 = vmatmul.msk.bf16.gmra.mxu0 %vm2547_vm11, %v4930_v63  ;;  %v2122_v63 = vld [vmem:[%s7909_s5 + $0x278] sm:$0xff] }
 0x341   : > { %4615 = vmatmul.msk.bf16.gmra.mxu2 %vm2547_vm11, %v4948_v1  ;;  %4633 = vmatmul.msk.bf16.gmra.mxu3 %vm2547_vm11, %v4966_v59 }
 0x344   : > { %v2868_v48 = vpop.f32.mrf.mxu2  ;;  %v2958_v50 = vpop.f32.mrf.mxu3 }
 0x345   : > { %v2780_v45 = vpop.f32.mrf.mxu0  ;;  %v6382_v6 = vadd.f32 %v2868_v48, %v2081_v52  ;;  %v6387_v3 = vadd.f32 %v2958_v50, %v2117_v38  ;;  %v6405_v58 = vpop.f32.mrf.mxu1  ;;  %v4951_v48 = vld [vmem:[%s7908_s4 + $0xf0] sm:$0xff]  ;;  %v4969_v50 = vld [vmem:[%s7908_s4 + $0x180] sm:$0xff]  ;;  %v2052_v38 = vld [vmem:[%s7909_s5 + $0x48] sm:$0xff] }
 0x346   : > { %v2781_v5 = vadd.f32 %v2780_v45, %v2046_v15 }
 0x348   : > { %3137 = vst.msk [vmem:[%s6292_s20 + $0x18] sm:$0xff] %vm3133_vm12, %v2781_v5 }
 0x34c   : > { %v2870_v46 = vpop.f32.mrf.mxu2  ;;  %v2960_v51 = vpop.f32.mrf.mxu3 }
 0x34d   : > { %v6389_v8 = vadd.f32 %v2870_v46, %v2082_v21  ;;  %v6391_v9 = vadd.f32 %v2960_v51, %v2118_v22  ;;  %v2783_v16 = vpop.f32.mrf.mxu0  ;;  %v6416_v4 = vpop.f32.mrf.mxu1 }
 0x34e   : > { %v2784_v23 = vadd.f32 %v2783_v16, %v2047_v14  ;;  %v2123_v16 = vld [vmem:[%s7909_s5 + $0x280] sm:$0xff] }
 0x34f   : > { %v3161_v33 = vpack.c.bf16 %v6389_v8, %v6382_v6  ;;  %v3179_v13 = vpack.c.bf16 %v6391_v9, %v6387_v3  ;;  %v2137_v3 = vld [vmem:[%s7909_s5 + $0x2f0] sm:$0xff] }
 0x350   : > { %3138 = vst.msk [vmem:[%s6292_s20 + $0x20] sm:$0xff] %vm3133_vm12, %v2784_v23 }
 0x351   : > { %4616 = vmatmul.msk.bf16.gmra.mxu2 %vm2547_vm11, %v4949_v42  ;;  %4634 = vmatmul.msk.bf16.gmra.mxu3 %vm2547_vm11, %v4967_v18  ;;  %v2124_v42 = vld [vmem:[%s7909_s5 + $0x288] sm:$0xff]  ;;  %v2053_v18 = vld [vmem:[%s7909_s5 + $0x50] sm:$0xff] }
 0x354   : > { %v6412_v17 = vpop.f32.mrf.mxu2  ;;  %v2963_v43 = vpop.f32.mrf.mxu3 }
 0x355   : > { %v2785_v10 = vpop.f32.mrf.mxu0  ;;  %v6429_v47 = vadd.f32 %v2963_v43, %v2119_v39  ;;  %v6443_v30 = vpop.f32.mrf.mxu1  ;;  %v4952_v39 = vld [vmem:[%s7908_s4 + $0xf8] sm:$0xff] }
 0x356   : > { %v2786_v26 = vadd.f32 %v2785_v10, %v2048_v55 }
 0x358   : > { %3139 = vst.msk [vmem:[%s6292_s20 + $0x28] sm:$0xff] %vm3133_vm12, %v2786_v26 }
 0x35c   : > { %v6427_v53 = vpop.f32.mrf.mxu2  ;;  %v2965_v57 = vpop.f32.mrf.mxu3 }
 0x35d   : > { %v6431_v27 = vadd.f32 %v2965_v57, %v2120_v41  ;;  %v2788_v25 = vpop.f32.mrf.mxu0  ;;  %v6454_v7 = vpop.f32.mrf.mxu1  ;;  %v4970_v41 = vld [vmem:[%s7908_s4 + $0x188] sm:$0xff] }
 0x35e   : > { %v2789_v24 = vadd.f32 %v2788_v25, %v2049_v40 }
 0x35f   : > { %v3180_v56 = vpack.c.bf16 %v6431_v27, %v6429_v47 }
 0x360   : > { %3140 = vst.msk [vmem:[%s6292_s20 + $0x30] sm:$0xff] %vm3133_vm12, %v2789_v24 }
 0x361   : > { %4617 = vmatmul.msk.bf16.gmra.mxu2 %vm2547_vm11, %v4950_v20  ;;  %4635 = vmatmul.msk.bf16.gmra.mxu3 %vm2547_vm11, %v4968_v34  ;;  %v2054_v20 = vld [vmem:[%s7909_s5 + $0x58] sm:$0xff] }
 0x364   : > { %v6450_v49 = vpop.f32.mrf.mxu2  ;;  %v2968_v37 = vpop.f32.mrf.mxu3 }
 0x365   : > { %v2790_v31 = vpop.f32.mrf.mxu0  ;;  %v6467_v11 = vadd.f32 %v2968_v37, %v2121_v12  ;;  %v6481_v52 = vpop.f32.mrf.mxu1  ;;  %v2087_v12 = vld [vmem:[%s7909_s5 + $0x160] sm:$0xff] }
 0x366   : > { %v2791_v2 = vadd.f32 %v2790_v31, %v2050_v36  ;;  %v2089_v31 = vld [vmem:[%s7909_s5 + $0x170] sm:$0xff] }
 0x368   : > { %3141 = vst.msk [vmem:[%s6292_s20 + $0x38] sm:$0xff] %vm3133_vm12, %v2791_v2 }
 0x36c   : > { %v6465_v1 = vpop.f32.mrf.mxu2  ;;  %v2970_v59 = vpop.f32.mrf.mxu3 }
 0x36d   : > { %v6469_v44 = vadd.f32 %v2970_v59, %v2122_v63  ;;  %v2793_v15 = vpop.f32.mrf.mxu0  ;;  %v2843_v51 = vpop.f32.mrf.mxu1  ;;  %v2088_v63 = vld [vmem:[%s7909_s5 + $0x168] sm:$0xff]  ;;  %v2090_v59 = vld [vmem:[%s7909_s5 + $0x178] sm:$0xff] }
 0x36e   : > { %v2794_v45 = vadd.f32 %v2793_v15, %v2051_v28  ;;  %v2125_v28 = vld [vmem:[%s7909_s5 + $0x290] sm:$0xff]  ;;  %v2126_v15 = vld [vmem:[%s7909_s5 + $0x298] sm:$0xff] }
 0x36f   : > { %v3181_v5 = vpack.c.bf16 %v6469_v44, %v6467_v11 }
 0x370   : > { %3142 = vst.msk [vmem:[%s6292_s20 + $0x40] sm:$0xff] %vm3133_vm12, %v2794_v45  ;;  %v2085_v45 = vld [vmem:[%s7909_s5 + $0x150] sm:$0xff] }
 0x371   : > { %4618 = vmatmul.msk.bf16.gmra.mxu2 %vm2547_vm11, %v4951_v48  ;;  %4636 = vmatmul.msk.bf16.gmra.mxu3 %vm2547_vm11, %v4969_v50  ;;  %v2055_v50 = vld [vmem:[%s7909_s5 + $0x60] sm:$0xff] }
 0x374   : > { %v2883_v21 = vpop.f32.mrf.mxu2  ;;  %v2973_v22 = vpop.f32.mrf.mxu3 }
 0x375   : > { %v2795_v14 = vpop.f32.mrf.mxu0  ;;  %v6499_v43 = vadd.f32 %v2973_v22, %v2123_v16  ;;  %v2845_v25 = vpop.f32.mrf.mxu1  ;;  %v2086_v16 = vld [vmem:[%s7909_s5 + $0x158] sm:$0xff] }
 0x376   : > { %v2796_v46 = vadd.f32 %v2795_v14, %v2052_v38  ;;  %v2884_v38 = vadd.f32 %v2883_v21, %v2087_v12  ;;  %v4971_v21 = vld [vmem:[%s7908_s4 + $0x190] sm:$0xff] }
 0x378   : > { %3143 = vst.msk [vmem:[%s6292_s20 + $0x48] sm:$0xff] %vm3133_vm12, %v2796_v46  ;;  %v2073_v46 = vld [vmem:[%s7909_s5 + $0xf0] sm:$0xff] }
 0x37c   : > { %v2885_v23 = vpop.f32.mrf.mxu2  ;;  %v2975_v55 = vpop.f32.mrf.mxu3 }
 0x37d   : > { %v6501_v10 = vadd.f32 %v2975_v55, %v2124_v42  ;;  %v2798_v26 = vpop.f32.mrf.mxu0  ;;  %v2848_v2 = vpop.f32.mrf.mxu1  ;;  %v2886_v42 = vadd.f32 %v2885_v23, %v2088_v63 }
 0x37e   : > { %v2799_v40 = vadd.f32 %v2798_v26, %v2053_v18 }
 0x37f   : > { %v3182_v57 = vpack.c.bf16 %v6501_v10, %v6499_v43  ;;  %v2102_v43 = vld [vmem:[%s7909_s5 + $0x1d8] sm:$0xff] }
 0x380   : > { %3144 = vst.msk [vmem:[%s6292_s20 + $0x50] sm:$0xff] %vm3133_vm12, %v2799_v40 }
 0x381   : > { %4619 = vmatmul.msk.bf16.gmra.mxu2 %vm2547_vm11, %v4952_v39  ;;  %4637 = vmatmul.msk.bf16.gmra.mxu3 %vm2547_vm11, %v4970_v41  ;;  %v2071_v41 = vld [vmem:[%s7909_s5 + $0xe0] sm:$0xff] }
 0x382   : > { %v2844_v12 = vadd.f32 %v2843_v51, %v2071_v41  ;;  %v2070_v51 = vld [vmem:[%s7909_s5 + $0xd8] sm:$0xff] }
 0x384   : > { %v2888_v34 = vpop.f32.mrf.mxu2  ;;  %v2978_v24 = vpop.f32.mrf.mxu3 }
 0x385   : > { %v2800_v36 = vpop.f32.mrf.mxu0  ;;  %v2889_v48 = vadd.f32 %v2888_v34, %v2089_v31  ;;  %v6550_v18 = vadd.f32 %v2978_v24, %v2125_v28  ;;  %v2849_v24 = vadd.f32 %v2848_v2, %v2073_v46  ;;  %v2881_v31 = vadd.f32 %v6465_v1, %v2086_v16  ;;  %v2850_v63 = vpop.f32.mrf.mxu1  ;;  %v2083_v28 = vld [vmem:[%s7909_s5 + $0x140] sm:$0xff]  ;;  %v2084_v2 = vld [vmem:[%s7909_s5 + $0x148] sm:$0xff] }
 0x386   : > { %v2801_v37 = vadd.f32 %v2800_v36, %v2054_v20  ;;  %v2072_v20 = vld [vmem:[%s7909_s5 + $0xe8] sm:$0xff]  ;;  %v2074_v36 = vld [vmem:[%s7909_s5 + $0xf8] sm:$0xff]  ;;  %v2841_v16 = vadd.f32 %v6481_v52, %v2070_v51 }
 0x387   : > { %v2851_v1 = vadd.f32 %v2850_v63, %v2074_v36  ;;  %v4972_v63 = vld [vmem:[%s7908_s4 + $0x198] sm:$0xff] }
 0x388   : > { %3145 = vst.msk [vmem:[%s6292_s20 + $0x58] sm:$0xff] %vm3133_vm12, %v2801_v37  ;;  %v2879_v37 = vadd.f32 %v6450_v49, %v2085_v45  ;;  %v2846_v49 = vadd.f32 %v2845_v25, %v2072_v20  ;;  %v2874_v45 = vadd.f32 %v6412_v17, %v2083_v28  ;;  %v2068_v17 = vld [vmem:[%s7909_s5 + $0xc8] sm:$0xff] }
 0x389   : > { %v2836_v41 = vadd.f32 %v6443_v30, %v2068_v17  ;;  %v2128_v20 = vld [vmem:[%s7909_s5 + $0x2a8] sm:$0xff] }
 0x38a   : > { %v3163_v46 = vpack.c.bf16 %v2881_v31, %v2879_v37 }
 0x38c   : > { %v2890_v22 = vpop.f32.mrf.mxu2  ;;  %v2980_v14 = vpop.f32.mrf.mxu3 }
 0x38d   : > { %v2891_v55 = vadd.f32 %v2890_v22, %v2090_v59  ;;  %v6552_v26 = vadd.f32 %v2980_v14, %v2126_v15  ;;  %v2803_v39 = vpop.f32.mrf.mxu0  ;;  %v3164_v59 = vpack.c.bf16 %v2886_v42, %v2884_v38  ;;  %v2069_v15 = vld [vmem:[%s7909_s5 + $0xd0] sm:$0xff]  ;;  %v2876_v38 = vadd.f32 %v6427_v53, %v2084_v2 }
 0x38e   : > { %v2804_v40 = vadd.f32 %v2803_v39, %v2055_v50  ;;  %v3157_v50 = vpack.c.bf16 %v2851_v1, %v2849_v24  ;;  %v2839_v22 = vadd.f32 %v6454_v7, %v2069_v15  ;;  %v2066_v24 = vld [vmem:[%s7909_s5 + $0xb8] sm:$0xff]  ;;  %v2064_v1 = vld [vmem:[%s7909_s5 + $0xa8] sm:$0xff] }
 0x38f   : > { %v3165_v23 = vpack.c.bf16 %v2891_v55, %v2889_v48  ;;  %v3183_v34 = vpack.c.bf16 %v6552_v26, %v6550_v18  ;;  %v2056_v48 = vld [vmem:[%s7909_s5 + $0x68] sm:$0xff]  ;;  %v3156_v55 = vpack.c.bf16 %v2846_v49, %v2844_v12  ;;  %v3162_v53 = vpack.c.bf16 %v2876_v38, %v2874_v45  ;;  %v2063_v49 = vld [vmem:[%s7909_s5 + $0xa0] sm:$0xff]  ;;  %v2058_v45 = vld [vmem:[%s7909_s5 + $0x78] sm:$0xff] }
 0x390   : > { %3146 = vst.msk [vmem:[%s6292_s20 + $0x60] sm:$0xff] %vm3133_vm12, %v2804_v40  ;;  %3614 = vmatpush.bf16.msra.mxu0 %v3157_v50  ;;  %v3155_v7 = vpack.c.bf16 %v2841_v16, %v2839_v22  ;;  %v2127_v40 = vld [vmem:[%s7909_s5 + $0x2a0] sm:$0xff]  ;;  %v2831_v2 = vadd.f32 %v6405_v58, %v2066_v24  ;;  %v2826_v58 = vadd.f32 %v6355_v54, %v2064_v1  ;;  %v2129_v54 = vld [vmem:[%s7909_s5 + $0x2b0] sm:$0xff] }
 0x391   : > { %4638 = vmatmul.msk.bf16.gmra.mxu3 %vm2547_vm11, %v4971_v21  ;;  %3663 = vmatpush.bf16.msrb.mxu1 %v3165_v23  ;;  %v2067_v21 = vld [vmem:[%s7909_s5 + $0xc0] sm:$0xff]  ;;  %v2065_v23 = vld [vmem:[%s7909_s5 + $0xb0] sm:$0xff] }
 0x392   : > { %v2834_v52 = vadd.f32 %v6416_v4, %v2067_v21  ;;  %v2057_v4 = vld [vmem:[%s7909_s5 + $0x70] sm:$0xff]  ;;  %v2829_v28 = vadd.f32 %v6371_v19, %v2065_v23  ;;  %v2824_v19 = vadd.f32 %v6317_v32, %v2063_v49  ;;  %v4973_v16 = vld [vmem:[%s7908_s4 + $0x1a0] sm:$0xff] }
 0x393   : > { %v4955_v23 = vld [vmem:[%s7908_s4 + $0x110] sm:$0xff] }
 0x394   : > { %v6591_v14 = vpop.f32.mrf.mxu2  ;;  %v2983_v25 = vpop.f32.mrf.mxu3  ;;  %3615 = vmatpush.bf16.msra.mxu0 %v3156_v55  ;;  %v3153_v50 = vpack.c.bf16 %v2831_v2, %v2829_v28  ;;  %v3152_v8 = vpack.c.bf16 %v2826_v58, %v2824_v19  ;;  %v4954_v55 = vld [vmem:[%s7908_s4 + $0x108] sm:$0xff]  ;;  %v2075_v58 = vld [vmem:[%s7909_s5 + $0x100] sm:$0xff] }
 0x395   : > { %3664 = vmatpush.bf16.msrb.mxu1 %v3164_v59  ;;  %v2805_v42 = vpop.f32.mrf.mxu0  ;;  %v6621_v37 = vadd.f32 %v2983_v25, %v2127_v40  ;;  %v3154_v59 = vpack.c.bf16 %v2836_v41, %v2834_v52 }
 0x396   : > { %v2806_v39 = vadd.f32 %v2805_v42, %v2056_v48  ;;  %v4953_v48 = vld [vmem:[%s7908_s4 + $0x100] sm:$0xff] }
 0x397   : > { %4620 = vmatmul.msk.bf16.gmra.mxu2 %vm2547_vm11, %v4953_v48 }
 0x398   : > { %3147 = vst.msk [vmem:[%s6292_s20 + $0x68] sm:$0xff] %vm3133_vm12, %v2806_v39  ;;  %3616 = vmatpush.bf16.msra.mxu0 %v3155_v7  ;;  %v2853_v39 = vpop.f32.mrf.mxu1 }
 0x399   : > { %3665 = vmatpush.bf16.msrb.mxu1 %v3163_v46 }
 0x39c   : > { %v6619_v30 = vpop.f32.mrf.mxu2  ;;  %v2985_v36 = vpop.f32.mrf.mxu3  ;;  %3617 = vmatpush.bf16.msra.mxu0 %v3154_v59 }
 0x39d   : > { %v6623_v31 = vadd.f32 %v2985_v36, %v2128_v20  ;;  %3666 = vmatpush.bf16.msrb.mxu1 %v3162_v53  ;;  %v2808_v12 = vpop.f32.mrf.mxu0  ;;  %v4974_v20 = vld [vmem:[%s7908_s4 + $0x1a8] sm:$0xff]  ;;  %v2059_v36 = vld [vmem:[%s7909_s5 + $0x80] sm:$0xff] }
 0x39e   : > { %v2809_v15 = vadd.f32 %v2808_v12, %v2057_v4  ;;  %v2061_v4 = vld [vmem:[%s7909_s5 + $0x90] sm:$0xff]  ;;  %v2060_v12 = vld [vmem:[%s7909_s5 + $0x88] sm:$0xff] }
 0x39f   : > { %v3184_v51 = vpack.c.bf16 %v6623_v31, %v6621_v37  ;;  %v2141_v37 = vld [vmem:[%s7909_s5 + $0x310] sm:$0xff]  ;;  %v2106_v31 = vld [vmem:[%s7909_s5 + $0x1f8] sm:$0xff] }
 0x3a0   : > { %3148 = vst.msk [vmem:[%s6292_s20 + $0x70] sm:$0xff] %vm3133_vm12, %v2809_v15  ;;  %3618 = vmatpush.bf16.msra.mxu0 %v3153_v50  ;;  %v2855_v7 = vpop.f32.mrf.mxu1  ;;  %v2077_v15 = vld [vmem:[%s7909_s5 + $0x110] sm:$0xff]  ;;  %v2076_v50 = vld [vmem:[%s7909_s5 + $0x108] sm:$0xff] }
 0x3a1   : > { %4639 = vmatmul.msk.bf16.gmra.mxu3 %vm2547_vm11, %v4972_v63  ;;  %3667 = vmatpush.bf16.msrb.mxu1 %v3161_v33  ;;  %v2130_v33 = vld [vmem:[%s7909_s5 + $0x2b8] sm:$0xff] }
 0x3a2   : > { %v2062_v63 = vld [vmem:[%s7909_s5 + $0x98] sm:$0xff] }
 0x3a4   : > { %v6653_v38 = vpop.f32.mrf.mxu2  ;;  %v2988_v22 = vpop.f32.mrf.mxu3  ;;  %3619 = vmatpush.bf16.msra.mxu0 %v3152_v8 }
 0x3a5   : > { %3668 = vmatpush.bf16.msrb.mxu1 %v3160_v29  ;;  %v2810_v6 = vpop.f32.mrf.mxu0  ;;  %v6668_v62 = vadd.f32 %v2988_v22, %v2129_v54  ;;  %v2856_v54 = vadd.f32 %v2855_v7, %v2076_v50 }
 0x3a6   : > { %v2811_v32 = vadd.f32 %v2810_v6, %v2058_v45  ;;  %v2078_v45 = vld [vmem:[%s7909_s5 + $0x118] sm:$0xff] }
 0x3a7   : > { %4621 = vmatmul.msk.bf16.gmra.mxu2 %vm2547_vm11, %v4954_v55 }
 0x3a8   : > { %3149 = vst.msk [vmem:[%s6292_s20 + $0x78] sm:$0xff] %vm3133_vm12, %v2811_v32  ;;  %v2858_v24 = vpop.f32.mrf.mxu1  ;;  %v2854_v32 = vadd.f32 %v2853_v39, %v2075_v58  ;;  %v4956_v39 = vld [vmem:[%s7908_s4 + $0x118] sm:$0xff]  ;;  %v2132_v58 = vld [vmem:[%s7909_s5 + $0x2c8] sm:$0xff] }
 0x3a9   : > { %v2859_v22 = vadd.f32 %v2858_v24, %v2077_v15  ;;  %v2135_v24 = vld [vmem:[%s7909_s5 + $0x2e0] sm:$0xff] }
 0x3ac   : > { %v6666_v25 = vpop.f32.mrf.mxu2  ;;  %v2990_v46 = vpop.f32.mrf.mxu3 }
 0x3ad   : > { %v6670_v61 = vadd.f32 %v2990_v46, %v2130_v33  ;;  %v2813_v29 = vpop.f32.mrf.mxu0 }
 0x3ae   : > { %v2814_v1 = vadd.f32 %v2813_v29, %v2059_v36 }
 0x3af   : > { %v3185_v42 = vpack.c.bf16 %v6670_v61, %v6668_v62  ;;  %v2104_v62 = vld [vmem:[%s7909_s5 + $0x1e8] sm:$0xff] }
 0x3b0   : > { %v2860_v8 = vpop.f32.mrf.mxu1 }
 0x3b1   : > { %4640 = vmatmul.msk.bf16.gmra.mxu3 %vm2547_vm11, %v4973_v16  ;;  %v2861_v33 = vadd.f32 %v2860_v8, %v2078_v45 }
 0x3b3   : > { %v3159_v29 = vpack.c.bf16 %v2861_v33, %v2859_v22  ;;  %v2139_v33 = vld [vmem:[%s7909_s5 + $0x300] sm:$0xff] }
 0x3b4   : > { %v6682_v21 = vpop.f32.mrf.mxu2  ;;  %v6684_v17 = vpop.f32.mrf.mxu3 }
 0x3b5   : > { %v2815_v53 = vpop.f32.mrf.mxu0  ;;  %3669 = vmatpush.bf16.msrb.mxu1 %v3159_v29 }
 0x3b6   : > { %v2816_v48 = vadd.f32 %v2815_v53, %v2060_v12  ;;  %v4975_v53 = vld [vmem:[%s7908_s4 + $0x1b0] sm:$0xff]  ;;  %v4662_v12 = vld [vmem:[%s7910_s6] sm:$0xf] }
 0x3b7   : > { %4622 = vmatmul.msk.bf16.gmra.mxu2 %vm2547_vm11, %v4955_v23  ;;  %v4977_v23 = vld [vmem:[%s7908_s4 + $0x1c0] sm:$0xff] }
 0x3b8   : > { %v3150_v46 = vpack.c.bf16 %v2816_v48, %v2814_v1  ;;  %v2133_v1 = vld [vmem:[%s7909_s5 + $0x2d0] sm:$0xff] }
 0x3bc   : > { %v6686_v52 = vpop.f32.mrf.mxu2  ;;  %v6688_v41 = vpop.f32.mrf.mxu3 }
 0x3bd   : > { %v2818_v40 = vpop.f32.mrf.mxu0  ;;  %v2996_v8 = vadd.f32 %v6688_v41, %v2132_v58 }
 0x3be   : > { %v2819_v28 = vadd.f32 %v2818_v40, %v2061_v4  ;;  %v3158_v40 = vpack.c.bf16 %v2856_v54, %v2854_v32 }
 0x3c0   : > { %3670 = vmatpush.bf16.msrb.mxu1 %v3158_v40 }
 0x3c1   : > { %4641 = vmatmul.msk.bf16.gmra.mxu3 %vm2547_vm11, %v4974_v20 }
 0x3c4   : > { %v6710_v2 = vpop.f32.mrf.mxu2  ;;  %v6712_v59 = vpop.f32.mrf.mxu3 }
 0x3c5   : > { %v2820_v49 = vpop.f32.mrf.mxu0  ;;  %v2999_v22 = vadd.f32 %v6712_v59, %v2133_v1 }
 0x3c6   : > { %v2821_v19 = vadd.f32 %v2820_v49, %v2062_v63  ;;  %v4997_v63 = vld [vmem:[%s7910_s6 + $0x1c] sm:$0xf0] }
 0x3c7   : > { %4623 = vmatmul.msk.bf16.gmra.mxu2 %vm2547_vm11, %v4956_v39  ;;  %v4663_v15 = vor.u32 %v4997_v63, %v4662_v12  ;;  %v4694_v39 = vld [vmem:[%s7910_s6 + $0x40] sm:$0xf] }
 0x3c8   : > { %v3151_v6 = vpack.c.bf16 %v2821_v19, %v2819_v28  ;;  %v2134_v28 = vld [vmem:[%s7909_s5 + $0x2d8] sm:$0xff]  ;;  %v4726_v12 = vld [vmem:[%s7910_s6 + $0x80] sm:$0xf] }
 0x3c9   : > { %v5013_v63 = vld [vmem:[%s7910_s6 + $0x9c] sm:$0xf0] }
 0x3ca   : > { %3620 = vmatpush.bf16.msra.mxu0 %v3151_v6  ;;  %v2131_v6 = vld [vmem:[%s7909_s5 + $0x2c0] sm:$0xff] }
 0x3cb   : > { %v2994_v54 = vadd.f32 %v6684_v17, %v2131_v6  ;;  %v4978_v17 = vld [vmem:[%s7908_s4 + $0x1c8] sm:$0xff]  ;;  %v2095_v6 = vld [vmem:[%s7909_s5 + $0x1a0] sm:$0xff] }
 0x3cc   : > { %v6726_v16 = vpop.f32.mrf.mxu2  ;;  %v3000_v55 = vpop.f32.mrf.mxu3 }
 0x3cd   : > { %v3001_v48 = vadd.f32 %v3000_v55, %v2134_v28  ;;  %v3186_v59 = vpack.c.bf16 %v2996_v8, %v2994_v54  ;;  %v4727_v28 = vor.u32 %v5013_v63, %v4726_v12  ;;  %v2143_v54 = vld [vmem:[%s7909_s5 + $0x320] sm:$0xff] }
 0x3ce   : > { %3621 = vmatpush.bf16.msra.mxu0 %v3150_v46  ;;  %v2140_v46 = vld [vmem:[%s7909_s5 + $0x308] sm:$0xff]  ;;  %v4790_v63 = vld [vmem:[%s7910_s6 + $0x100] sm:$0xf] }
 0x3cf   : > { %v3187_v32 = vpack.c.bf16 %v3001_v48, %v2999_v22  ;;  %v2099_v48 = vld [vmem:[%s7909_s5 + $0x1c0] sm:$0xff]  ;;  %v2098_v22 = vld [vmem:[%s7909_s5 + $0x1b8] sm:$0xff] }
 0x3d1   : > { %4642 = vmatmul.msk.bf16.gmra.mxu3 %vm2547_vm11, %v4975_v53  ;;  %3622 = vmatmul.bf16.vlgmr.msra.gmra.mxu0 %v4663_v15 }
 0x3d2   : > { %3761 = vmatpush.bf16.msrb.mxu0 %v3181_v5  ;;  %v4976_v5 = vld [vmem:[%s7908_s4 + $0x1b8] sm:$0xff] }
 0x3d4   : > { %v6742_v7 = vpop.f32.mrf.mxu2  ;;  %v3003_v20 = vpop.f32.mrf.mxu3 }
 0x3d5   : > { %v3004_v49 = vadd.f32 %v3003_v20, %v2135_v24  ;;  %v5005_v20 = vld [vmem:[%s7910_s6 + $0x5c] sm:$0xf0]  ;;  %v4664_v24 = vld [vmem:[%s7910_s6 + $0x20] sm:$0xf0] }
 0x3d6   : > { %3762 = vmatpush.bf16.msrb.mxu0 %v3180_v56 }
 0x3da   : > { %3763 = vmatpush.bf16.msrb.mxu0 %v3179_v13 }
 0x3dc   : > { %v6750_v11 = vpop.f32.mrf.mxu2  ;;  %v3005_v44 = vpop.f32.mrf.mxu3 }
 0x3dd   : > { %v3006_v4 = vadd.f32 %v3005_v44, %v2136_v35  ;;  %v4695_v44 = vor.u32 %v5005_v20, %v4694_v39  ;;  %v5001_v39 = vld [vmem:[%s7910_s6 + $0x44] sm:$0xf]  ;;  %v2094_v20 = vld [vmem:[%s7909_s5 + $0x198] sm:$0xff] }
 0x3de   : > { %3764 = vmatpush.bf16.msrb.mxu0 %v3178_v60 }
 0x3df   : > { %v3188_v19 = vpack.c.bf16 %v3006_v4, %v3004_v49  ;;  %v2101_v4 = vld [vmem:[%s7909_s5 + $0x1d0] sm:$0xff] }
 0x3e1   : > { %4643 = vmatmul.msk.bf16.gmra.mxu3 %vm2547_vm11, %v4976_v5  ;;  %3627 = vmatmul.bf16.gmra.mxu0 %v4695_v44 }
 0x3e4   : > { %v6756_v47 = vpop.f32.mrf.mxu2  ;;  %v3008_v27 = vpop.f32.mrf.mxu3 }
 0x3e5   : > { %v3009_v13 = vadd.f32 %v3008_v27, %v2137_v3  ;;  %v2105_v3 = vld [vmem:[%s7909_s5 + $0x1f0] sm:$0xff]  ;;  %v2919_v15 = vadd.f32 %v6756_v47, %v2101_v4 }
 0x3ec   : > { %v6767_v60 = vpop.f32.mrf.mxu2  ;;  %v3010_v9 = vpop.f32.mrf.mxu3 }
 0x3ed   : > { %v3011_v56 = vadd.f32 %v3010_v9, %v2138_v0  ;;  %v2103_v0 = vld [vmem:[%s7909_s5 + $0x1e0] sm:$0xff]  ;;  %v2921_v49 = vadd.f32 %v6767_v60, %v2102_v43  ;;  %v2097_v60 = vld [vmem:[%s7909_s5 + $0x1b0] sm:$0xff] }
 0x3ee   : > { %v2909_v8 = vadd.f32 %v6710_v2, %v2097_v60  ;;  %v5009_v43 = vld [vmem:[%s7910_s6 + $0x84] sm:$0xf] }
 0x3ef   : > { %v3189_v36 = vpack.c.bf16 %v3011_v56, %v3009_v13  ;;  %v5017_v60 = vld [vmem:[%s7910_s6 + $0xc4] sm:$0xf] }
 0x3f1   : > { %4644 = vmatmul.msk.bf16.gmra.mxu3 %vm2547_vm11, %v4977_v23  ;;  %3810 = vmatpush.bf16.msra.mxu1 %v3189_v36  ;;  %v4993_v23 = vld [vmem:[%s7910_s6 + $0x4] sm:$0xf] }
 0x3f2   : > { %v4667_v10 = vor.u32 %v4993_v23, %v4664_v24  ;;  %3632 = vmatmul.bf16.gmra.mxu0 %v4727_v28  ;;  %v5029_v28 = vld [vmem:[%s7910_s6 + $0x11c] sm:$0xf0] }
 0x3f4   : > { %v2923_v50 = vpop.f32.mrf.mxu2  ;;  %v3013_v45 = vpop.f32.mrf.mxu3  ;;  %3671 = vmatmul.bf16.vlgmr.msrb.gmra.mxu1 %v4667_v10  ;;  %v4728_v10 = vld [vmem:[%s7910_s6 + $0xa0] sm:$0xf0] }
 0x3f5   : > { %3811 = vmatpush.bf16.msra.mxu1 %v3188_v19  ;;  %v6803_v53 = vadd.f32 %v3013_v45, %v2139_v33  ;;  %v2100_v19 = vld [vmem:[%s7909_s5 + $0x1c8] sm:$0xff]  ;;  %v3171_v45 = vpack.c.bf16 %v2921_v49, %v2919_v15  ;;  %v4791_v15 = vor.u32 %v5029_v28, %v4790_v63  ;;  %v4886_v28 = vld [vmem:[%s7910_s6 + $0x1c0] sm:$0xf] }
 0x3f6   : > { %v2916_v47 = vadd.f32 %v6750_v11, %v2100_v19  ;;  %v2096_v11 = vld [vmem:[%s7909_s5 + $0x1a8] sm:$0xff] }
 0x3f7   : > { %v2144_v33 = vld [vmem:[%s7909_s5 + $0x328] sm:$0xff]  ;;  %v2906_v2 = vadd.f32 %v6686_v52, %v2096_v11  ;;  %v2093_v52 = vld [vmem:[%s7909_s5 + $0x190] sm:$0xff] }
 0x3f8   : > { %v4670_v49 = vld [vmem:[%s7910_s6 + $0x8] sm:$0xf] }
 0x3f9   : > { %3812 = vmatpush.bf16.msra.mxu1 %v3187_v32  ;;  %v4702_v11 = vld [vmem:[%s7910_s6 + $0x48] sm:$0xf] }
 0x3fc   : > { %v2925_v29 = vpop.f32.mrf.mxu2  ;;  %v3015_v55 = vpop.f32.mrf.mxu3 }
 0x3fd   : > { %v6805_v40 = vadd.f32 %v3015_v55, %v2140_v46  ;;  %3813 = vmatpush.bf16.msra.mxu1 %v3186_v59  ;;  %v2926_v13 = vadd.f32 %v2925_v29, %v2104_v62  ;;  %v2904_v46 = vadd.f32 %v6682_v21, %v2095_v6  ;;  %v4696_v21 = vld [vmem:[%s7910_s6 + $0x60] sm:$0xf0]  ;;  %v2899_v62 = vadd.f32 %v6653_v38, %v2093_v52 }
 0x3fe   : > { %v4699_v44 = vor.u32 %v5001_v39, %v4696_v21  ;;  %v5025_v39 = vld [vmem:[%s7910_s6 + $0x104] sm:$0xf] }
 0x3ff   : > { %v3190_v41 = vpack.c.bf16 %v6805_v40, %v6803_v53  ;;  %v4792_v21 = vld [vmem:[%s7910_s6 + $0x120] sm:$0xf0]  ;;  %v5010_v40 = vld [vmem:[%s7910_s6 + $0x8c] sm:$0xf] }
 0x400   : > { %v4795_v52 = vor.u32 %v5025_v39, %v4792_v21  ;;  %v2152_v39 = vld [vmem:[%s7909_s5 + $0x368] sm:$0xff] }
 0x401   : > { %4645 = vmatmul.msk.bf16.gmra.mxu3 %vm2547_vm11, %v4978_v17  ;;  %3814 = vmatpush.bf16.msra.mxu1 %v3185_v42  ;;  %v2924_v42 = vadd.f32 %v2923_v50, %v2103_v0  ;;  %v2914_v50 = vadd.f32 %v6742_v7, %v2099_v48  ;;  %v2911_v7 = vadd.f32 %v6726_v16, %v2098_v22  ;;  %v4980_v17 = vld [vmem:[%s7908_s4 + $0x1d8] sm:$0xff]  ;;  %v4760_v22 = vld [vmem:[%s7910_s6 + $0xe0] sm:$0xf0] }
 0x402   : > { %v4763_v6 = vor.u32 %v5017_v60, %v4760_v22  ;;  %v5022_v60 = vld [vmem:[%s7910_s6 + $0xe4] sm:$0xf0] }
 0x403   : > { %v3172_v1 = vpack.c.bf16 %v2926_v13, %v2924_v42  ;;  %v3170_v32 = vpack.c.bf16 %v2916_v47, %v2914_v50  ;;  %v3169_v16 = vpack.c.bf16 %v2911_v7, %v2909_v8  ;;  %v4982_v47 = vld [vmem:[%s7908_s4 + $0x1e8] sm:$0xff]  ;;  %v4822_v8 = vld [vmem:[%s7910_s6 + $0x140] sm:$0xf] }
 0x404   : > { %v2928_v5 = vpop.f32.mrf.mxu2  ;;  %v3018_v27 = vpop.f32.mrf.mxu3  ;;  %3676 = vmatmul.bf16.gmra.mxu1 %v4699_v44  ;;  %v5037_v7 = vld [vmem:[%s7910_s6 + $0x15c] sm:$0xf0] }
 0x405   : > { %3815 = vmatpush.bf16.msra.mxu1 %v3184_v51  ;;  %v2142_v51 = vld [vmem:[%s7909_s5 + $0x318] sm:$0xff]  ;;  %v2929_v61 = vadd.f32 %v2928_v5, %v2105_v3  ;;  %v6846_v56 = vadd.f32 %v3018_v27, %v2141_v37  ;;  %v4758_v27 = vld [vmem:[%s7910_s6 + $0xc0] sm:$0xf]  ;;  %v2901_v37 = vadd.f32 %v6666_v25, %v2094_v20 }
 0x406   : > { %v5021_v3 = vld [vmem:[%s7910_s6 + $0xdc] sm:$0xf0] }
 0x407   : > { %v4759_v0 = vor.u32 %v5021_v3, %v4758_v27  ;;  %v4854_v20 = vld [vmem:[%s7910_s6 + $0x180] sm:$0xf]  ;;  %v4734_v3 = vld [vmem:[%s7910_s6 + $0x88] sm:$0xf] }
 0x408   : > { %v5045_v44 = vld [vmem:[%s7910_s6 + $0x19c] sm:$0xf0] }
 0x409   : > { %3816 = vmatpush.bf16.msra.mxu1 %v3183_v34  ;;  %v4979_v34 = vld [vmem:[%s7908_s4 + $0x1d0] sm:$0xff]  ;;  %3637 = vmatmul.bf16.gmra.mxu0 %v4759_v0  ;;  %v4855_v27 = vor.u32 %v5045_v44, %v4854_v20  ;;  %v5014_v0 = vld [vmem:[%s7910_s6 + $0xa4] sm:$0xf0]  ;;  %v5041_v20 = vld [vmem:[%s7910_s6 + $0x184] sm:$0xf] }
 0x40a   : > { %v4856_v44 = vld [vmem:[%s7910_s6 + $0x1a0] sm:$0xf0] }
 0x40c   : > { %v2930_v35 = vpop.f32.mrf.mxu2  ;;  %v3020_v9 = vpop.f32.mrf.mxu3 }
 0x40d   : > { %v2931_v18 = vadd.f32 %v2930_v35, %v2106_v31  ;;  %v6848_v26 = vadd.f32 %v3020_v9, %v2142_v51  ;;  %3817 = vmatpush.bf16.msra.mxu1 %v3182_v57  ;;  %v3168_v31 = vpack.c.bf16 %v2906_v2, %v2904_v46  ;;  %v2091_v51 = vld [vmem:[%s7909_s5 + $0x180] sm:$0xff]  ;;  %v3167_v9 = vpack.c.bf16 %v2901_v37, %v2899_v62 }
 0x40e   : > { %v2894_v35 = vadd.f32 %v6591_v14, %v2091_v51  ;;  %v4735_v62 = vor.u32 %v5014_v0, %v4734_v3  ;;  %v2113_v51 = vld [vmem:[%s7909_s5 + $0x230] sm:$0xff]  ;;  %v4859_v3 = vor.u32 %v5041_v20, %v4856_v44 }
 0x40f   : > { %v3173_v57 = vpack.c.bf16 %v2931_v18, %v2929_v61  ;;  %v3191_v36 = vpack.c.bf16 %v6848_v26, %v6846_v56  ;;  %v2092_v61 = vld [vmem:[%s7909_s5 + $0x188] sm:$0xff]  ;;  %v2145_v18 = vld [vmem:[%s7909_s5 + $0x330] sm:$0xff] }
 0x410   : > { %v2896_v38 = vadd.f32 %v6619_v30, %v2092_v61  ;;  %v4981_v30 = vld [vmem:[%s7908_s4 + $0x1e0] sm:$0xff]  ;;  %v2114_v61 = vld [vmem:[%s7909_s5 + $0x238] sm:$0xff]  ;;  %v4987_v56 = vld [vmem:[%s7908_s4 + $0x210] sm:$0xff] }
 0x411   : > { %4646 = vmatmul.msk.bf16.gmra.mxu3 %vm2547_vm11, %v4979_v34  ;;  %3712 = vmatpush.bf16.msra.mxu2 %v3173_v57  ;;  %v2146_v34 = vld [vmem:[%s7909_s5 + $0x338] sm:$0xff]  ;;  %v4731_v57 = vor.u32 %v5009_v43, %v4728_v10  ;;  %v2109_v10 = vld [vmem:[%s7909_s5 + $0x210] sm:$0xff] }
 0x412   : > { %v3166_v13 = vpack.c.bf16 %v2896_v38, %v2894_v35  ;;  %v2111_v35 = vld [vmem:[%s7909_s5 + $0x220] sm:$0xff]  ;;  %v2112_v38 = vld [vmem:[%s7909_s5 + $0x228] sm:$0xff] }
 0x414   : > { %v3023_v58 = vpop.f32.mrf.mxu3  ;;  %3681 = vmatmul.bf16.gmra.mxu1 %v4731_v57 }
 0x415   : > { %3713 = vmatpush.bf16.msra.mxu2 %v3172_v1  ;;  %v6909_v29 = vadd.f32 %v3023_v58, %v2143_v54  ;;  %v4998_v1 = vld [vmem:[%s7910_s6 + $0x24] sm:$0xf0] }
 0x416   : > { %v4671_v48 = vor.u32 %v4998_v1, %v4670_v49  ;;  %v5006_v54 = vld [vmem:[%s7910_s6 + $0x64] sm:$0xf0]  ;;  %v2110_v49 = vld [vmem:[%s7909_s5 + $0x218] sm:$0xff] }
 0x419   : > { %3714 = vmatpush.bf16.msra.mxu2 %v3171_v45  ;;  %3642 = vmatmul.bf16.gmra.mxu0 %v4791_v15  ;;  %v5053_v15 = vld [vmem:[%s7910_s6 + $0x1dc] sm:$0xf0] }
 0x41a   : > { %v6947_v25 = vpop.f32.mrf.mxu2 }
 0x41c   : > { %v3025_v59 = vpop.f32.mrf.mxu3 }
 0x41d   : > { %v6911_v55 = vadd.f32 %v3025_v59, %v2144_v33  ;;  %3715 = vmatpush.bf16.msra.mxu2 %v3170_v32  ;;  %v4823_v32 = vor.u32 %v5037_v7, %v4822_v8  ;;  %v4703_v33 = vor.u32 %v5006_v54, %v4702_v11  ;;  %v2108_v11 = vld [vmem:[%s7909_s5 + $0x208] sm:$0xff] }
 0x41f   : > { %v3192_v5 = vpack.c.bf16 %v6911_v55, %v6909_v29  ;;  %v4999_v29 = vld [vmem:[%s7910_s6 + $0x2c] sm:$0xf0] }
 0x421   : > { %4647 = vmatmul.msk.bf16.gmra.mxu3 %vm2547_vm11, %v4980_v17  ;;  %3716 = vmatpush.bf16.msra.mxu2 %v3169_v16  ;;  %v4983_v16 = vld [vmem:[%s7908_s4 + $0x1f0] sm:$0xff] }
 0x422   : > { %v6962_v4 = vpop.f32.mrf.mxu2 }
 0x424   : > { %v3028_v42 = vpop.f32.mrf.mxu3  ;;  %3686 = vmatmul.bf16.gmra.mxu1 %v4763_v6 }
 0x425   : > { %3717 = vmatpush.bf16.msra.mxu2 %v3168_v31  ;;  %v6955_v24 = vadd.f32 %v3028_v42, %v2145_v18 }
 0x429   : > { %3718 = vmatpush.bf16.msra.mxu2 %v3167_v9  ;;  %3647 = vmatmul.bf16.gmra.mxu0 %v4823_v32  ;;  %v2107_v32 = vld [vmem:[%s7909_s5 + $0x200] sm:$0xff] }
 0x42a   : > { %v6987_v58 = vpop.f32.mrf.mxu2 }
 0x42b   : > { %v2939_v6 = vadd.f32 %v6987_v58, %v2109_v10  ;;  %v2153_v58 = vld [vmem:[%s7909_s5 + $0x370] sm:$0xff] }
 0x42c   : > { %v3030_v23 = vpop.f32.mrf.mxu3 }
 0x42d   : > { %v6957_v14 = vadd.f32 %v3030_v23, %v2146_v34  ;;  %3719 = vmatpush.bf16.msra.mxu2 %v3166_v13  ;;  %v4984_v13 = vld [vmem:[%s7908_s4 + $0x1f8] sm:$0xff]  ;;  %v5033_v34 = vld [vmem:[%s7910_s6 + $0x144] sm:$0xf] }
 0x42e   : > { %v4824_v23 = vld [vmem:[%s7910_s6 + $0x160] sm:$0xf0] }
 0x42f   : > { %v3193_v12 = vpack.c.bf16 %v6957_v14, %v6955_v24  ;;  %v4827_v43 = vor.u32 %v5033_v34, %v4824_v23  ;;  %v2149_v34 = vld [vmem:[%s7909_s5 + $0x350] sm:$0xff]  ;;  %v2158_v24 = vld [vmem:[%s7909_s5 + $0x398] sm:$0xff] }
 0x430   : > { %3720 = vmatmul.bf16.vlgmr.msra.gmra.mxu2 %v4671_v48  ;;  %v4887_v48 = vor.u32 %v5053_v15, %v4886_v28 }
 0x431   : > { %4648 = vmatmul.msk.bf16.gmra.mxu3 %vm2547_vm11, %v4981_v30 }
 0x432   : > { %v2940_v45 = vpop.f32.mrf.mxu2 }
 0x433   : > { %v2941_v8 = vadd.f32 %v2940_v45, %v2110_v49  ;;  %v2154_v45 = vld [vmem:[%s7909_s5 + $0x378] sm:$0xff]  ;;  %v2155_v49 = vld [vmem:[%s7909_s5 + $0x380] sm:$0xff] }
 0x434   : > { %v6985_v19 = vpop.f32.mrf.mxu3  ;;  %3691 = vmatmul.bf16.gmra.mxu1 %v4795_v52 }
 0x439   : > { %3652 = vmatmul.bf16.gmra.mxu0 %v4855_v27  ;;  %v2151_v27 = vld [vmem:[%s7909_s5 + $0x360] sm:$0xff] }
 0x43a   : > { %v2943_v59 = vpop.f32.mrf.mxu2 }
 0x43b   : > { %v2944_v57 = vadd.f32 %v2943_v59, %v2111_v35  ;;  %v2936_v59 = vadd.f32 %v6962_v4, %v2108_v11  ;;  %v4985_v4 = vld [vmem:[%s7908_s4 + $0x200] sm:$0xff]  ;;  %v2150_v35 = vld [vmem:[%s7909_s5 + $0x358] sm:$0xff]  ;;  %v4704_v11 = vld [vmem:[%s7910_s6 + $0x68] sm:$0xf0] }
 0x43c   : > { %v6989_v50 = vpop.f32.mrf.mxu3 }
 0x440   : > { %3725 = vmatmul.bf16.gmra.mxu2 %v4703_v33  ;;  %v2934_v33 = vadd.f32 %v6947_v25, %v2107_v32  ;;  %v5002_v32 = vld [vmem:[%s7910_s6 + $0x4c] sm:$0xf] }
 0x441   : > { %4649 = vmatmul.msk.bf16.gmra.mxu3 %vm2547_vm11, %v4982_v47  ;;  %v4766_v47 = vld [vmem:[%s7910_s6 + $0xc8] sm:$0xf] }
 0x442   : > { %v2945_v17 = vpop.f32.mrf.mxu2  ;;  %v4767_v22 = vor.u32 %v5022_v60, %v4766_v47 }
 0x443   : > { %v2946_v63 = vadd.f32 %v2945_v17, %v2112_v38  ;;  %v3174_v17 = vpack.c.bf16 %v2936_v59, %v2934_v33  ;;  %v4830_v33 = vld [vmem:[%s7910_s6 + $0x148] sm:$0xf] }
 0x444   : > { %v7013_v46 = vpop.f32.mrf.mxu3  ;;  %3696 = vmatmul.bf16.gmra.mxu1 %v4827_v43  ;;  %v2148_v43 = vld [vmem:[%s7909_s5 + $0x348] sm:$0xff] }
 0x445   : > { %v3176_v7 = vpack.c.bf16 %v2946_v63, %v2944_v57  ;;  %v2147_v57 = vld [vmem:[%s7909_s5 + $0x340] sm:$0xff]  ;;  %v3036_v63 = vadd.f32 %v6989_v50, %v2148_v43  ;;  %v5038_v59 = vld [vmem:[%s7910_s6 + $0x164] sm:$0xf0] }
 0x446   : > { %v5049_v50 = vld [vmem:[%s7910_s6 + $0x1c4] sm:$0xf] }
 0x449   : > { %3657 = vmatmul.bf16.gmra.mxu0 %v4887_v48 }
 0x44a   : > { %v2948_v31 = vpop.f32.mrf.mxu2 }
 0x44b   : > { %v2949_v9 = vadd.f32 %v2948_v31, %v2113_v51  ;;  %v4994_v51 = vld [vmem:[%s7910_s6 + $0xc] sm:$0xf] }
 0x44c   : > { %v7015_v2 = vpop.f32.mrf.mxu3 }
 0x44d   : > { %v3041_v23 = vadd.f32 %v7015_v2, %v2150_v35  ;;  %v3034_v2 = vadd.f32 %v6985_v19, %v2147_v57  ;;  %v4986_v19 = vld [vmem:[%s7908_s4 + $0x208] sm:$0xff]  ;;  %v4988_v35 = vld [vmem:[%s7908_s4 + $0x218] sm:$0xff] }
 0x44e   : > { %v7111_v31 = vpop.f32.mrf.mxu0 }
 0x450   : > { %3730 = vmatmul.bf16.gmra.mxu2 %v4735_v62 }
 0x451   : > { %4650 = vmatmul.msk.bf16.gmra.mxu3 %vm2547_vm11, %v4983_v16  ;;  %v3175_v16 = vpack.c.bf16 %v2941_v8, %v2939_v6 }
 0x452   : > { %v2950_v18 = vpop.f32.mrf.mxu2 }
 0x453   : > { %v2951_v30 = vadd.f32 %v2950_v18, %v2114_v61  ;;  %v4672_v61 = vld [vmem:[%s7910_s6 + $0x28] sm:$0xf0] }
 0x454   : > { %v7039_v37 = vpop.f32.mrf.mxu3  ;;  %v4675_v38 = vor.u32 %v4994_v51, %v4672_v61  ;;  %3701 = vmatmul.bf16.gmra.mxu1 %v4859_v3  ;;  %v2159_v3 = vld [vmem:[%s7909_s5 + $0x3a0] sm:$0xff] }
 0x455   : > { %v3177_v1 = vpack.c.bf16 %v2951_v30, %v2949_v9  ;;  %v5030_v9 = vld [vmem:[%s7910_s6 + $0x124] sm:$0xf0] }
 0x456   : > { %v7142_v15 = vpop.f32.mrf.mxu0 }
 0x457   : > { %3765 = vmatpush.bf16.msrb.mxu0 %v3177_v1  ;;  %v3194_v1 = vpack.c.bf16 %v3036_v63, %v3034_v2 }
 0x45b   : > { %3766 = vmatpush.bf16.msrb.mxu0 %v3176_v7 }
 0x45c   : > { %v3045_v42 = vpop.f32.mrf.mxu3 }
 0x45d   : > { %v3046_v0 = vadd.f32 %v3045_v42, %v2152_v39  ;;  %v4798_v42 = vld [vmem:[%s7910_s6 + $0x108] sm:$0xf] }
 0x45e   : > { %v4799_v18 = vor.u32 %v5030_v9, %v4798_v42  ;;  %v7166_v7 = vpop.f32.mrf.mxu0  ;;  %v4710_v42 = vld [vmem:[%s7910_s6 + $0x50] sm:$0xf] }
 0x45f   : > { %3767 = vmatpush.bf16.msrb.mxu0 %v3175_v16  ;;  %v4831_v16 = vor.u32 %v5038_v59, %v4830_v33  ;;  %v5007_v9 = vld [vmem:[%s7910_s6 + $0x6c] sm:$0xf0]  ;;  %v5026_v59 = vld [vmem:[%s7910_s6 + $0x10c] sm:$0xf] }
 0x460   : > { %3735 = vmatmul.bf16.gmra.mxu2 %v4767_v22  ;;  %v4888_v22 = vld [vmem:[%s7910_s6 + $0x1e0] sm:$0xf0] }
 0x461   : > { %4651 = vmatmul.msk.bf16.gmra.mxu3 %vm2547_vm11, %v4984_v13  ;;  %v3044_v13 = vadd.f32 %v7039_v37, %v2151_v27  ;;  %v3039_v37 = vadd.f32 %v7013_v46, %v2149_v34  ;;  %v2156_v46 = vld [vmem:[%s7909_s5 + $0x388] sm:$0xff]  ;;  %v4891_v6 = vor.u32 %v5049_v50, %v4888_v22  ;;  %v4989_v50 = vld [vmem:[%s7908_s4 + $0x220] sm:$0xff] }
 0x463   : > { %3768 = vmatpush.bf16.msrb.mxu0 %v3174_v17  ;;  %v3196_v30 = vpack.c.bf16 %v3046_v0, %v3044_v13  ;;  %v3195_v28 = vpack.c.bf16 %v3041_v23, %v3039_v37  ;;  %v2157_v17 = vld [vmem:[%s7909_s5 + $0x390] sm:$0xff]  ;;  %v2160_v0 = vld [vmem:[%s7909_s5 + $0x3a8] sm:$0xff]  ;;  %v4711_v13 = vor.u32 %v5007_v9, %v4710_v42 }
 0x464   : > { %v3048_v54 = vpop.f32.mrf.mxu3  ;;  %3706 = vmatmul.bf16.gmra.mxu1 %v4891_v6  ;;  %v5018_v23 = vld [vmem:[%s7910_s6 + $0xcc] sm:$0xf]  ;;  %v5054_v37 = vld [vmem:[%s7910_s6 + $0x1e4] sm:$0xf0]  ;;  %v4742_v6 = vld [vmem:[%s7910_s6 + $0x90] sm:$0xf] }
 0x465   : > { %v3049_v25 = vadd.f32 %v3048_v54, %v2153_v58  ;;  %v4707_v54 = vor.u32 %v5002_v32, %v4704_v11  ;;  %v5015_v32 = vld [vmem:[%s7910_s6 + $0xac] sm:$0xf0]  ;;  %v5003_v42 = vld [vmem:[%s7910_s6 + $0x54] sm:$0xf] }
 0x466   : > { %3769 = vmatmul.bf16.vlgmr.msrb.gmra.mxu0 %v4675_v38  ;;  %v4743_v11 = vor.u32 %v5015_v32, %v4742_v6  ;;  %v4712_v9 = vld [vmem:[%s7910_s6 + $0x70] sm:$0xf0] }
 0x46c   : > { %v3050_v21 = vpop.f32.mrf.mxu3 }
 0x46d   : > { %v3051_v52 = vadd.f32 %v3050_v21, %v2154_v45  ;;  %v7187_v45 = vpop.f32.mrf.mxu0 }
 0x46f   : > { %v3197_v62 = vpack.c.bf16 %v3051_v52, %v3049_v25  ;;  %v4862_v25 = vld [vmem:[%s7910_s6 + $0x188] sm:$0xf] }
 0x470   : > { %3740 = vmatmul.bf16.gmra.mxu2 %v4799_v18  ;;  %v5046_v52 = vld [vmem:[%s7910_s6 + $0x1a4] sm:$0xf0] }
 0x471   : > { %4652 = vmatmul.msk.bf16.gmra.mxu3 %vm2547_vm11, %v4985_v4  ;;  %3859 = vmatpush.bf16.msrb.mxu2 %v3197_v62  ;;  %v7208_v26 = vpop.f32.mrf.mxu1  ;;  %v4863_v4 = vor.u32 %v5046_v52, %v4862_v25  ;;  %v4774_v25 = vld [vmem:[%s7910_s6 + $0xd0] sm:$0xf] }
 0x472   : > { %v5023_v52 = vld [vmem:[%s7910_s6 + $0xec] sm:$0xf0] }
 0x474   : > { %v3053_v10 = vpop.f32.mrf.mxu3 }
 0x475   : > { %3860 = vmatpush.bf16.msrb.mxu2 %v3196_v30  ;;  %v7151_v47 = vadd.f32 %v3053_v10, %v2155_v49  ;;  %v7218_v53 = vpop.f32.mrf.mxu0  ;;  %v4768_v30 = vld [vmem:[%s7910_s6 + $0xe8] sm:$0xf0]  ;;  %v4894_v10 = vld [vmem:[%s7910_s6 + $0x1c8] sm:$0xf]  ;;  %v2161_v49 = vld [vmem:[%s7909_s5 + $0x3b0] sm:$0xff] }
 0x476   : > { %3774 = vmatmul.bf16.gmra.mxu0 %v4707_v54  ;;  %v4771_v43 = vor.u32 %v5018_v23, %v4768_v30  ;;  %v4895_v57 = vor.u32 %v5054_v37, %v4894_v10  ;;  %v3278_v10 = vld [vmem:[%s7911_s7] sm:$0xff] }
 0x479   : > { %3861 = vmatpush.bf16.msrb.mxu2 %v3195_v28  ;;  %v7233_v44 = vpop.f32.mrf.mxu1 }
 0x47c   : > { %v3055_v48 = vpop.f32.mrf.mxu3 }
 0x47d   : > { %v7153_v60 = vadd.f32 %v3055_v48, %v2156_v46  ;;  %3862 = vmatpush.bf16.msrb.mxu2 %v3194_v1  ;;  %v7235_v27 = vpop.f32.mrf.mxu0  ;;  %v2162_v46 = vld [vmem:[%s7909_s5 + $0x3b8] sm:$0xff] }
 0x47f   : > { %v3198_v8 = vpack.c.bf16 %v7153_v60, %v7151_v47  ;;  %v4872_v47 = vld [vmem:[%s7910_s6 + $0x1b0] sm:$0xf0] }
 0x480   : > { %3745 = vmatmul.bf16.gmra.mxu2 %v4831_v16  ;;  %v4800_v16 = vld [vmem:[%s7910_s6 + $0x128] sm:$0xf0] }
 0x481   : > { %4653 = vmatmul.msk.bf16.gmra.mxu3 %vm2547_vm11, %v4986_v19  ;;  %3863 = vmatpush.bf16.msrb.mxu2 %v3193_v12  ;;  %v7250_v38 = vpop.f32.mrf.mxu1 }
 0x484   : > { %v3058_v58 = vpop.f32.mrf.mxu3 }
 0x485   : > { %3864 = vmatpush.bf16.msrb.mxu2 %v3192_v5  ;;  %v7198_v12 = vadd.f32 %v3058_v58, %v2157_v17  ;;  %v4803_v58 = vor.u32 %v5026_v59, %v4800_v16  ;;  %v4995_v17 = vld [vmem:[%s7910_s6 + $0x14] sm:$0xf]  ;;  %v5042_v59 = vld [vmem:[%s7910_s6 + $0x18c] sm:$0xf] }
 0x486   : > { %v7260_v34 = vpop.f32.mrf.mxu0  ;;  %v4864_v16 = vld [vmem:[%s7910_s6 + $0x1a8] sm:$0xf0] }
 0x489   : > { %3865 = vmatpush.bf16.msrb.mxu2 %v3191_v36  ;;  %v4678_v36 = vld [vmem:[%s7910_s6 + $0x10] sm:$0xf]  ;;  %v7275_v28 = vpop.f32.mrf.mxu1 }
 0x48a   : > { %v4679_v55 = vor.u32 %v4999_v29, %v4678_v36 }
 0x48c   : > { %v3060_v14 = vpop.f32.mrf.mxu3  ;;  %3818 = vmatmul.bf16.vlgmr.msra.gmra.mxu1 %v4679_v55 }
 0x48d   : > { %v7200_v39 = vadd.f32 %v3060_v14, %v2158_v24  ;;  %3866 = vmatpush.bf16.msrb.mxu2 %v3190_v41  ;;  %v4736_v41 = vld [vmem:[%s7910_s6 + $0xa8] sm:$0xf0]  ;;  %v4680_v24 = vld [vmem:[%s7910_s6 + $0x30] sm:$0xf0] }
 0x48e   : > { %v4739_v21 = vor.u32 %v5010_v40, %v4736_v41  ;;  %v7277_v2 = vpop.f32.mrf.mxu0  ;;  %v4683_v14 = vor.u32 %v4995_v17, %v4680_v24  ;;  %v4990_v41 = vld [vmem:[%s7908_s4 + $0x228] sm:$0xff]  ;;  %v5011_v17 = vld [vmem:[%s7910_s6 + $0x94] sm:$0xf] }
 0x48f   : > { %v3199_v5 = vpack.c.bf16 %v7200_v39, %v7198_v12  ;;  %v4744_v24 = vld [vmem:[%s7910_s6 + $0xb0] sm:$0xf0] }
 0x490   : > { %3779 = vmatmul.bf16.gmra.mxu0 %v4739_v21  ;;  %3750 = vmatmul.bf16.gmra.mxu2 %v4863_v4 }
 0x491   : > { %4654 = vmatmul.msk.bf16.gmra.mxu3 %vm2547_vm11, %v4987_v56  ;;  %v7292_v22 = vpop.f32.mrf.mxu1 }
 0x494   : > { %v3063_v20 = vpop.f32.mrf.mxu3 }
 0x495   : > { %v7243_v51 = vadd.f32 %v3063_v20, %v2159_v3  ;;  %v4775_v20 = vor.u32 %v5023_v52, %v4774_v25 }
 0x496   : > { %v7302_v33 = vpop.f32.mrf.mxu0 }
 0x499   : > { %v7319_v36 = vpop.f32.mrf.mxu1 }
 0x49c   : > { %v3065_v62 = vpop.f32.mrf.mxu3  ;;  %3823 = vmatmul.bf16.gmra.mxu1 %v4711_v13  ;;  %v4715_v13 = vor.u32 %v5003_v42, %v4712_v9 }
 0x49d   : > { %v7245_v61 = vadd.f32 %v3065_v62, %v2160_v0  ;;  %v5034_v0 = vld [vmem:[%s7910_s6 + $0x14c] sm:$0xf] }
 0x49e   : > { %v7321_v55 = vpop.f32.mrf.mxu0  ;;  %v4832_v62 = vld [vmem:[%s7910_s6 + $0x168] sm:$0xf0] }
 0x49f   : > { %v3200_v18 = vpack.c.bf16 %v7245_v61, %v7243_v51  ;;  %v4686_v51 = vld [vmem:[%s7910_s6 + $0x18] sm:$0xf] }
 0x4a0   : > { %3784 = vmatmul.bf16.gmra.mxu0 %v4771_v43  ;;  %3755 = vmatmul.bf16.gmra.mxu2 %v4895_v57  ;;  %v3624_v57 = vadd.f32 %v7111_v31, %v3278_v10  ;;  %v3279_v31 = vld [vmem:[%s7911_s7 + $0x8] sm:$0xff]  ;;  %v5000_v61 = vld [vmem:[%s7910_s6 + $0x34] sm:$0xf0] }
 0x4a1   : > { %4655 = vmatmul.msk.bf16.gmra.mxu3 %vm2547_vm11, %v4988_v35  ;;  %v7328_v21 = vpop.f32.mrf.mxu1  ;;  %v4835_v35 = vor.u32 %v5034_v0, %v4832_v62  ;;  %v4687_v39 = vor.u32 %v5000_v61, %v4686_v51 }
 0x4a2   : > { %v3673_v32 = vadd.f32 %v7208_v26, %v3624_v57  ;;  %v3626_v26 = vadd.f32 %v7142_v15, %v3279_v31  ;;  %v3280_v15 = vld [vmem:[%s7911_s7 + $0x10] sm:$0xff]  ;;  %v4896_v31 = vld [vmem:[%s7910_s6 + $0x1e8] sm:$0xf0] }
 0x4a3   : > { %v3629_v42 = vadd.f32 %v7166_v7, %v3280_v15  ;;  %v3281_v7 = vld [vmem:[%s7911_s7 + $0x18] sm:$0xff] }
 0x4a4   : > { %v3068_v63 = vpop.f32.mrf.mxu3 }
 0x4a5   : > { %v7285_v48 = vadd.f32 %v3068_v63, %v2161_v49  ;;  %v4991_v49 = vld [vmem:[%s7908_s4 + $0x230] sm:$0xff] }
 0x4a6   : > { %v7336_v3 = vpop.f32.mrf.mxu0 }
 0x4a9   : > { %v7353_v30 = vpop.f32.mrf.mxu1 }
 0x4ac   : > { %v3070_v1 = vpop.f32.mrf.mxu3  ;;  %3828 = vmatmul.bf16.gmra.mxu1 %v4743_v11 }
 0x4ad   : > { %v7287_v19 = vadd.f32 %v3070_v1, %v2162_v46  ;;  %v4806_v1 = vld [vmem:[%s7910_s6 + $0x110] sm:$0xf] }
 0x4ae   : > { %v7355_v43 = vpop.f32.mrf.mxu0 }
 0x4af   : > { %v3201_v54 = vpack.c.bf16 %v7287_v19, %v7285_v48  ;;  %v3286_v48 = vld [vmem:[%s7911_s7 + $0x40] sm:$0xff]  ;;  %v2174_v19 = vld [vmem:[%s7909_s5 + $0x418] sm:$0xff] }
 0x4b0   : > { %3789 = vmatmul.bf16.gmra.mxu0 %v4803_v58  ;;  %3867 = vmatmul.bf16.vlgmr.msrb.gmra.mxu2 %v4683_v14  ;;  %v4867_v58 = vor.u32 %v5042_v59, %v4864_v16  ;;  %v4776_v59 = vld [vmem:[%s7910_s6 + $0xf0] sm:$0xf0] }
 0x4b1   : > { %4656 = vmatmul.msk.bf16.gmra.mxu3 %vm2547_vm11, %v4989_v50  ;;  %v7366_v46 = vpop.f32.mrf.mxu1  ;;  %v5031_v50 = vld [vmem:[%s7910_s6 + $0x12c] sm:$0xf0] }
 0x4b2   : > { %v4807_v6 = vor.u32 %v5031_v50, %v4806_v1  ;;  %v5050_v50 = vld [vmem:[%s7910_s6 + $0x1cc] sm:$0xf] }
 0x4b3   : > { %v3721_v29 = vpop.f32.mrf.mxu2 }
 0x4b4   : > { %v7317_v56 = vpop.f32.mrf.mxu3  ;;  %v3722_v14 = vadd.f32 %v3721_v29, %v3673_v32  ;;  %v5019_v32 = vld [vmem:[%s7910_s6 + $0xd4] sm:$0xf] }
 0x4b6   : > { %v7378_v11 = vpop.f32.mrf.mxu0 }
 0x4b9   : > { %v7395_v0 = vpop.f32.mrf.mxu1 }
 0x4bb   : > { %v3723_v4 = vpop.f32.mrf.mxu2 }
 0x4bc   : > { %v7323_v40 = vpop.f32.mrf.mxu3  ;;  %3833 = vmatmul.bf16.gmra.mxu1 %v4775_v20  ;;  %v3675_v20 = vadd.f32 %v7233_v44, %v3626_v26  ;;  %v4838_v44 = vld [vmem:[%s7910_s6 + $0x150] sm:$0xf] }
 0x4be   : > { %v7397_v62 = vpop.f32.mrf.mxu0 }
 0x4c0   : > { %3794 = vmatmul.bf16.gmra.mxu0 %v4835_v35  ;;  %3872 = vmatmul.bf16.gmra.mxu2 %v4715_v13  ;;  %v7399_v35 = vadd.f32 %v3723_v4, %v3675_v20  ;;  %v4992_v13 = vld [vmem:[%s7908_s4 + $0x238] sm:$0xff]  ;;  %v5039_v4 = vld [vmem:[%s7910_s6 + $0x16c] sm:$0xf0] }
 0x4c1   : > { %4657 = vmatmul.msk.bf16.gmra.mxu3 %vm2547_vm11, %v4990_v41  ;;  %v4747_v41 = vor.u32 %v5011_v17, %v4744_v24  ;;  %v7408_v10 = vpop.f32.mrf.mxu1  ;;  %v4839_v57 = vor.u32 %v5039_v4, %v4838_v44 }
 0x4c3   : > { %v3726_v37 = vpop.f32.mrf.mxu2 }
 0x4c4   : > { %v7351_v23 = vpop.f32.mrf.mxu3 }
 0x4c6   : > { %v7420_v1 = vpop.f32.mrf.mxu0 }
 0x4c9   : > { %v7439_v26 = vpop.f32.mrf.mxu1 }
 0x4cb   : > { %v3728_v25 = vpop.f32.mrf.mxu2 }
 0x4cc   : > { %v7361_v63 = vpop.f32.mrf.mxu3  ;;  %3838 = vmatmul.bf16.gmra.mxu1 %v4807_v6  ;;  %v4899_v6 = vor.u32 %v5050_v50, %v4896_v31  ;;  %v2167_v50 = vld [vmem:[%s7909_s5 + $0x3e0] sm:$0xff] }
 0x4ce   : > { %v7441_v20 = vpop.f32.mrf.mxu0 }
 0x4d0   : > { %3799 = vmatmul.bf16.gmra.mxu0 %v4867_v58  ;;  %3877 = vmatmul.bf16.gmra.mxu2 %v4747_v41  ;;  %v4779_v58 = vor.u32 %v5019_v32, %v4776_v59 }
 0x4d1   : > { %4658 = vmatmul.msk.bf16.gmra.mxu3 %vm2547_vm11, %v4991_v49  ;;  %v3678_v49 = vadd.f32 %v7250_v38, %v3629_v42  ;;  %v3631_v38 = vadd.f32 %v7187_v45, %v3281_v7  ;;  %v3282_v45 = vld [vmem:[%s7911_s7 + $0x20] sm:$0xff]  ;;  %v2170_v42 = vld [vmem:[%s7909_s5 + $0x3f8] sm:$0xff]  ;;  %v7458_v7 = vpop.f32.mrf.mxu1 }
 0x4d3   : > { %v3731_v9 = vpop.f32.mrf.mxu2  ;;  %v7436_v16 = vadd.f32 %v3726_v37, %v3678_v49  ;;  %v3680_v24 = vadd.f32 %v7275_v28, %v3631_v38  ;;  %v2169_v37 = vld [vmem:[%s7909_s5 + $0x3f0] sm:$0xff]  ;;  %v3634_v28 = vadd.f32 %v7218_v53, %v3282_v45  ;;  %v3283_v53 = vld [vmem:[%s7911_s7 + $0x28] sm:$0xff] }
 0x4d4   : > { %v3083_v52 = vpop.f32.mrf.mxu3  ;;  %v5047_v49 = vld [vmem:[%s7910_s6 + $0x1ac] sm:$0xf0] }
 0x4d5   : > { %v7443_v15 = vadd.f32 %v3728_v25, %v3680_v24  ;;  %v3683_v59 = vadd.f32 %v7292_v22, %v3634_v28  ;;  %v3084_v22 = vadd.f32 %v3083_v52, %v2167_v50 }
 0x4db   : > { %v3733_v41 = vpop.f32.mrf.mxu2 }
 0x4dc   : > { %v3085_v29 = vpop.f32.mrf.mxu3  ;;  %3843 = vmatmul.bf16.gmra.mxu1 %v4839_v57  ;;  %v4870_v57 = vld [vmem:[%s7910_s6 + $0x190] sm:$0xf] }
 0x4dd   : > { %v4871_v31 = vor.u32 %v5047_v49, %v4870_v57  ;;  %v2163_v57 = vld [vmem:[%s7909_s5 + $0x3c0] sm:$0xff] }
 0x4e0   : > { %3804 = vmatmul.bf16.gmra.mxu0 %v4899_v6  ;;  %3882 = vmatmul.bf16.gmra.mxu2 %v4779_v58  ;;  %v5027_v58 = vld [vmem:[%s7910_s6 + $0x114] sm:$0xf] }
 0x4e1   : > { %4659 = vmatmul.msk.bf16.gmra.mxu3 %vm2547_vm11, %v4992_v13  ;;  %v2168_v13 = vld [vmem:[%s7909_s5 + $0x3e8] sm:$0xff] }
 0x4e2   : > { %v3086_v6 = vadd.f32 %v3085_v29, %v2168_v13  ;;  %v3636_v29 = vadd.f32 %v7235_v27, %v3283_v53  ;;  %v2165_v13 = vld [vmem:[%s7909_s5 + $0x3d0] sm:$0xff] }
 0x4e3   : > { %v3770_v38 = vpop.f32.mrf.mxu0  ;;  %v3736_v45 = vpop.f32.mrf.mxu2  ;;  %v3079_v27 = vadd.f32 %v7351_v23, %v2165_v13  ;;  %v3284_v23 = vld [vmem:[%s7911_s7 + $0x30] sm:$0xff] }
 0x4e4   : > { %v3088_v17 = vpop.f32.mrf.mxu3  ;;  %v7479_v24 = vadd.f32 %v3770_v38, %v3722_v14  ;;  %v3685_v52 = vadd.f32 %v7319_v36, %v3636_v29  ;;  %v2171_v36 = vld [vmem:[%s7909_s5 + $0x400] sm:$0xff] }
 0x4e5   : > { %v3089_v44 = vadd.f32 %v3088_v17, %v2169_v37  ;;  %v2166_v17 = vld [vmem:[%s7909_s5 + $0x3d8] sm:$0xff]  ;;  %v4808_v37 = vld [vmem:[%s7910_s6 + $0x130] sm:$0xf0] }
 0x4e6   : > { %v4811_v28 = vor.u32 %v5027_v58, %v4808_v37  ;;  %v3081_v14 = vadd.f32 %v7361_v63, %v2166_v17  ;;  %v7504_v50 = vadd.f32 %v3733_v41, %v3685_v52  ;;  %v3639_v41 = vadd.f32 %v7260_v34, %v3284_v23  ;;  %v4902_v17 = vld [vmem:[%s7910_s6 + $0x1d0] sm:$0xf]  ;;  %v3285_v34 = vld [vmem:[%s7911_s7 + $0x38] sm:$0xff] }
 0x4e7   : > { %v5055_v37 = vld [vmem:[%s7910_s6 + $0x1ec] sm:$0xf0] }
 0x4e8   : > { %v3203_v49 = vpack.c.bf16 %v3081_v14, %v3079_v27  ;;  %v4903_v29 = vor.u32 %v5055_v37, %v4902_v17  ;;  %v5035_v14 = vld [vmem:[%s7910_s6 + $0x154] sm:$0xf]  ;;  %v4718_v37 = vld [vmem:[%s7910_s6 + $0x58] sm:$0xf] }
 0x4e9   : > { %v3288_v17 = vld [vmem:[%s7911_s7 + $0x50] sm:$0xff] }
 0x4eb   : > { %v7502_v53 = vpop.f32.mrf.mxu0 }
 0x4ec   : > { %v3090_v25 = vpop.f32.mrf.mxu3  ;;  %3848 = vmatmul.bf16.gmra.mxu1 %v4871_v31  ;;  %v3074_v31 = vadd.f32 %v7317_v56, %v2163_v57 }
 0x4ed   : > { %v3091_v4 = vadd.f32 %v3090_v25, %v2170_v42  ;;  %v7485_v42 = vadd.f32 %v3731_v9, %v3683_v59  ;;  %v3204_v25 = vpack.c.bf16 %v3086_v6, %v3084_v22  ;;  %v7496_v9 = vpop.f32.mrf.mxu1  ;;  %v3738_v6 = vpop.f32.mrf.mxu2 }
 0x4ef   : > { %v3205_v32 = vpack.c.bf16 %v3091_v4, %v3089_v44  ;;  %v2164_v44 = vld [vmem:[%s7909_s5 + $0x3c8] sm:$0xff] }
 0x4f0   : > { %3887 = vmatmul.bf16.gmra.mxu2 %v4811_v28  ;;  %v3076_v63 = vadd.f32 %v7323_v40, %v2164_v44  ;;  %v2172_v40 = vld [vmem:[%s7909_s5 + $0x408] sm:$0xff]  ;;  %v3688_v28 = vadd.f32 %v7328_v21, %v3639_v41  ;;  %v4840_v44 = vld [vmem:[%s7910_s6 + $0x170] sm:$0xf0] }
 0x4f1   : > { %3908 = vmatpush.bf16.msra.mxu0 %v3205_v32  ;;  %v4843_v27 = vor.u32 %v5035_v14, %v4840_v44 }
 0x4f2   : > { %v3202_v32 = vpack.c.bf16 %v3076_v63, %v3074_v31  ;;  %v3737_v21 = vadd.f32 %v3736_v45, %v3688_v28  ;;  %v3649_v28 = vadd.f32 %v7336_v3, %v3288_v17  ;;  %v4904_v3 = vld [vmem:[%s7910_s6 + $0x1f0] sm:$0xf0] }
 0x4f3   : > { %v3775_v13 = vpop.f32.mrf.mxu0 }
 0x4f4   : > { %v3093_v4 = vpop.f32.mrf.mxu3 }
 0x4f5   : > { %3909 = vmatpush.bf16.msra.mxu0 %v3204_v25  ;;  %v7517_v38 = vadd.f32 %v3093_v4, %v2171_v36  ;;  %v7521_v56 = vpop.f32.mrf.mxu1  ;;  %v7539_v25 = vadd.f32 %v3775_v13, %v7436_v16  ;;  %v3641_v4 = vadd.f32 %v7277_v2, %v3285_v34  ;;  %v3741_v57 = vpop.f32.mrf.mxu2  ;;  %v5008_v34 = vld [vmem:[%s7910_s6 + $0x74] sm:$0xf0] }
 0x4f6   : > { %v4719_v14 = vor.u32 %v5008_v34, %v4718_v37 }
 0x4f7   : > { %v3690_v16 = vadd.f32 %v7353_v30, %v3641_v4 }
 0x4f9   : > { %3910 = vmatpush.bf16.msra.mxu0 %v3203_v49  ;;  %v7556_v2 = vadd.f32 %v3738_v6, %v3690_v16 }
 0x4fb   : > { %v7554_v49 = vpop.f32.mrf.mxu0 }
 0x4fc   : > { %v3095_v59 = vpop.f32.mrf.mxu3  ;;  %3853 = vmatmul.bf16.gmra.mxu1 %v4903_v29  ;;  %v2176_v29 = vld [vmem:[%s7909_s5 + $0x428] sm:$0xff] }
 0x4fd   : > { %v7519_v58 = vadd.f32 %v3095_v59, %v2172_v40  ;;  %3911 = vmatpush.bf16.msra.mxu0 %v3202_v32  ;;  %v7552_v63 = vpop.f32.mrf.mxu1  ;;  %v7584_v23 = vpop.f32.mrf.mxu2 }
 0x4ff   : > { %v3206_v22 = vpack.c.bf16 %v7519_v58, %v7517_v38  ;;  %v4752_v38 = vld [vmem:[%s7910_s6 + $0xb8] sm:$0xf0] }
 0x500   : > { %3892 = vmatmul.bf16.gmra.mxu2 %v4843_v27 }
 0x501   : > { %3912 = vmatpush.bf16.msra.mxu0 %v3201_v54  ;;  %v3644_v54 = vadd.f32 %v7302_v33, %v3286_v48  ;;  %v5043_v33 = vld [vmem:[%s7910_s6 + $0x194] sm:$0xf] }
 0x502   : > { %v5051_v48 = vld [vmem:[%s7910_s6 + $0x1d4] sm:$0xf] }
 0x503   : > { %v3693_v36 = vadd.f32 %v7366_v46, %v3644_v54 }
 0x504   : > { %v3098_v52 = vpop.f32.mrf.mxu3 }
 0x505   : > { %3913 = vmatpush.bf16.msra.mxu0 %v3200_v18  ;;  %v2173_v18 = vld [vmem:[%s7909_s5 + $0x410] sm:$0xff]  ;;  %v3742_v60 = vadd.f32 %v3741_v57, %v3693_v36  ;;  %v3698_v57 = vadd.f32 %v7408_v10, %v3649_v28  ;;  %v4750_v36 = vld [vmem:[%s7910_s6 + $0x98] sm:$0xf] }
 0x509   : > { %3914 = vmatpush.bf16.msra.mxu0 %v3199_v5  ;;  %v7577_v5 = vadd.f32 %v3098_v52, %v2173_v18  ;;  %v3819_v45 = vpop.f32.mrf.mxu1  ;;  %v4907_v18 = vor.u32 %v5051_v48, %v4904_v3 }
 0x50a   : > { %v7599_v46 = vadd.f32 %v3819_v45, %v7479_v24  ;;  %v2175_v24 = vld [vmem:[%s7909_s5 + $0x420] sm:$0xff]  ;;  %v3287_v45 = vld [vmem:[%s7911_s7 + $0x48] sm:$0xff] }
 0x50c   : > { %v3100_v12 = vpop.f32.mrf.mxu3 }
 0x50d   : > { %v7579_v30 = vadd.f32 %v3100_v12, %v2174_v19  ;;  %3915 = vmatpush.bf16.msra.mxu0 %v3198_v8  ;;  %v3780_v40 = vpop.f32.mrf.mxu0  ;;  %v4875_v8 = vor.u32 %v5043_v33, %v4872_v47  ;;  %v2178_v33 = vld [vmem:[%s7909_s5 + $0x438] sm:$0xff] }
 0x50e   : > { %v3781_v6 = vadd.f32 %v3780_v40, %v7485_v42  ;;  %v3746_v42 = vpop.f32.mrf.mxu2  ;;  %v5016_v40 = vld [vmem:[%s7910_s6 + $0xb4] sm:$0xf0] }
 0x50f   : > { %v3207_v31 = vpack.c.bf16 %v7579_v30, %v7577_v5  ;;  %v3747_v61 = vadd.f32 %v3746_v42, %v3698_v57  ;;  %v4751_v17 = vor.u32 %v5016_v40, %v4750_v36  ;;  %v4720_v5 = vld [vmem:[%s7910_s6 + $0x78] sm:$0xf0] }
 0x510   : > { %3916 = vmatmul.bf16.vlgmr.msra.gmra.mxu0 %v4687_v39  ;;  %3897 = vmatmul.bf16.gmra.mxu2 %v4875_v8  ;;  %v3646_v8 = vadd.f32 %v7321_v55, %v3287_v45 }
 0x511   : > { %v7596_v41 = vpop.f32.mrf.mxu1 }
 0x514   : > { %v3103_v32 = vpop.f32.mrf.mxu3 }
 0x515   : > { %v7601_v59 = vpop.f32.mrf.mxu0  ;;  %v7619_v44 = vadd.f32 %v3103_v32, %v2175_v24 }
 0x516   : > { %v3748_v19 = vpop.f32.mrf.mxu2 }
 0x519   : > { %v3824_v27 = vpop.f32.mrf.mxu1 }
 0x51a   : > { %v7635_v10 = vadd.f32 %v3824_v27, %v7539_v25  ;;  %v2177_v25 = vld [vmem:[%s7909_s5 + $0x430] sm:$0xff] }
 0x51c   : > { %v3105_v13 = vpop.f32.mrf.mxu3 }
 0x51d   : > { %v7621_v4 = vadd.f32 %v3105_v13, %v2176_v29  ;;  %v3785_v16 = vpop.f32.mrf.mxu0 }
 0x51e   : > { %v3786_v51 = vadd.f32 %v3785_v16, %v3737_v21  ;;  %v3290_v21 = vld [vmem:[%s7911_s7 + $0x60] sm:$0xff]  ;;  %v3751_v42 = vpop.f32.mrf.mxu2 }
 0x51f   : > { %v3208_v52 = vpack.c.bf16 %v7621_v4, %v7619_v44  ;;  %v3654_v47 = vadd.f32 %v7378_v11, %v3290_v21  ;;  %v5004_v44 = vld [vmem:[%s7910_s6 + $0x5c] sm:$0xf] }
 0x520   : > { %3921 = vmatmul.bf16.gmra.mxu0 %v4719_v14  ;;  %3902 = vmatmul.bf16.gmra.mxu2 %v4907_v18  ;;  %v3695_v14 = vadd.f32 %v7395_v0, %v3646_v8  ;;  %v3289_v0 = vld [vmem:[%s7911_s7 + $0x58] sm:$0xff]  ;;  %v4723_v30 = vor.u32 %v5004_v44, %v4720_v5  ;;  %v3778_v5 = vadd.f32 %v7554_v49, %v7443_v15 }
 0x521   : > { %v7632_v12 = vpop.f32.mrf.mxu1  ;;  %v3703_v28 = vadd.f32 %v7458_v7, %v3654_v47  ;;  %v3292_v7 = vld [vmem:[%s7911_s7 + $0x70] sm:$0xff]  ;;  %v3651_v21 = vadd.f32 %v7355_v43, %v3289_v0  ;;  %v4784_v4 = vld [vmem:[%s7910_s6 + $0xf8] sm:$0xf0]  ;;  %v3783_v49 = vadd.f32 %v7601_v59, %v7504_v50 }
 0x522   : > { %v3744_v57 = vadd.f32 %v7584_v23, %v3695_v14  ;;  %v5024_v23 = vld [vmem:[%s7910_s6 + $0xf4] sm:$0xf0] }
 0x523   : > { %v3752_v27 = vadd.f32 %v3751_v42, %v3703_v28  ;;  %v3700_v47 = vadd.f32 %v7439_v26, %v3651_v21  ;;  %v4814_v26 = vld [vmem:[%s7910_s6 + $0x118] sm:$0xf] }
 0x524   : > { %v3108_v54 = vpop.f32.mrf.mxu3 }
 0x525   : > { %v7637_v39 = vpop.f32.mrf.mxu0  ;;  %v7659_v37 = vadd.f32 %v3108_v54, %v2177_v25 }
 0x526   : > { %v3753_v48 = vpop.f32.mrf.mxu2 }
 0x529   : > { %v3829_v24 = vpop.f32.mrf.mxu1 }
 0x52a   : > { %v7672_v3 = vadd.f32 %v3829_v24, %v3781_v6  ;;  %v3659_v6 = vadd.f32 %v7420_v1, %v3292_v7  ;;  %v3749_v24 = vadd.f32 %v3748_v19, %v3700_v47 }
 0x52c   : > { %v3110_v32 = vpop.f32.mrf.mxu3  ;;  %v3708_v25 = vadd.f32 %v7521_v56, %v3659_v6  ;;  %v3291_v56 = vld [vmem:[%s7911_s7 + $0x68] sm:$0xff] }
 0x52d   : > { %v7661_v34 = vadd.f32 %v3110_v32, %v2178_v33  ;;  %v3790_v13 = vpop.f32.mrf.mxu0  ;;  %v3656_v19 = vadd.f32 %v7397_v62, %v3291_v56  ;;  %v3293_v62 = vld [vmem:[%s7911_s7 + $0x78] sm:$0xff] }
 0x52e   : > { %v3791_v11 = vadd.f32 %v3790_v13, %v3742_v60  ;;  %v4782_v60 = vld [vmem:[%s7910_s6 + $0xd8] sm:$0xf]  ;;  %v3756_v32 = vpop.f32.mrf.mxu2 }
 0x52f   : > { %v3209_v29 = vpack.c.bf16 %v7661_v34, %v7659_v37  ;;  %v4783_v36 = vor.u32 %v5024_v23, %v4782_v60  ;;  %v3705_v7 = vadd.f32 %v7496_v9, %v3656_v19  ;;  %v5040_v9 = vld [vmem:[%s7910_s6 + $0x174] sm:$0xf0]  ;;  %v4688_v37 = vld [vmem:[%s7910_s6 + $0x38] sm:$0xf0] }
 0x530   : > { %3926 = vmatmul.bf16.gmra.mxu0 %v4751_v17  ;;  %v3757_v17 = vadd.f32 %v3756_v32, %v3708_v25 }
 0x531   : > { %v7670_v16 = vpop.f32.mrf.mxu1  ;;  %v3754_v23 = vadd.f32 %v3753_v48, %v3705_v7 }
 0x534   : > { %v7667_v55 = vpop.f32.mrf.mxu3 }
 0x535   : > { %v3792_v18 = vpop.f32.mrf.mxu0 }
 0x536   : > { %v3793_v54 = vadd.f32 %v3792_v18, %v3744_v57 }
 0x539   : > { %v3834_v40 = vpop.f32.mrf.mxu1 }
 0x53a   : > { %v7696_v1 = vadd.f32 %v3834_v40, %v3786_v51 }
 0x53c   : > { %v7688_v45 = vpop.f32.mrf.mxu3 }
 0x53d   : > { %v3795_v33 = vpop.f32.mrf.mxu0 }
 0x53e   : > { %v3796_v8 = vadd.f32 %v3795_v33, %v3747_v61  ;;  %v5032_v61 = vld [vmem:[%s7910_s6 + $0x134] sm:$0xf0] }
 0x53f   : > { %v4815_v57 = vor.u32 %v5032_v61, %v4814_v26  ;;  %v4846_v33 = vld [vmem:[%s7910_s6 + $0x158] sm:$0xf] }
 0x540   : > { %3931 = vmatmul.bf16.gmra.mxu0 %v4783_v36  ;;  %v4847_v48 = vor.u32 %v5040_v9, %v4846_v33  ;;  %v2183_v33 = vld [vmem:[%s7909_s5 + $0x460] sm:$0xff] }
 0x541   : > { %v7694_v28 = vpop.f32.mrf.mxu1 }
 0x544   : > { %v7692_v42 = vpop.f32.mrf.mxu3 }
 0x545   : > { %v3797_v43 = vpop.f32.mrf.mxu0 }
 0x546   : > { %v3798_v13 = vadd.f32 %v3797_v43, %v3749_v24  ;;  %v3758_v43 = vpop.f32.mrf.mxu2 }
 0x549   : > { %v3839_v51 = vpop.f32.mrf.mxu1 }
 0x54a   : > { %v7709_v21 = vadd.f32 %v3839_v51, %v3791_v11 }
 0x54c   : > { %v3120_v14 = vpop.f32.mrf.mxu3 }
 0x54d   : > { %v3800_v18 = vpop.f32.mrf.mxu0 }
 0x54e   : > { %v3801_v0 = vadd.f32 %v3800_v18, %v3752_v27  ;;  %v3661_v27 = vadd.f32 %v7441_v20, %v3293_v62  ;;  %v4878_v20 = vld [vmem:[%s7910_s6 + $0x198] sm:$0xf] }
 0x550   : > { %3936 = vmatmul.bf16.gmra.mxu0 %v4815_v57  ;;  %v3710_v32 = vadd.f32 %v7552_v63, %v3661_v27  ;;  %v5048_v63 = vld [vmem:[%s7910_s6 + $0x1b4] sm:$0xf0] }
 0x551   : > { %v3841_v6 = vpop.f32.mrf.mxu1 }
 0x552   : > { %v7711_v36 = vadd.f32 %v3841_v6, %v3793_v54  ;;  %v3759_v26 = vadd.f32 %v3758_v43, %v3710_v32 }
 0x554   : > { %v3123_v60 = vpop.f32.mrf.mxu3 }
 0x555   : > { %v3802_v40 = vpop.f32.mrf.mxu0 }
 0x556   : > { %v3803_v25 = vadd.f32 %v3802_v40, %v3754_v23  ;;  %v4879_v23 = vor.u32 %v5048_v63, %v4878_v20 }
 0x559   : > { %v3844_v54 = vpop.f32.mrf.mxu1 }
 0x55a   : > { %v7724_v19 = vadd.f32 %v3844_v54, %v3796_v8  ;;  %v2186_v8 = vld [vmem:[%s7909_s5 + $0x478] sm:$0xff]  ;;  %v3124_v54 = vadd.f32 %v3123_v60, %v2183_v33 }
 0x55b   : > { %v4880_v33 = vld [vmem:[%s7910_s6 + $0x1b8] sm:$0xf0] }
 0x55c   : > { %v3125_v11 = vpop.f32.mrf.mxu3 }
 0x55d   : > { %v3805_v47 = vpop.f32.mrf.mxu0 }
 0x55e   : > { %v3806_v24 = vadd.f32 %v3805_v47, %v3757_v17  ;;  %v2185_v17 = vld [vmem:[%s7909_s5 + $0x470] sm:$0xff] }
 0x55f   : > { %v2181_v47 = vld [vmem:[%s7909_s5 + $0x450] sm:$0xff] }
 0x560   : > { %3941 = vmatmul.bf16.gmra.mxu0 %v4847_v48  ;;  %v2182_v48 = vld [vmem:[%s7909_s5 + $0x458] sm:$0xff] }
 0x561   : > { %v3846_v61 = vpop.f32.mrf.mxu1  ;;  %v3121_v32 = vadd.f32 %v3120_v14, %v2182_v48 }
 0x562   : > { %v7726_v57 = vadd.f32 %v3846_v61, %v3798_v13  ;;  %v2184_v13 = vld [vmem:[%s7909_s5 + $0x468] sm:$0xff]  ;;  %v2179_v61 = vld [vmem:[%s7909_s5 + $0x440] sm:$0xff] }
 0x563   : > { %v3126_v9 = vadd.f32 %v3125_v11, %v2184_v13  ;;  %v3119_v11 = vadd.f32 %v7692_v42, %v2181_v47  ;;  %v3114_v63 = vadd.f32 %v7667_v55, %v2179_v61  ;;  %v4910_v42 = vld [vmem:[%s7910_s6 + $0x1d8] sm:$0xf]  ;;  %v5052_v47 = vld [vmem:[%s7910_s6 + $0x1dc] sm:$0xf] }
 0x564   : > { %v3128_v56 = vpop.f32.mrf.mxu3 }
 0x565   : > { %v3807_v51 = vpop.f32.mrf.mxu0  ;;  %v3129_v6 = vadd.f32 %v3128_v56, %v2185_v17  ;;  %v3212_v43 = vpack.c.bf16 %v3126_v9, %v3124_v54  ;;  %v2180_v56 = vld [vmem:[%s7909_s5 + $0x448] sm:$0xff]  ;;  %v3211_v14 = vpack.c.bf16 %v3121_v32, %v3119_v11  ;;  %v5056_v17 = vld [vmem:[%s7910_s6 + $0x1f4] sm:$0xf0]  ;;  %v4912_v32 = vld [vmem:[%s7910_s6 + $0x1f8] sm:$0xf0] }
 0x566   : > { %v7728_v18 = vadd.f32 %v3807_v51, %v3759_v26  ;;  %v3116_v20 = vadd.f32 %v7688_v45, %v2180_v56  ;;  %v4911_v13 = vor.u32 %v5056_v17, %v4910_v42 }
 0x569   : > { %v3849_v62 = vpop.f32.mrf.mxu1 }
 0x56a   : > { %v7761_v60 = vadd.f32 %v3849_v62, %v3801_v0  ;;  %v4996_v0 = vld [vmem:[%s7910_s6 + $0x1c] sm:$0xf] }
 0x56b   : > { %v4691_v34 = vor.u32 %v4996_v0, %v4688_v37  ;;  %v5044_v62 = vld [vmem:[%s7910_s6 + $0x19c] sm:$0xf] }
 0x56c   : > { %v3130_v7 = vpop.f32.mrf.mxu3 }
 0x56d   : > { %v3131_v40 = vadd.f32 %v3130_v7, %v2186_v8  ;;  %v3210_v8 = vpack.c.bf16 %v3116_v20, %v3114_v63  ;;  %v5036_v7 = vld [vmem:[%s7910_s6 + $0x15c] sm:$0xf]  ;;  %v3773_v63 = vadd.f32 %v7502_v53, %v7399_v35 }
 0x56f   : > { %v3213_v27 = vpack.c.bf16 %v3131_v40, %v3129_v6  ;;  %v3868_v40 = vpop.f32.mrf.mxu2 }
 0x570   : > { %3946 = vmatmul.bf16.gmra.mxu0 %v4879_v23  ;;  %v4848_v23 = vld [vmem:[%s7910_s6 + $0x178] sm:$0xf0] }
 0x571   : > { %3957 = vmatpush.bf16.msrb.mxu1 %v3213_v27  ;;  %v3851_v26 = vpop.f32.mrf.mxu1  ;;  %v4851_v6 = vor.u32 %v5036_v7, %v4848_v23  ;;  %v4883_v27 = vor.u32 %v5044_v62, %v4880_v33 }
 0x572   : > { %v7763_v51 = vadd.f32 %v3851_v26, %v3803_v25  ;;  %v4816_v25 = vld [vmem:[%s7910_s6 + $0x138] sm:$0xf0] }
 0x575   : > { %3958 = vmatpush.bf16.msrb.mxu1 %v3212_v43  ;;  %v4915_v43 = vor.u32 %v5052_v47, %v4912_v32 }
 0x577   : > { %v3870_v48 = vpop.f32.mrf.mxu2 }
 0x579   : > { %3959 = vmatpush.bf16.msrb.mxu1 %v3211_v14  ;;  %v3854_v55 = vpop.f32.mrf.mxu1  ;;  %v3869_v14 = vadd.f32 %v3868_v40, %v7599_v46 }
 0x57a   : > { %v7779_v45 = vadd.f32 %v3854_v55, %v3806_v24 }
 0x57d   : > { %3960 = vmatpush.bf16.msrb.mxu1 %v3210_v8 }
 0x57f   : > { %v3873_v56 = vpop.f32.mrf.mxu2 }
 0x580   : > { %3951 = vmatmul.bf16.gmra.mxu0 %v4911_v13  ;;  %v3822_v13 = vadd.f32 %v7596_v41, %v3773_v63 }
 0x581   : > { %3961 = vmatpush.bf16.msrb.mxu1 %v3209_v29  ;;  %v5028_v29 = vld [vmem:[%s7910_s6 + $0x11c] sm:$0xf]  ;;  %v7835_v26 = vpop.f32.mrf.mxu1 }
 0x582   : > { %v4819_v24 = vor.u32 %v5028_v29, %v4816_v25  ;;  %v3871_v55 = vadd.f32 %v3870_v48, %v3822_v13  ;;  %v3788_v48 = vadd.f32 %v7637_v39, %v7556_v2 }
 0x584   : > { %v3837_v32 = vadd.f32 %v7694_v28, %v3788_v48 }
 0x585   : > { %3962 = vmatpush.bf16.msrb.mxu1 %v3208_v52 }
 0x587   : > { %v3875_v61 = vpop.f32.mrf.mxu2 }
 0x589   : > { %3963 = vmatpush.bf16.msrb.mxu1 %v3207_v31  ;;  %v5012_v31 = vld [vmem:[%s7910_s6 + $0x9c] sm:$0xf] }
 0x58a   : > { %v4755_v58 = vor.u32 %v5012_v31, %v4752_v38 }
 0x58d   : > { %3964 = vmatpush.bf16.msrb.mxu1 %v3206_v22  ;;  %v5020_v22 = vld [vmem:[%s7910_s6 + $0xdc] sm:$0xf]  ;;  %v3917_v9 = vpop.f32.mrf.mxu0 }
 0x58e   : > { %v4787_v52 = vor.u32 %v5020_v22, %v4784_v4  ;;  %v3918_v42 = vadd.f32 %v3917_v9, %v3869_v14 }
 0x58f   : > { %v3878_v46 = vpop.f32.mrf.mxu2 }
 0x590   : > { %3965 = vmatmul.bf16.vlgmr.msrb.gmra.mxu1 %v4691_v34  ;;  %v3874_v34 = vadd.f32 %v3873_v56, %v7635_v10  ;;  %v3879_v15 = vadd.f32 %v3878_v46, %v7672_v3 }
 0x595   : > { %v3919_v54 = vpop.f32.mrf.mxu0 }
 0x596   : > { %v3920_v35 = vadd.f32 %v3919_v54, %v3871_v55 }
 0x597   : > { %v3880_v44 = vpop.f32.mrf.mxu2 }
 0x59d   : > { %v3922_v11 = vpop.f32.mrf.mxu0 }
 0x5a0   : > { %3970 = vmatmul.bf16.gmra.mxu1 %v4723_v30  ;;  %v3923_v30 = vadd.f32 %v3922_v11, %v3874_v34 }
 0x5a5   : > { %v3924_v20 = vpop.f32.mrf.mxu0 }
 0x5ad   : > { %v3927_v0 = vpop.f32.mrf.mxu0 }
 0x5b0   : > { %3975 = vmatmul.bf16.gmra.mxu1 %v4755_v58  ;;  %v3827_v58 = vadd.f32 %v7632_v12, %v3778_v5 }
 0x5b2   : > { %v3876_v22 = vadd.f32 %v3875_v61, %v3827_v58 }
 0x5b4   : > { %v3925_v4 = vadd.f32 %v3924_v20, %v3876_v22 }
 0x5b5   : > { %v3929_v41 = vpop.f32.mrf.mxu0 }
 0x5bd   : > { %v3932_v10 = vpop.f32.mrf.mxu0 }
 0x5c0   : > { %3980 = vmatmul.bf16.gmra.mxu1 %v4787_v52  ;;  %v3883_v52 = vpop.f32.mrf.mxu2 }
 0x5c1   : > { %v3884_v50 = vadd.f32 %v3883_v52, %v7696_v1 }
 0x5c3   : > { %v3933_v54 = vadd.f32 %v3932_v10, %v3884_v50 }
 0x5c5   : > { %v3934_v40 = vpop.f32.mrf.mxu0 }
 0x5c8   : > { %v3885_v23 = vpop.f32.mrf.mxu2 }
 0x5cd   : > { %v3937_v59 = vpop.f32.mrf.mxu0 }
 0x5d0   : > { %3985 = vmatmul.bf16.gmra.mxu1 %v4819_v24  ;;  %v3928_v24 = vadd.f32 %v3927_v0, %v3879_v15  ;;  %v3888_v3 = vpop.f32.mrf.mxu2 }
 0x5d1   : > { %v3889_v1 = vadd.f32 %v3888_v3, %v7709_v21 }
 0x5d3   : > { %v3938_v2 = vadd.f32 %v3937_v59, %v3889_v1 }
 0x5d5   : > { %v3939_v61 = vpop.f32.mrf.mxu0 }
 0x5d8   : > { %v3890_v56 = vpop.f32.mrf.mxu2 }
 0x5d9   : > { %v3891_v28 = vadd.f32 %v3890_v56, %v7711_v36 }
 0x5e0   : > { %3990 = vmatmul.bf16.gmra.mxu1 %v4851_v6  ;;  %v3832_v6 = vadd.f32 %v7670_v16, %v3783_v49  ;;  %v3893_v39 = vpop.f32.mrf.mxu2 }
 0x5e1   : > { %v3894_v21 = vadd.f32 %v3893_v39, %v7724_v19 }
 0x5e2   : > { %v3881_v62 = vadd.f32 %v3880_v44, %v3832_v6 }
 0x5e4   : > { %v3930_v33 = vadd.f32 %v3929_v41, %v3881_v62 }
 0x5e8   : > { %v3895_v55 = vpop.f32.mrf.mxu2 }
 0x5e9   : > { %v3896_v44 = vadd.f32 %v3895_v55, %v7726_v57 }
 0x5f0   : > { %3995 = vmatmul.bf16.gmra.mxu1 %v4883_v27  ;;  %v3898_v34 = vpop.f32.mrf.mxu2 }
 0x600   : > { %4000 = vmatmul.bf16.gmra.mxu1 %v4915_v43  ;;  %v3886_v43 = vadd.f32 %v3885_v23, %v3837_v32  ;;  %v3857_v23 = vadd.f32 %v7835_v26, %v7728_v18 }
 0x602   : > { %v3935_v11 = vadd.f32 %v3934_v40, %v3886_v43 }
 0x60d   : > { %v3966_v17 = vpop.f32.mrf.mxu1 }
 0x60e   : > { %v3967_v8 = vadd.f32 %v3966_v17, %v3918_v42  ;;  %v3942_v17 = vpop.f32.mrf.mxu0 }
 0x610   : > { %4006 = vst.msk [vmem:[%s7845_s21] sm:$0xff] %vm3133_vm12, %v3967_v8  ;;  %v3940_v8 = vadd.f32 %v3939_v61, %v3891_v28 }
 0x615   : > { %v3968_v53 = vpop.f32.mrf.mxu1 }
 0x616   : > { %v3969_v37 = vadd.f32 %v3968_v53, %v3920_v35  ;;  %v3944_v0 = vpop.f32.mrf.mxu0  ;;  %v3943_v35 = vadd.f32 %v3942_v17, %v3894_v21 }
 0x617   : > { %v3945_v5 = vadd.f32 %v3944_v0, %v3896_v44 }
 0x618   : > { %4007 = vst.msk [vmem:[%s7845_s21 + $0x8] sm:$0xff] %vm3133_vm12, %v3969_v37 }
 0x61d   : > { %v3971_v31 = vpop.f32.mrf.mxu1 }
 0x61e   : > { %v3972_v38 = vadd.f32 %v3971_v31, %v3923_v30  ;;  %v3947_v36 = vpop.f32.mrf.mxu0  ;;  %v3899_v31 = vadd.f32 %v3898_v34, %v7761_v60 }
 0x620   : > { %4008 = vst.msk [vmem:[%s7845_s21 + $0x10] sm:$0xff] %vm3133_vm12, %v3972_v38  ;;  %v3900_v38 = vpop.f32.mrf.mxu2  ;;  %v3948_v19 = vadd.f32 %v3947_v36, %v3899_v31 }
 0x621   : > { %v3901_v52 = vadd.f32 %v3900_v38, %v7763_v51 }
 0x625   : > { %v3973_v29 = vpop.f32.mrf.mxu1 }
 0x626   : > { %v3974_v25 = vadd.f32 %v3973_v29, %v3925_v4  ;;  %v3949_v58 = vpop.f32.mrf.mxu0 }
 0x627   : > { %v3950_v57 = vadd.f32 %v3949_v58, %v3901_v52 }
 0x628   : > { %4009 = vst.msk [vmem:[%s7845_s21 + $0x18] sm:$0xff] %vm3133_vm12, %v3974_v25  ;;  %v3903_v29 = vpop.f32.mrf.mxu2 }
 0x629   : > { %v3904_v60 = vadd.f32 %v3903_v29, %v7779_v45 }
 0x62d   : > { %v3976_v7 = vpop.f32.mrf.mxu1 }
 0x62e   : > { %v3977_v12 = vadd.f32 %v3976_v7, %v3928_v24  ;;  %v3952_v15 = vpop.f32.mrf.mxu0 }
 0x62f   : > { %v3953_v49 = vadd.f32 %v3952_v15, %v3904_v60 }
 0x630   : > { %4010 = vst.msk [vmem:[%s7845_s21 + $0x20] sm:$0xff] %vm3133_vm12, %v3977_v12  ;;  %v3905_v12 = vpop.f32.mrf.mxu2 }
 0x631   : > { %v3906_v6 = vadd.f32 %v3905_v12, %v3857_v23 }
 0x635   : > { %v3978_v9 = vpop.f32.mrf.mxu1 }
 0x636   : > { %v3979_v27 = vadd.f32 %v3978_v9, %v3930_v33  ;;  %v3954_v51 = vpop.f32.mrf.mxu0 }
 0x637   : > { %v3955_v40 = vadd.f32 %v3954_v51, %v3906_v6 }
 0x638   : > { %4011 = vst.msk [vmem:[%s7845_s21 + $0x28] sm:$0xff] %vm3133_vm12, %v3979_v27 }
 0x63d   : > { %v3981_v16 = vpop.f32.mrf.mxu1 }
 0x63e   : > { %v3982_v47 = vadd.f32 %v3981_v16, %v3933_v54 }
 0x640   : > { %4012 = vst.msk [vmem:[%s7845_s21 + $0x30] sm:$0xff] %vm3133_vm12, %v3982_v47 }
 0x645   : > { %v3983_v20 = vpop.f32.mrf.mxu1 }
 0x646   : > { %v3984_v14 = vadd.f32 %v3983_v20, %v3935_v11 }
 0x648   : > { %4013 = vst.msk [vmem:[%s7845_s21 + $0x38] sm:$0xff] %vm3133_vm12, %v3984_v14 }
 0x64d   : > { %v3986_v63 = vpop.f32.mrf.mxu1 }
 0x64e   : > { %v3987_v42 = vadd.f32 %v3986_v63, %v3938_v2 }
 0x650   : > { %4014 = vst.msk [vmem:[%s7845_s21 + $0x40] sm:$0xff] %vm3133_vm12, %v3987_v42 }
 0x655   : > { %v3988_v13 = vpop.f32.mrf.mxu1 }
 0x656   : > { %v3989_v46 = vadd.f32 %v3988_v13, %v3940_v8 }
 0x658   : > { %4015 = vst.msk [vmem:[%s7845_s21 + $0x48] sm:$0xff] %vm3133_vm12, %v3989_v46 }
 0x65d   : > { %v3991_v53 = vpop.f32.mrf.mxu1 }
 0x65e   : > { %v3992_v37 = vadd.f32 %v3991_v53, %v3943_v35 }
 0x660   : > { %4016 = vst.msk [vmem:[%s7845_s21 + $0x50] sm:$0xff] %vm3133_vm12, %v3992_v37 }
 0x665   : > { %v3993_v30 = vpop.f32.mrf.mxu1 }
 0x666   : > { %v3994_v41 = vadd.f32 %v3993_v30, %v3945_v5 }
 0x668   : > { %4017 = vst.msk [vmem:[%s7845_s21 + $0x58] sm:$0xff] %vm3133_vm12, %v3994_v41 }
 0x66d   : > { %v3996_v22 = vpop.f32.mrf.mxu1 }
 0x66e   : > { %v3997_v4 = vadd.f32 %v3996_v22, %v3948_v19 }
 0x670   : > { %4018 = vst.msk [vmem:[%s7845_s21 + $0x60] sm:$0xff] %vm3133_vm12, %v3997_v4 }
 0x675   : > { %v3998_v25 = vpop.f32.mrf.mxu1 }
 0x676   : > { %v3999_v10 = vadd.f32 %v3998_v25, %v3950_v57 }
 0x678   : > { %4019 = vst.msk [vmem:[%s7845_s21 + $0x68] sm:$0xff] %vm3133_vm12, %v3999_v10 }
 0x67d   : > { %v4001_v24 = vpop.f32.mrf.mxu1 }
 0x67e   : > { %v4002_v7 = vadd.f32 %v4001_v24, %v3953_v49 }
 0x680   : > { %4020 = vst.msk [vmem:[%s7845_s21 + $0x70] sm:$0xff] %vm3133_vm12, %v4002_v7 }
 0x685   : > { %v4003_v62 = vpop.f32.mrf.mxu1 }
 0x686   : > { %v4004_v33 = vadd.f32 %v4003_v62, %v3955_v40 }
 0x688   : > { %4021 = vst.msk [vmem:[%s7845_s21 + $0x78] sm:$0xff] %vm3133_vm12, %v4004_v33 }
 0x689 PF: > { %s20_s30 = sadd.s32 1, %s5140_s30  }
 0x68a   : > { %p17_p4 = scmp.ge.s32.totalorder %s20_s30, 4  }
 0x68c   :  { %19 = sbr.rel (!%p17_p4) target bundleno = 1 (0x1), region = 111 }

</bundles_post_ra>
